<compile_context>
chip_gen: v7x
topology: tpu7x:2x2x1
jax: 0.10.0
libtpu: 0.0.40
codegen_flags: <defaults>
</compile_context>

<pallas_src>
import jax
import jax.numpy as jnp
from jax.experimental import pallas as pl
from jax.experimental.pallas import tpu as pltpu

_EPS = 1e-5
_VMEM_LIMIT = 48 * 1024 * 1024   # explicit scoped-VMEM limit with headroom (v7x: 64 MiB phys)


def _mosaic_params():
    return pltpu.CompilerParams(
        dimension_semantics=("parallel",),     # batch grid axis -> megacore sharding on v7x
        vmem_limit_bytes=_VMEM_LIMIT,
    )


# ----------------------------------------------------------------------------------
# In-kernel helpers
# ----------------------------------------------------------------------------------
def _zero_border(pad_ref, H, W, C):
    """Zero only the 1-pixel border ring of a (H+2, W+2, C) VMEM scratch."""
    pad_ref[0:1, :, :] = jnp.zeros((1, W + 2, C), jnp.float32)
    pad_ref[H + 1:H + 2, :, :] = jnp.zeros((1, W + 2, C), jnp.float32)
    pad_ref[:, 0:1, :] = jnp.zeros((H + 2, 1, C), jnp.float32)
    pad_ref[:, W + 1:W + 2, :] = jnp.zeros((H + 2, 1, C), jnp.float32)


def _im2col(xp, H, W):
    """xp: (H+2, W+2, C) zero-padded map -> (H*W, 9*C) patches (tap-major, channel-minor)."""
    C = xp.shape[-1]
    cols = [xp[dy:dy + H, dx:dx + W, :] for dy in range(3) for dx in range(3)]
    return jnp.concatenate(cols, axis=-1).reshape(H * W, 9 * C)


# ----------------------------------------------------------------------------------
# Kernel 1: fused (pad + channel-concat) + conv1 as one bf16 MXU dot + BN1 partials
# ----------------------------------------------------------------------------------
def _concat_conv1_kernel(x2_ref, x1_ref, w_ref, b_ref, h_ref, st_ref, pad_ref):
    # x2_ref: (1,H,W,C2) bf16 skip;  x1_ref: (1,H,W,C1) bf16 upsampled (+diff-pad folded)
    # w_ref : (9*(C2+C1), Cmid) bf16 im2col conv1 weight (channel order = cat([x2, x1]))
    # b_ref : (1, Cmid) f32
    # h_ref : (1,H,W,Cmid) f32  raw conv1 output (pre-BN)
    # st_ref: (1,2,Cmid) f32    per-image [sum, sum_sq] partials for global BN1 stats
    # pad_ref: VMEM (H+2, W+2, C2+C1) f32 scratch (zero-padded concat, never hits HBM)
    _, H, W, _ = x2_ref.shape
    Cin = pad_ref.shape[-1]
    Cm = w_ref.shape[-1]

    _zero_border(pad_ref, H, W, Cin)
    cat = jnp.concatenate([x2_ref[0], x1_ref[0]], axis=-1).astype(jnp.float32)
    pad_ref[1:H + 1, 1:W + 1, :] = cat

    patches = _im2col(pad_ref[...], H, W).astype(jnp.bfloat16)      # (H*W, 9*Cin)
    h = jnp.dot(patches, w_ref[...], preferred_element_type=jnp.float32) + b_ref[...]

    h_ref[...] = h.reshape(1, H, W, Cm)
    s = jnp.sum(h, axis=0, keepdims=True)
    ss = jnp.sum(h * h, axis=0, keepdims=True)
    st_ref[...] = jnp.concatenate([s, ss], axis=0)[None]


# ----------------------------------------------------------------------------------
# Kernel 2: BN1 + ReLU + conv2 (one bf16 MXU dot) + BN2 partials
# ----------------------------------------------------------------------------------
def _bn_relu_conv2_kernel(h_ref, sc_ref, sh_ref, w_ref, b_ref, o_ref, st_ref, pad_ref):
    # h_ref : (1,H,W,Cm) f32 raw conv1 output;  sc/sh: (1,Cm) folded BN1 scale/shift
    # w_ref : (9*Cm, Cout) bf16;  b_ref: (1,Cout) f32
    # o_ref : (1,H,W,Cout) f32 raw conv2 output;  st_ref: (1,2,Cout) f32 BN2 partials
    # pad_ref: VMEM (H+2, W+2, Cm) f32 scratch
    _, H, W, Cm = h_ref.shape
    Co = w_ref.shape[-1]

    act = jnp.maximum(h_ref[0] * sc_ref[0] + sh_ref[0], 0.0)        # BN1 + ReLU (f32)
    _zero_border(pad_ref, H, W, Cm)
    pad_ref[1:H + 1, 1:W + 1, :] = act

    patches = _im2col(pad_ref[...], H, W).astype(jnp.bfloat16)      # (H*W, 9*Cm)
    h = jnp.dot(patches, w_ref[...], preferred_element_type=jnp.float32) + b_ref[...]

    o_ref[...] = h.reshape(1, H, W, Co)
    s = jnp.sum(h, axis=0, keepdims=True)
    ss = jnp.sum(h * h, axis=0, keepdims=True)
    st_ref[...] = jnp.concatenate([s, ss], axis=0)[None]


# ----------------------------------------------------------------------------------
# Kernel 3: BN2 + ReLU (elementwise)
# ----------------------------------------------------------------------------------
def _bn_relu_kernel(h_ref, sc_ref, sh_ref, o_ref):
    o_ref[...] = jnp.maximum(h_ref[...] * sc_ref[0] + sh_ref[0], 0.0)


# ----------------------------------------------------------------------------------
# JAX-side glue
# ----------------------------------------------------------------------------------
def _interp_matrix(n_in, n_out):
    """align_corners=True bilinear interpolation matrix (n_out, n_in)."""
    if n_in == 1:
        return jnp.ones((n_out, 1), jnp.float32)
    src = jnp.arange(n_out, dtype=jnp.float32) * ((n_in - 1) / (n_out - 1))
    i0 = jnp.clip(jnp.floor(src).astype(jnp.int32), 0, n_in - 2)
    frac = src - i0.astype(jnp.float32)
    rows = jnp.arange(n_out)
    m = jnp.zeros((n_out, n_in), jnp.float32)
    m = m.at[rows, i0].add(1.0 - frac)
    m = m.at[rows, i0 + 1].add(frac)
    return m


def _bn_fold(stats, gamma, beta, count):
    """Finalize global (N*H*W) batch stats; fold BN into per-channel scale/shift."""
    s = jnp.sum(stats[:, 0, :], axis=0)
    ss = jnp.sum(stats[:, 1, :], axis=0)
    mean = s / count
    var = jnp.maximum(ss / count - mean * mean, 0.0)     # biased var (train-mode BN)
    scale = gamma.reshape(-1) * jax.lax.rsqrt(var + _EPS)
    shift = beta.reshape(-1) - mean * scale
    return (scale.reshape(1, -1).astype(jnp.float32),
            shift.reshape(1, -1).astype(jnp.float32))


def up_forward_nhwc(x1, x2, params):
    """x1: (N,H1,W1,C1) low-res feature map; x2: (N,H,W,C2) skip. Returns (N,H,W,Cout)."""
    w1, b1, g1, bt1, w2, b2, g2, bt2 = params
    N, H1, W1, C1 = x1.shape
    _, H, W, C2 = x2.shape
    Cin = C2 + C1
    Cm = w1.shape[-1]
    Co = w2.shape[-1]
    count = N * H * W

    # Bilinear upsample (align_corners=True); F.pad is folded into the interp matrices
    # so the diff-padded x1 is produced directly (no separate pad / concat arrays in HBM).
    # TODO(synk): negative diffX/diffY (upsampled larger than skip -> crop) not handled.
    diffY = H - 2 * H1
    diffX = W - 2 * W1
    MyP = jnp.pad(_interp_matrix(H1, 2 * H1), ((diffY // 2, diffY - diffY // 2), (0, 0)))
    MxP = jnp.pad(_interp_matrix(W1, 2 * W1), ((diffX // 2, diffX - diffX // 2), (0, 0)))
    x1u = jnp.einsum('ph,nhwc->npwc', MyP, x1.astype(jnp.float32))
    x1u = jnp.einsum('qw,npwc->npqc', MxP, x1u).astype(jnp.bfloat16)   # (N,H,W,C1)
    x2b = x2.astype(jnp.bfloat16)

    # im2col weights (tap-major, channel-minor) in bf16 for the MXU.
    w1_2d = w1.reshape(9 * Cin, Cm).astype(jnp.bfloat16)
    w2_2d = w2.reshape(9 * Cm, Co).astype(jnp.bfloat16)
    b1r = b1.reshape(1, Cm).astype(jnp.float32)
    b2r = b2.reshape(1, Co).astype(jnp.float32)

    img = lambda c: pl.BlockSpec((1, H, W, c), lambda n: (n, 0, 0, 0))
    stat = lambda c: pl.BlockSpec((1, 2, c), lambda n: (n, 0, 0))
    full = lambda shape: pl.BlockSpec(shape, lambda n: (0, 0))

    # --- stage 1: fused concat/pad + conv1 + BN1 partial stats --------------------
    cost1 = pl.CostEstimate(
        flops=2 * count * 9 * Cin * Cm, transcendentals=0,
        bytes_accessed=2 * count * Cin + 2 * 9 * Cin * Cm + 4 * count * Cm + 8 * N * Cm)
    h1, st1 = pl.pallas_call(
        _concat_conv1_kernel,
        out_shape=(jax.ShapeDtypeStruct((N, H, W, Cm), jnp.float32),
                   jax.ShapeDtypeStruct((N, 2, Cm), jnp.float32)),
        grid=(N,),
        in_specs=[img(C2), img(C1), full((9 * Cin, Cm)), full((1, Cm))],
        out_specs=[img(Cm), stat(Cm)],
        scratch_shapes=[pltpu.VMEM((H + 2, W + 2, Cin), jnp.float32)],
        compiler_params=_mosaic_params(),
        cost_estimate=cost1,
    )(x2b, x1u, w1_2d, b1r)
    sc1, sh1 = _bn_fold(st1, g1, bt1, count)

    # --- stage 2: BN1+ReLU + conv2 + BN2 partial stats ---------------------------
    cost2 = pl.CostEstimate(
        flops=2 * count * 9 * Cm * Co + 4 * count * Cm, transcendentals=0,
        bytes_accessed=4 * count * Cm + 2 * 9 * Cm * Co + 4 * count * Co + 8 * N * Co)
    h2, st2 = pl.pallas_call(
        _bn_relu_conv2_kernel,
        out_shape=(jax.ShapeDtypeStruct((N, H, W, Co), jnp.float32),
                   jax.ShapeDtypeStruct((N, 2, Co), jnp.float32)),
        grid=(N,),
        in_specs=[img(Cm), full((1, Cm)), full((1, Cm)),
                  full((9 * Cm, Co)), full((1, Co))],
        out_specs=[img(Co), stat(Co)],
        scratch_shapes=[pltpu.VMEM((H + 2, W + 2, Cm), jnp.float32)],
        compiler_params=_mosaic_params(),
        cost_estimate=cost2,
    )(h1, sc1, sh1, w2_2d, b2r)
    sc2, sh2 = _bn_fold(st2, g2, bt2, count)

    # --- stage 3: BN2 + ReLU ------------------------------------------------------
    cost3 = pl.CostEstimate(flops=3 * count * Co, transcendentals=0,
                            bytes_accessed=8 * count * Co)
    y = pl.pallas_call(
        _bn_relu_kernel,
        out_shape=jax.ShapeDtypeStruct((N, H, W, Co), jnp.float32),
        grid=(N,),
        in_specs=[img(Co), full((1, Co)), full((1, Co))],
        out_specs=img(Co),
        compiler_params=_mosaic_params(),
        cost_estimate=cost3,
    )(h2, sc2, sh2)
    return y


def up_forward(x1_nchw, x2_nchw, params):
    """Thin NCHW adapter mirroring the PyTorch module; prefer up_forward_nhwc to avoid
    the boundary transposes when the surrounding graph is already channels-last."""
    x1 = jnp.transpose(x1_nchw, (0, 2, 3, 1)).astype(jnp.float32)
    x2 = jnp.transpose(x2_nchw, (0, 2, 3, 1)).astype(jnp.float32)
    y = up_forward_nhwc(x1, x2, params)
    return jnp.transpose(y, (0, 3, 1, 2))


# ----------------------------------------------------------------------------------
# Deterministic parameters (shapes implied by Up(in_channels, out_channels))
# ----------------------------------------------------------------------------------
def init_params(in_channels, out_channels, key):
    cmid = cout = out_channels
    k1, k2, k3, k4 = jax.random.split(key, 4)
    # PyTorch conv weight layout (Cout, Cin, kH, kW) -> HWIO (kH, kW, Cin, Cout)
    w1_t = 0.1 * jax.random.normal(k1, (cmid, in_channels, 3, 3), jnp.float32)
    w2_t = 0.1 * jax.random.normal(k3, (cout, cmid, 3, 3), jnp.float32)
    w1 = jnp.transpose(w1_t, (2, 3, 1, 0))
    w2 = jnp.transpose(w2_t, (2, 3, 1, 0))
    b1 = 0.1 * jax.random.normal(k2, (cmid,), jnp.float32)
    b2 = 0.1 * jax.random.normal(k4, (cout,), jnp.float32)
    g1 = jnp.ones((cmid,), jnp.float32)
    bt1 = jnp.zeros((cmid,), jnp.float32)
    g2 = jnp.ones((cout,), jnp.float32)
    bt2 = jnp.zeros((cout,), jnp.float32)
    return (w1, b1, g1, bt1, w2, b2, g2, bt2)


# ----------------------------------------------------------------------------------
# Pure-JAX f32 reference (for a loose numerical check against the bf16-MXU kernels)
# ----------------------------------------------------------------------------------
def _reference_nhwc(x1, x2, params):
    w1, b1, g1, bt1, w2, b2, g2, bt2 = params
    _, H1, W1, _ = x1.shape
    _, H, W, _ = x2.shape
    diffY = H - 2 * H1
    diffX = W - 2 * W1
    My = _interp_matrix(H1, 2 * H1)
    Mx = _interp_matrix(W1, 2 * W1)
    x1u = jnp.einsum('ph,nhwc->npwc', My, x1)
    x1u = jnp.einsum('qw,npwc->npqc', Mx, x1u)
    x1u = jnp.pad(x1u, ((0, 0), (diffY // 2, diffY - diffY // 2),
                        (diffX // 2, diffX - diffX // 2), (0, 0)))
    x = jnp.concatenate([x2, x1u], axis=-1)

    def conv_bn_relu(z, w, b, g, bt):
        y = jax.lax.conv_general_dilated(
            z, w, (1, 1), 'SAME', dimension_numbers=('NHWC', 'HWIO', 'NHWC')) + b
        mean = jnp.mean(y, axis=(0, 1, 2))
        var = jnp.mean(jnp.square(y - mean), axis=(0, 1, 2))
        return jnp.maximum((y - mean) * jax.lax.rsqrt(var + _EPS) * g + bt, 0.0)

    return conv_bn_relu(conv_bn_relu(x, w1, b1, g1, bt1), w2, b2, g2, bt2)


if __name__ == "__main__":
    in_channels, out_channels = 8, 4
    N, H2, W2 = 2, 16, 16

    key = jax.random.PRNGKey(0)
    kx1, kx2, kp = jax.random.split(key, 3)
    # x1: lower-resolution feature map (in_channels // 2 channels), NCHW
    x1 = jax.random.normal(kx1, (N, in_channels // 2, H2 // 2, W2 // 2), jnp.float32)
    # x2: skip connection (in_channels // 2 channels), NCHW
    x2 = jax.random.normal(kx2, (N, in_channels // 2, H2, W2), jnp.float32)

    params = init_params(in_channels, out_channels, kp)

    out = jax.jit(up_forward)(x1, x2, params)
    out = jax.block_until_ready(out)
    assert out.shape == (N, out_channels, H2, W2), out.shape
    assert bool(jnp.all(jnp.isfinite(out)))

    # numerical check vs pure-JAX f32 reference (bf16 MXU inputs -> loose tolerance)
    ref = _reference_nhwc(jnp.transpose(x1, (0, 2, 3, 1)),
                          jnp.transpose(x2, (0, 2, 3, 1)), params)
    ref = jnp.transpose(ref, (0, 3, 1, 2))
    err = float(jnp.max(jnp.abs(out - ref)))
    assert err < 0.25, f"max abs err vs reference: {err}"

    print("KERNEL_OK")
</pallas_src>

<mosaic_0001>
module attributes {stable_mosaic.version = 11 : i64} {
  func.func private @main(%arg0: i32) attributes {dimension_semantics = [#tpu.dimension_semantics<core_parallel>], iteration_bounds = array<i64: 2>, tpu.core_type = #tpu.core_type<sc_scalar_subcore>, window_params = []} {
    return
  }
}

module attributes {stable_mosaic.version = 11 : i64} {
  func.func private @main(%arg0: i32) attributes {dimension_semantics = [#tpu.dimension_semantics<core_parallel>], iteration_bounds = array<i64: 2>, tpu.core_type = #tpu.core_type<sc_scalar_subcore>, window_params = []} {
    return
  }
}

module attributes {stable_mosaic.version = 11 : i64} {
  func.func @_concat_conv1_kernel(%arg0: i32, %arg1: memref<1x16x16x4xbf16, #tpu.memory_space<vmem>>, %arg2: memref<1x16x16x4xbf16, #tpu.memory_space<vmem>>, %arg3: memref<72x4xbf16, #tpu.memory_space<vmem>>, %arg4: memref<1x4xf32, #tpu.memory_space<vmem>>, %arg5: memref<1x16x16x4xf32, #tpu.memory_space<vmem>>, %arg6: memref<1x2x4xf32, #tpu.memory_space<vmem>>, %arg7: memref<18x18x8xf32, #tpu.memory_space<vmem>>) attributes {dimension_semantics = [#tpu.dimension_semantics<parallel>], iteration_bounds = array<i64: 2>, scalar_prefetch = 0 : i64, scratch_operands = 1 : i64, tpu.core_type = #tpu.core_type<tc>, window_params = [{transform_indices = @transform_0, window_bounds = array<i64: 1, 16, 16, 4>}, {transform_indices = @transform_1, window_bounds = array<i64: 1, 16, 16, 4>}, {pipeline_mode = #tpu.pipeline_mode<synchronous>, transform_indices = @transform_2, window_bounds = array<i64: 72, 4>}, {pipeline_mode = #tpu.pipeline_mode<synchronous>, transform_indices = @transform_3, window_bounds = array<i64: 1, 4>}, {transform_indices = @transform_4, window_bounds = array<i64: 1, 16, 16, 4>}, {transform_indices = @transform_5, window_bounds = array<i64: 1, 2, 4>}]} {
    %cst = arith.constant 0.000000e+00 : f32
    %0 = vector.broadcast %cst : f32 to vector<1x18x8xf32>
    %c0 = arith.constant 0 : index
    %c0_0 = arith.constant 0 : index
    %c0_1 = arith.constant 0 : index
    %1 = vector.load %arg7[%c0, %c0_0, %c0_1] : memref<18x18x8xf32, #tpu.memory_space<vmem>>, vector<1x18x8xf32>
    tpu.vector_store %arg7[%c0, %c0_0, %c0_1], %0 {strides = array<i32>} : memref<18x18x8xf32, #tpu.memory_space<vmem>>, vector<1x18x8xf32>,
    %cst_2 = arith.constant 0.000000e+00 : f32
    %2 = vector.broadcast %cst_2 : f32 to vector<1x18x8xf32>
    %c17 = arith.constant 17 : index
    %c0_3 = arith.constant 0 : index
    %c0_4 = arith.constant 0 : index
    %3 = vector.load %arg7[%c17, %c0_3, %c0_4] : memref<18x18x8xf32, #tpu.memory_space<vmem>>, vector<1x18x8xf32>
    tpu.vector_store %arg7[%c17, %c0_3, %c0_4], %2 {strides = array<i32>} : memref<18x18x8xf32, #tpu.memory_space<vmem>>, vector<1x18x8xf32>,
    %cst_5 = arith.constant 0.000000e+00 : f32
    %4 = vector.broadcast %cst_5 : f32 to vector<18x1x8xf32>
    %c0_6 = arith.constant 0 : index
    %c0_7 = arith.constant 0 : index
    %c0_8 = arith.constant 0 : index
    %5 = vector.load %arg7[%c0_6, %c0_7, %c0_8] : memref<18x18x8xf32, #tpu.memory_space<vmem>>, vector<18x1x8xf32>
    tpu.vector_store %arg7[%c0_6, %c0_7, %c0_8], %4 {strides = array<i32>} : memref<18x18x8xf32, #tpu.memory_space<vmem>>, vector<18x1x8xf32>,
    %cst_9 = arith.constant 0.000000e+00 : f32
    %6 = vector.broadcast %cst_9 : f32 to vector<18x1x8xf32>
    %c0_10 = arith.constant 0 : index
    %c17_11 = arith.constant 17 : index
    %c0_12 = arith.constant 0 : index
    %7 = vector.load %arg7[%c0_10, %c17_11, %c0_12] : memref<18x18x8xf32, #tpu.memory_space<vmem>>, vector<18x1x8xf32>
    tpu.vector_store %arg7[%c0_10, %c17_11, %c0_12], %6 {strides = array<i32>} : memref<18x18x8xf32, #tpu.memory_space<vmem>>, vector<18x1x8xf32>,
    %c0_13 = arith.constant 0 : index
    %c0_14 = arith.constant 0 : index
    %c0_15 = arith.constant 0 : index
    %c0_16 = arith.constant 0 : index
    %8 = vector.load %arg1[%c0_13, %c0_14, %c0_15, %c0_16] : memref<1x16x16x4xbf16, #tpu.memory_space<vmem>>, vector<1x16x16x4xbf16>
    %9 = vector.shape_cast %8 : vector<1x16x16x4xbf16> to vector<16x16x4xbf16>
    %c0_17 = arith.constant 0 : index
    %c0_18 = arith.constant 0 : index
    %c0_19 = arith.constant 0 : index
    %c0_20 = arith.constant 0 : index
    %10 = vector.load %arg2[%c0_17, %c0_18, %c0_19, %c0_20] : memref<1x16x16x4xbf16, #tpu.memory_space<vmem>>, vector<1x16x16x4xbf16>
    %11 = vector.shape_cast %10 : vector<1x16x16x4xbf16> to vector<16x16x4xbf16>
    %12 = tpu.concatenate %9, %11 in 2 : vector<16x16x4xbf16>, vector<16x16x4xbf16> -> vector<16x16x8xbf16>
    %13 = arith.extf %12 : vector<16x16x8xbf16> to vector<16x16x8xf32>
    %c1 = arith.constant 1 : index
    %c1_21 = arith.constant 1 : index
    %c0_22 = arith.constant 0 : index
    %14 = vector.load %arg7[%c1, %c1_21, %c0_22] : memref<18x18x8xf32, #tpu.memory_space<vmem>>, vector<16x16x8xf32>
    tpu.vector_store %arg7[%c1, %c1_21, %c0_22], %13 {strides = array<i32>} : memref<18x18x8xf32, #tpu.memory_space<vmem>>, vector<16x16x8xf32>,
    %c0_23 = arith.constant 0 : index
    %c0_24 = arith.constant 0 : index
    %c0_25 = arith.constant 0 : index
    %15 = vector.load %arg7[%c0_23, %c0_24, %c0_25] : memref<18x18x8xf32, #tpu.memory_space<vmem>>, vector<18x18x8xf32>
    %16 = vector.extract_strided_slice %15 {offsets = [0, 0, 0], sizes = [16, 16, 8], strides = [1, 1, 1]} : vector<18x18x8xf32> to vector<16x16x8xf32>
    %17 = vector.extract_strided_slice %15 {offsets = [0, 1, 0], sizes = [16, 16, 8], strides = [1, 1, 1]} : vector<18x18x8xf32> to vector<16x16x8xf32>
    %18 = vector.extract_strided_slice %15 {offsets = [0, 2, 0], sizes = [16, 16, 8], strides = [1, 1, 1]} : vector<18x18x8xf32> to vector<16x16x8xf32>
    %19 = vector.extract_strided_slice %15 {offsets = [1, 0, 0], sizes = [16, 16, 8], strides = [1, 1, 1]} : vector<18x18x8xf32> to vector<16x16x8xf32>
    %20 = vector.extract_strided_slice %15 {offsets = [1, 1, 0], sizes = [16, 16, 8], strides = [1, 1, 1]} : vector<18x18x8xf32> to vector<16x16x8xf32>
    %21 = vector.extract_strided_slice %15 {offsets = [1, 2, 0], sizes = [16, 16, 8], strides = [1, 1, 1]} : vector<18x18x8xf32> to vector<16x16x8xf32>
    %22 = vector.extract_strided_slice %15 {offsets = [2, 0, 0], sizes = [16, 16, 8], strides = [1, 1, 1]} : vector<18x18x8xf32> to vector<16x16x8xf32>
    %23 = vector.extract_strided_slice %15 {offsets = [2, 1, 0], sizes = [16, 16, 8], strides = [1, 1, 1]} : vector<18x18x8xf32> to vector<16x16x8xf32>
    %24 = vector.extract_strided_slice %15 {offsets = [2, 2, 0], sizes = [16, 16, 8], strides = [1, 1, 1]} : vector<18x18x8xf32> to vector<16x16x8xf32>
    %25 = tpu.concatenate %16, %17, %18, %19, %20, %21, %22, %23, %24 in 2 : vector<16x16x8xf32>, vector<16x16x8xf32>, vector<16x16x8xf32>, vector<16x16x8xf32>, vector<16x16x8xf32>, vector<16x16x8xf32>, vector<16x16x8xf32>, vector<16x16x8xf32>, vector<16x16x8xf32> -> vector<16x16x72xf32>
    %26 = vector.shape_cast %25 : vector<16x16x72xf32> to vector<256x72xf32>
    %27 = arith.truncf %26 : vector<256x72xf32> to vector<256x72xbf16>
    %c0_26 = arith.constant 0 : index
    %c0_27 = arith.constant 0 : index
    %28 = vector.load %arg3[%c0_26, %c0_27] : memref<72x4xbf16, #tpu.memory_space<vmem>>, vector<72x4xbf16>
    %cst_28 = arith.constant dense<0.000000e+00> : vector<256x4xf32>
    %29 = tpu.matmul %27, %28, %cst_28 {dimension_numbers = #tpu.dot_dimension_numbers<[1], [0], [0], [1], [0, 0, 1, 1], [], []>} : vector<256x72xbf16>, vector<72x4xbf16>, vector<256x4xf32> -> vector<256x4xf32>
    %c0_29 = arith.constant 0 : index
    %c0_30 = arith.constant 0 : index
    %30 = vector.load %arg4[%c0_29, %c0_30] : memref<1x4xf32, #tpu.memory_space<vmem>>, vector<1x4xf32>
    %31 = vector.broadcast %30 : vector<1x4xf32> to vector<256x4xf32>
    %32 = arith.addf %29, %31 : vector<256x4xf32>
    %33 = vector.shape_cast %32 : vector<256x4xf32> to vector<1x16x16x4xf32>
    %c0_31 = arith.constant 0 : index
    %c0_32 = arith.constant 0 : index
    %c0_33 = arith.constant 0 : index
    %c0_34 = arith.constant 0 : index
    %34 = vector.load %arg5[%c0_31, %c0_32, %c0_33, %c0_34] : memref<1x16x16x4xf32, #tpu.memory_space<vmem>>, vector<1x16x16x4xf32>
    tpu.vector_store %arg5[%c0_31, %c0_32, %c0_33, %c0_34], %33 {strides = array<i32>} : memref<1x16x16x4xf32, #tpu.memory_space<vmem>>, vector<1x16x16x4xf32>,
    %cst_35 = arith.constant dense<0.000000e+00> : vector<4xf32>
    %35 = vector.multi_reduction <add>, %32, %cst_35 [0] : vector<256x4xf32> to vector<4xf32>
    %36 = vector.shape_cast %35 : vector<4xf32> to vector<1x4xf32>
    %37 = arith.mulf %32, %32 : vector<256x4xf32>
    %cst_36 = arith.constant dense<0.000000e+00> : vector<4xf32>
    %38 = vector.multi_reduction <add>, %37, %cst_36 [0] : vector<256x4xf32> to vector<4xf32>
    %39 = vector.shape_cast %38 : vector<4xf32> to vector<1x4xf32>
    %40 = tpu.concatenate %36, %39 in 0 : vector<1x4xf32>, vector<1x4xf32> -> vector<2x4xf32>
    %41 = vector.shape_cast %40 : vector<2x4xf32> to vector<1x2x4xf32>
    %c0_37 = arith.constant 0 : index
    %c0_38 = arith.constant 0 : index
    %c0_39 = arith.constant 0 : index
    %42 = vector.load %arg6[%c0_37, %c0_38, %c0_39] : memref<1x2x4xf32, #tpu.memory_space<vmem>>, vector<1x2x4xf32>
    tpu.vector_store %arg6[%c0_37, %c0_38, %c0_39], %41 {strides = array<i32>} : memref<1x2x4xf32, #tpu.memory_space<vmem>>, vector<1x2x4xf32>,
    return
  }
  func.func @transform_0(%arg0: i32) -> (i32, i32, i32, i32) {
    %c0_i32 = arith.constant 0 : i32
    %c0_i32_0 = arith.constant 0 : i32
    %c0_i32_1 = arith.constant 0 : i32
    %c0_i32_2 = arith.constant 0 : i32
    return %arg0, %c0_i32, %c0_i32_0, %c0_i32_1 : i32, i32, i32, i32
  }
  func.func @transform_1(%arg0: i32) -> (i32, i32, i32, i32) {
    %c0_i32 = arith.constant 0 : i32
    %c0_i32_0 = arith.constant 0 : i32
    %c0_i32_1 = arith.constant 0 : i32
    %c0_i32_2 = arith.constant 0 : i32
    return %arg0, %c0_i32, %c0_i32_0, %c0_i32_1 : i32, i32, i32, i32
  }
  func.func @transform_2(%arg0: i32) -> (i32, i32) {
    %c0_i32 = arith.constant 0 : i32
    %c0_i32_0 = arith.constant 0 : i32
    %c0_i32_1 = arith.constant 0 : i32
    return %c0_i32, %c0_i32_0 : i32, i32
  }
  func.func @transform_3(%arg0: i32) -> (i32, i32) {
    %c0_i32 = arith.constant 0 : i32
    %c0_i32_0 = arith.constant 0 : i32
    %c0_i32_1 = arith.constant 0 : i32
    return %c0_i32, %c0_i32_0 : i32, i32
  }
  func.func @transform_4(%arg0: i32) -> (i32, i32, i32, i32) {
    %c0_i32 = arith.constant 0 : i32
    %c0_i32_0 = arith.constant 0 : i32
    %c0_i32_1 = arith.constant 0 : i32
    %c0_i32_2 = arith.constant 0 : i32
    return %arg0, %c0_i32, %c0_i32_0, %c0_i32_1 : i32, i32, i32, i32
  }
  func.func @transform_5(%arg0: i32) -> (i32, i32, i32) {
    %c0_i32 = arith.constant 0 : i32
    %c0_i32_0 = arith.constant 0 : i32
    %c0_i32_1 = arith.constant 0 : i32
    return %arg0, %c0_i32, %c0_i32_0 : i32, i32, i32
  }
}

module attributes {stable_mosaic.version = 11 : i64} {
  func.func @_bn_relu_kernel(%arg0: i32, %arg1: memref<1x16x16x4xf32, #tpu.memory_space<vmem>>, %arg2: memref<1x4xf32, #tpu.memory_space<vmem>>, %arg3: memref<1x4xf32, #tpu.memory_space<vmem>>, %arg4: memref<1x16x16x4xf32, #tpu.memory_space<vmem>>) attributes {dimension_semantics = [#tpu.dimension_semantics<parallel>], iteration_bounds = array<i64: 2>, scalar_prefetch = 0 : i64, scratch_operands = 0 : i64, tpu.core_type = #tpu.core_type<tc>, window_params = [{transform_indices = @transform_0, window_bounds = array<i64: 1, 16, 16, 4>}, {pipeline_mode = #tpu.pipeline_mode<synchronous>, transform_indices = @transform_1, window_bounds = array<i64: 1, 4>}, {pipeline_mode = #tpu.pipeline_mode<synchronous>, transform_indices = @transform_2, window_bounds = array<i64: 1, 4>}, {transform_indices = @transform_3, window_bounds = array<i64: 1, 16, 16, 4>}]} {
    %c0 = arith.constant 0 : index
    %c0_0 = arith.constant 0 : index
    %c0_1 = arith.constant 0 : index
    %c0_2 = arith.constant 0 : index
    %0 = vector.load %arg1[%c0, %c0_0, %c0_1, %c0_2] : memref<1x16x16x4xf32, #tpu.memory_space<vmem>>, vector<1x16x16x4xf32>
    %c0_3 = arith.constant 0 : index
    %c0_4 = arith.constant 0 : index
    %1 = vector.load %arg2[%c0_3, %c0_4] : memref<1x4xf32, #tpu.memory_space<vmem>>, vector<1x4xf32>
    %2 = vector.shape_cast %1 : vector<1x4xf32> to vector<4xf32>
    %3 = vector.shape_cast %2 : vector<4xf32> to vector<1x1x1x4xf32>
    %4 = vector.broadcast %3 : vector<1x1x1x4xf32> to vector<1x16x16x4xf32>
    %5 = arith.mulf %0, %4 : vector<1x16x16x4xf32>
    %c0_5 = arith.constant 0 : index
    %c0_6 = arith.constant 0 : index
    %6 = vector.load %arg3[%c0_5, %c0_6] : memref<1x4xf32, #tpu.memory_space<vmem>>, vector<1x4xf32>
    %7 = vector.shape_cast %6 : vector<1x4xf32> to vector<4xf32>
    %8 = vector.shape_cast %7 : vector<4xf32> to vector<1x1x1x4xf32>
    %9 = vector.broadcast %8 : vector<1x1x1x4xf32> to vector<1x16x16x4xf32>
    %10 = arith.addf %5, %9 : vector<1x16x16x4xf32>
    %cst = arith.constant 0.000000e+00 : f32
    %11 = vector.broadcast %cst : f32 to vector<1x16x16x4xf32>
    %12 = arith.maximumf %10, %11 : vector<1x16x16x4xf32>
    %c0_7 = arith.constant 0 : index
    %c0_8 = arith.constant 0 : index
    %c0_9 = arith.constant 0 : index
    %c0_10 = arith.constant 0 : index
    %13 = vector.load %arg4[%c0_7, %c0_8, %c0_9, %c0_10] : memref<1x16x16x4xf32, #tpu.memory_space<vmem>>, vector<1x16x16x4xf32>
    tpu.vector_store %arg4[%c0_7, %c0_8, %c0_9, %c0_10], %12 {strides = array<i32>} : memref<1x16x16x4xf32, #tpu.memory_space<vmem>>, vector<1x16x16x4xf32>,
    return
  }
  func.func @transform_0(%arg0: i32) -> (i32, i32, i32, i32) {
    %c0_i32 = arith.constant 0 : i32
    %c0_i32_0 = arith.constant 0 : i32
    %c0_i32_1 = arith.constant 0 : i32
    %c0_i32_2 = arith.constant 0 : i32
    return %arg0, %c0_i32, %c0_i32_0, %c0_i32_1 : i32, i32, i32, i32
  }
  func.func @transform_1(%arg0: i32) -> (i32, i32) {
    %c0_i32 = arith.constant 0 : i32
    %c0_i32_0 = arith.constant 0 : i32
    %c0_i32_1 = arith.constant 0 : i32
    return %c0_i32, %c0_i32_0 : i32, i32
  }
  func.func @transform_2(%arg0: i32) -> (i32, i32) {
    %c0_i32 = arith.constant 0 : i32
    %c0_i32_0 = arith.constant 0 : i32
    %c0_i32_1 = arith.constant 0 : i32
    return %c0_i32, %c0_i32_0 : i32, i32
  }
  func.func @transform_3(%arg0: i32) -> (i32, i32, i32, i32) {
    %c0_i32 = arith.constant 0 : i32
    %c0_i32_0 = arith.constant 0 : i32
    %c0_i32_1 = arith.constant 0 : i32
    %c0_i32_2 = arith.constant 0 : i32
    return %arg0, %c0_i32, %c0_i32_0, %c0_i32_1 : i32, i32, i32, i32
  }
}

module attributes {stable_mosaic.version = 11 : i64} {
  func.func @_bn_relu_conv2_kernel(%arg0: i32, %arg1: memref<1x16x16x4xf32, #tpu.memory_space<vmem>>, %arg2: memref<1x4xf32, #tpu.memory_space<vmem>>, %arg3: memref<1x4xf32, #tpu.memory_space<vmem>>, %arg4: memref<36x4xbf16, #tpu.memory_space<vmem>>, %arg5: memref<1x4xf32, #tpu.memory_space<vmem>>, %arg6: memref<1x16x16x4xf32, #tpu.memory_space<vmem>>, %arg7: memref<1x2x4xf32, #tpu.memory_space<vmem>>, %arg8: memref<18x18x4xf32, #tpu.memory_space<vmem>>) attributes {dimension_semantics = [#tpu.dimension_semantics<parallel>], iteration_bounds = array<i64: 2>, scalar_prefetch = 0 : i64, scratch_operands = 1 : i64, tpu.core_type = #tpu.core_type<tc>, window_params = [{transform_indices = @transform_0, window_bounds = array<i64: 1, 16, 16, 4>}, {pipeline_mode = #tpu.pipeline_mode<synchronous>, transform_indices = @transform_1, window_bounds = array<i64: 1, 4>}, {pipeline_mode = #tpu.pipeline_mode<synchronous>, transform_indices = @transform_2, window_bounds = array<i64: 1, 4>}, {pipeline_mode = #tpu.pipeline_mode<synchronous>, transform_indices = @transform_3, window_bounds = array<i64: 36, 4>}, {pipeline_mode = #tpu.pipeline_mode<synchronous>, transform_indices = @transform_4, window_bounds = array<i64: 1, 4>}, {transform_indices = @transform_5, window_bounds = array<i64: 1, 16, 16, 4>}, {transform_indices = @transform_6, window_bounds = array<i64: 1, 2, 4>}]} {
    %c0 = arith.constant 0 : index
    %c0_0 = arith.constant 0 : index
    %c0_1 = arith.constant 0 : index
    %c0_2 = arith.constant 0 : index
    %0 = vector.load %arg1[%c0, %c0_0, %c0_1, %c0_2] : memref<1x16x16x4xf32, #tpu.memory_space<vmem>>, vector<1x16x16x4xf32>
    %1 = vector.shape_cast %0 : vector<1x16x16x4xf32> to vector<16x16x4xf32>
    %c0_3 = arith.constant 0 : index
    %c0_4 = arith.constant 0 : index
    %2 = vector.load %arg2[%c0_3, %c0_4] : memref<1x4xf32, #tpu.memory_space<vmem>>, vector<1x4xf32>
    %3 = vector.shape_cast %2 : vector<1x4xf32> to vector<4xf32>
    %4 = vector.shape_cast %3 : vector<4xf32> to vector<1x1x4xf32>
    %5 = vector.broadcast %4 : vector<1x1x4xf32> to vector<16x16x4xf32>
    %6 = arith.mulf %1, %5 : vector<16x16x4xf32>
    %c0_5 = arith.constant 0 : index
    %c0_6 = arith.constant 0 : index
    %7 = vector.load %arg3[%c0_5, %c0_6] : memref<1x4xf32, #tpu.memory_space<vmem>>, vector<1x4xf32>
    %8 = vector.shape_cast %7 : vector<1x4xf32> to vector<4xf32>
    %9 = vector.shape_cast %8 : vector<4xf32> to vector<1x1x4xf32>
    %10 = vector.broadcast %9 : vector<1x1x4xf32> to vector<16x16x4xf32>
    %11 = arith.addf %6, %10 : vector<16x16x4xf32>
    %cst = arith.constant 0.000000e+00 : f32
    %12 = vector.broadcast %cst : f32 to vector<16x16x4xf32>
    %13 = arith.maximumf %11, %12 : vector<16x16x4xf32>
    %cst_7 = arith.constant 0.000000e+00 : f32
    %14 = vector.broadcast %cst_7 : f32 to vector<1x18x4xf32>
    %c0_8 = arith.constant 0 : index
    %c0_9 = arith.constant 0 : index
    %c0_10 = arith.constant 0 : index
    %15 = vector.load %arg8[%c0_8, %c0_9, %c0_10] : memref<18x18x4xf32, #tpu.memory_space<vmem>>, vector<1x18x4xf32>
    tpu.vector_store %arg8[%c0_8, %c0_9, %c0_10], %14 {strides = array<i32>} : memref<18x18x4xf32, #tpu.memory_space<vmem>>, vector<1x18x4xf32>,
    %cst_11 = arith.constant 0.000000e+00 : f32
    %16 = vector.broadcast %cst_11 : f32 to vector<1x18x4xf32>
    %c17 = arith.constant 17 : index
    %c0_12 = arith.constant 0 : index
    %c0_13 = arith.constant 0 : index
    %17 = vector.load %arg8[%c17, %c0_12, %c0_13] : memref<18x18x4xf32, #tpu.memory_space<vmem>>, vector<1x18x4xf32>
    tpu.vector_store %arg8[%c17, %c0_12, %c0_13], %16 {strides = array<i32>} : memref<18x18x4xf32, #tpu.memory_space<vmem>>, vector<1x18x4xf32>,
    %cst_14 = arith.constant 0.000000e+00 : f32
    %18 = vector.broadcast %cst_14 : f32 to vector<18x1x4xf32>
    %c0_15 = arith.constant 0 : index
    %c0_16 = arith.constant 0 : index
    %c0_17 = arith.constant 0 : index
    %19 = vector.load %arg8[%c0_15, %c0_16, %c0_17] : memref<18x18x4xf32, #tpu.memory_space<vmem>>, vector<18x1x4xf32>
    tpu.vector_store %arg8[%c0_15, %c0_16, %c0_17], %18 {strides = array<i32>} : memref<18x18x4xf32, #tpu.memory_space<vmem>>, vector<18x1x4xf32>,
    %cst_18 = arith.constant 0.000000e+00 : f32
    %20 = vector.broadcast %cst_18 : f32 to vector<18x1x4xf32>
    %c0_19 = arith.constant 0 : index
    %c17_20 = arith.constant 17 : index
    %c0_21 = arith.constant 0 : index
    %21 = vector.load %arg8[%c0_19, %c17_20, %c0_21] : memref<18x18x4xf32, #tpu.memory_space<vmem>>, vector<18x1x4xf32>
    tpu.vector_store %arg8[%c0_19, %c17_20, %c0_21], %20 {strides = array<i32>} : memref<18x18x4xf32, #tpu.memory_space<vmem>>, vector<18x1x4xf32>,
    %c1 = arith.constant 1 : index
    %c1_22 = arith.constant 1 : index
    %c0_23 = arith.constant 0 : index
    %22 = vector.load %arg8[%c1, %c1_22, %c0_23] : memref<18x18x4xf32, #tpu.memory_space<vmem>>, vector<16x16x4xf32>
    tpu.vector_store %arg8[%c1, %c1_22, %c0_23], %13 {strides = array<i32>} : memref<18x18x4xf32, #tpu.memory_space<vmem>>, vector<16x16x4xf32>,
    %c0_24 = arith.constant 0 : index
    %c0_25 = arith.constant 0 : index
    %c0_26 = arith.constant 0 : index
    %23 = vector.load %arg8[%c0_24, %c0_25, %c0_26] : memref<18x18x4xf32, #tpu.memory_space<vmem>>, vector<18x18x4xf32>
    %24 = vector.extract_strided_slice %23 {offsets = [0, 0, 0], sizes = [16, 16, 4], strides = [1, 1, 1]} : vector<18x18x4xf32> to vector<16x16x4xf32>
    %25 = vector.extract_strided_slice %23 {offsets = [0, 1, 0], sizes = [16, 16, 4], strides = [1, 1, 1]} : vector<18x18x4xf32> to vector<16x16x4xf32>
    %26 = vector.extract_strided_slice %23 {offsets = [0, 2, 0], sizes = [16, 16, 4], strides = [1, 1, 1]} : vector<18x18x4xf32> to vector<16x16x4xf32>
    %27 = vector.extract_strided_slice %23 {offsets = [1, 0, 0], sizes = [16, 16, 4], strides = [1, 1, 1]} : vector<18x18x4xf32> to vector<16x16x4xf32>
    %28 = vector.extract_strided_slice %23 {offsets = [1, 1, 0], sizes = [16, 16, 4], strides = [1, 1, 1]} : vector<18x18x4xf32> to vector<16x16x4xf32>
    %29 = vector.extract_strided_slice %23 {offsets = [1, 2, 0], sizes = [16, 16, 4], strides = [1, 1, 1]} : vector<18x18x4xf32> to vector<16x16x4xf32>
    %30 = vector.extract_strided_slice %23 {offsets = [2, 0, 0], sizes = [16, 16, 4], strides = [1, 1, 1]} : vector<18x18x4xf32> to vector<16x16x4xf32>
    %31 = vector.extract_strided_slice %23 {offsets = [2, 1, 0], sizes = [16, 16, 4], strides = [1, 1, 1]} : vector<18x18x4xf32> to vector<16x16x4xf32>
    %32 = vector.extract_strided_slice %23 {offsets = [2, 2, 0], sizes = [16, 16, 4], strides = [1, 1, 1]} : vector<18x18x4xf32> to vector<16x16x4xf32>
    %33 = tpu.concatenate %24, %25, %26, %27, %28, %29, %30, %31, %32 in 2 : vector<16x16x4xf32>, vector<16x16x4xf32>, vector<16x16x4xf32>, vector<16x16x4xf32>, vector<16x16x4xf32>, vector<16x16x4xf32>, vector<16x16x4xf32>, vector<16x16x4xf32>, vector<16x16x4xf32> -> vector<16x16x36xf32>
    %34 = vector.shape_cast %33 : vector<16x16x36xf32> to vector<256x36xf32>
    %35 = arith.truncf %34 : vector<256x36xf32> to vector<256x36xbf16>
    %c0_27 = arith.constant 0 : index
    %c0_28 = arith.constant 0 : index
    %36 = vector.load %arg4[%c0_27, %c0_28] : memref<36x4xbf16, #tpu.memory_space<vmem>>, vector<36x4xbf16>
    %cst_29 = arith.constant dense<0.000000e+00> : vector<256x4xf32>
    %37 = tpu.matmul %35, %36, %cst_29 {dimension_numbers = #tpu.dot_dimension_numbers<[1], [0], [0], [1], [0, 0, 1, 1], [], []>} : vector<256x36xbf16>, vector<36x4xbf16>, vector<256x4xf32> -> vector<256x4xf32>
    %c0_30 = arith.constant 0 : index
    %c0_31 = arith.constant 0 : index
    %38 = vector.load %arg5[%c0_30, %c0_31] : memref<1x4xf32, #tpu.memory_space<vmem>>, vector<1x4xf32>
    %39 = vector.broadcast %38 : vector<1x4xf32> to vector<256x4xf32>
    %40 = arith.addf %37, %39 : vector<256x4xf32>
    %41 = vector.shape_cast %40 : vector<256x4xf32> to vector<1x16x16x4xf32>
    %c0_32 = arith.constant 0 : index
    %c0_33 = arith.constant 0 : index
    %c0_34 = arith.constant 0 : index
    %c0_35 = arith.constant 0 : index
    %42 = vector.load %arg6[%c0_32, %c0_33, %c0_34, %c0_35] : memref<1x16x16x4xf32, #tpu.memory_space<vmem>>, vector<1x16x16x4xf32>
    tpu.vector_store %arg6[%c0_32, %c0_33, %c0_34, %c0_35], %41 {strides = array<i32>} : memref<1x16x16x4xf32, #tpu.memory_space<vmem>>, vector<1x16x16x4xf32>,
    %cst_36 = arith.constant dense<0.000000e+00> : vector<4xf32>
    %43 = vector.multi_reduction <add>, %40, %cst_36 [0] : vector<256x4xf32> to vector<4xf32>
    %44 = vector.shape_cast %43 : vector<4xf32> to vector<1x4xf32>
    %45 = arith.mulf %40, %40 : vector<256x4xf32>
    %cst_37 = arith.constant dense<0.000000e+00> : vector<4xf32>
    %46 = vector.multi_reduction <add>, %45, %cst_37 [0] : vector<256x4xf32> to vector<4xf32>
    %47 = vector.shape_cast %46 : vector<4xf32> to vector<1x4xf32>
    %48 = tpu.concatenate %44, %47 in 0 : vector<1x4xf32>, vector<1x4xf32> -> vector<2x4xf32>
    %49 = vector.shape_cast %48 : vector<2x4xf32> to vector<1x2x4xf32>
    %c0_38 = arith.constant 0 : index
    %c0_39 = arith.constant 0 : index
    %c0_40 = arith.constant 0 : index
    %50 = vector.load %arg7[%c0_38, %c0_39, %c0_40] : memref<1x2x4xf32, #tpu.memory_space<vmem>>, vector<1x2x4xf32>
    tpu.vector_store %arg7[%c0_38, %c0_39, %c0_40], %49 {strides = array<i32>} : memref<1x2x4xf32, #tpu.memory_space<vmem>>, vector<1x2x4xf32>,
    return
  }
  func.func @transform_0(%arg0: i32) -> (i32, i32, i32, i32) {
    %c0_i32 = arith.constant 0 : i32
    %c0_i32_0 = arith.constant 0 : i32
    %c0_i32_1 = arith.constant 0 : i32
    %c0_i32_2 = arith.constant 0 : i32
    return %arg0, %c0_i32, %c0_i32_0, %c0_i32_1 : i32, i32, i32, i32
  }
  func.func @transform_1(%arg0: i32) -> (i32, i32) {
    %c0_i32 = arith.constant 0 : i32
    %c0_i32_0 = arith.constant 0 : i32
    %c0_i32_1 = arith.constant 0 : i32
    return %c0_i32, %c0_i32_0 : i32, i32
  }
  func.func @transform_2(%arg0: i32) -> (i32, i32) {
    %c0_i32 = arith.constant 0 : i32
    %c0_i32_0 = arith.constant 0 : i32
    %c0_i32_1 = arith.constant 0 : i32
    return %c0_i32, %c0_i32_0 : i32, i32
  }
  func.func @transform_3(%arg0: i32) -> (i32, i32) {
    %c0_i32 = arith.constant 0 : i32
    %c0_i32_0 = arith.constant 0 : i32
    %c0_i32_1 = arith.constant 0 : i32
    return %c0_i32, %c0_i32_0 : i32, i32
  }
  func.func @transform_4(%arg0: i32) -> (i32, i32) {
    %c0_i32 = arith.constant 0 : i32
    %c0_i32_0 = arith.constant 0 : i32
    %c0_i32_1 = arith.constant 0 : i32
    return %c0_i32, %c0_i32_0 : i32, i32
  }
  func.func @transform_5(%arg0: i32) -> (i32, i32, i32, i32) {
    %c0_i32 = arith.constant 0 : i32
    %c0_i32_0 = arith.constant 0 : i32
    %c0_i32_1 = arith.constant 0 : i32
    %c0_i32_2 = arith.constant 0 : i32
    return %arg0, %c0_i32, %c0_i32_0, %c0_i32_1 : i32, i32, i32, i32
  }
  func.func @transform_6(%arg0: i32) -> (i32, i32, i32) {
    %c0_i32 = arith.constant 0 : i32
    %c0_i32_0 = arith.constant 0 : i32
    %c0_i32_1 = arith.constant 0 : i32
    return %arg0, %c0_i32, %c0_i32_0 : i32, i32, i32
  }
}

</mosaic_0001>

<bundles_post_ra>
// kernel: up_forward.5
= control target key start
LH: loop header
LB: loop body
LE: loop exit
PB: predicated region body
PF: predicated region fallthrough
CT: control target
= control target key end

     0   :  { %s452_s12 = smov 0   ;;  %s643_s0 = inlined_call_operand.vmem [shape: f32[2,16,16,4], index: 0, kind: input, shape index: {}]   ;;  %s644_s1 = inlined_call_operand.vmem [shape: f32[1,4], index: 1, kind: input, shape index: {}]   ;;  %s645_s2 = inlined_call_operand.vmem [shape: f32[1,4], index: 2, kind: input, shape index: {}]   ;;  %s646_s3 = inlined_call_operand.vmem [shape: f32[2,16,16,4], index: 3, kind: output, shape index: {}]  }
   0x1 LB: > { %s401_s13 = sadd.s32 4294967295, %s430_s12   ;;  %p405_p0 = scmp.ge.s32.totalorder %s430_s12, 1  ;;  %s430_s12 = sphi %s452_s12, %s13_s12  }
   0x2   : > { %p137_p1 = scmp.lt.s32.totalorder %s430_s12, 3 }
   0x4   : > { %p138_p2 = pnand %p405_p0, %p137_p1 }
   0x5   : > { %p161_p3 = scmp.lt.s32.totalorder (!%p138_p2), %s401_s13, 1  ;;  %v463_v0 = vld [vmem:[%s644_s1] ss:$0 sm:$0xff] (!%p138_p2)  ;;  %vm313_vm0 = vcmask (!%p138_p2), 31744  }
   0x6   : > { %141 = sbr.rel (%p138_p2) target bundleno = 46 (0x2e), region = 32  ;;  %v473_v1 = vld [vmem:[%s645_s2] ss:$0 sm:$0xff] (!%p138_p2) }
   0xd   : > { %s648_s13 = smov (!%p161_p3, %s401_s13), 1 }
   0xe   : > { %s414_s14 = sshll.u32 %s648_s13, 8 }
   0xf   : > { %s468_s19 = scalar_lea.vmem %s643_s0, %s414_s14  ;;  %s496_s24 = scalar_lea.vmem %s646_s3, %s414_s14 }
  0x10   : > { %v171_v2 = vld [vmem:[%s468_s19] sm:$0xff]  ;;  %v172_v3 = vld [vmem:[%s468_s19 + $0x8] sm:$0xff]  ;;  %v173_v4 = vld [vmem:[%s468_s19 + $0x10] sm:$0xff] }
  0x11   : > { %v210_v5 = vmul.f32 %v463_v0, %v171_v2  ;;  %v211_v6 = vmul.f32 %v463_v0, %v172_v3  ;;  %v212_v7 = vmul.f32 %v463_v0, %v173_v4  ;;  %v174_v8 = vld [vmem:[%s468_s19 + $0x18] sm:$0xff]  ;;  %v175_v9 = vld [vmem:[%s468_s19 + $0x20] sm:$0xff]  ;;  %v176_v10 = vld [vmem:[%s468_s19 + $0x28] sm:$0xff] }
  0x12   : > { %v213_v11 = vmul.f32 %v463_v0, %v174_v8  ;;  %v214_v12 = vmul.f32 %v463_v0, %v175_v9  ;;  %v215_v13 = vmul.f32 %v463_v0, %v176_v10  ;;  %v177_v14 = vld [vmem:[%s468_s19 + $0x30] sm:$0xff]  ;;  %v178_v15 = vld [vmem:[%s468_s19 + $0x38] sm:$0xff]  ;;  %v179_v24 = vld [vmem:[%s468_s19 + $0x40] sm:$0xff] }
  0x13   : > { %v249_v16 = vadd.f32 %v473_v1, %v210_v5  ;;  %v250_v17 = vadd.f32 %v473_v1, %v211_v6  ;;  %v251_v18 = vadd.f32 %v473_v1, %v212_v7  ;;  %v216_v19 = vmul.f32 %v463_v0, %v177_v14  ;;  %v180_v25 = vld [vmem:[%s468_s19 + $0x48] sm:$0xff]  ;;  %v181_v26 = vld [vmem:[%s468_s19 + $0x50] sm:$0xff]  ;;  %v182_v31 = vld [vmem:[%s468_s19 + $0x58] sm:$0xff] }
  0x14   : > { %v252_v20 = vadd.f32 %v473_v1, %v213_v11  ;;  %v253_v21 = vadd.f32 %v473_v1, %v214_v12  ;;  %v254_v22 = vadd.f32 %v473_v1, %v215_v13  ;;  %v217_v23 = vmul.f32 %v463_v0, %v178_v15  ;;  %v183_v32 = vld [vmem:[%s468_s19 + $0x60] sm:$0xff]  ;;  %v184_v33 = vld [vmem:[%s468_s19 + $0x68] sm:$0xff]  ;;  %v185_v38 = vld [vmem:[%s468_s19 + $0x70] sm:$0xff] }
  0x15   : > { %v281_v27 = vmax.f32 %v249_v16, 0.0  ;;  %v282_v28 = vmax.f32 %v250_v17, 0.0  ;;  %v283_v29 = vmax.f32 %v251_v18, 0.0  ;;  %v255_v30 = vadd.f32 %v473_v1, %v216_v19  ;;  %v186_v43 = vld [vmem:[%s468_s19 + $0x78] sm:$0xff]  ;;  %v187_v56 = vld [vmem:[%s468_s19 + $0x80] sm:$0xff]  ;;  %v188_v57 = vld [vmem:[%s468_s19 + $0x88] sm:$0xff] }
  0x16   : > { %v284_v34 = vmax.f32 %v252_v20, 0.0  ;;  %v285_v35 = vmax.f32 %v253_v21, 0.0  ;;  %v286_v36 = vmax.f32 %v254_v22, 0.0  ;;  %v256_v37 = vadd.f32 %v473_v1, %v217_v23  ;;  %v189_v58 = vld [vmem:[%s468_s19 + $0x90] sm:$0xff]  ;;  %v190_v63 = vld [vmem:[%s468_s19 + $0x98] sm:$0xff]  ;;  %v191_v2 = vld [vmem:[%s468_s19 + $0xa0] sm:$0xff] }
  0x17   : > { %314 = vst.msk [vmem:[%s496_s24] sm:$0xff] %vm313_vm0, %v281_v27  ;;  %315 = vst.msk [vmem:[%s496_s24 + $0x8] sm:$0xff] %vm313_vm0, %v282_v28  ;;  %v287_v39 = vmax.f32 %v255_v30, 0.0  ;;  %v218_v40 = vmul.f32 %v463_v0, %v179_v24  ;;  %v219_v41 = vmul.f32 %v463_v0, %v180_v25  ;;  %v220_v42 = vmul.f32 %v463_v0, %v181_v26  ;;  %v192_v3 = vld [vmem:[%s468_s19 + $0xa8] sm:$0xff]  ;;  %v193_v8 = vld [vmem:[%s468_s19 + $0xb0] sm:$0xff] }
  0x18   : > { %316 = vst.msk [vmem:[%s496_s24 + $0x10] sm:$0xff] %vm313_vm0, %v283_v29  ;;  %317 = vst.msk [vmem:[%s496_s24 + $0x18] sm:$0xff] %vm313_vm0, %v284_v34  ;;  %v288_v44 = vmax.f32 %v256_v37, 0.0  ;;  %v221_v45 = vmul.f32 %v463_v0, %v182_v31  ;;  %v222_v46 = vmul.f32 %v463_v0, %v183_v32  ;;  %v223_v47 = vmul.f32 %v463_v0, %v184_v33  ;;  %v194_v13 = vld [vmem:[%s468_s19 + $0xb8] sm:$0xff]  ;;  %v195_v26 = vld [vmem:[%s468_s19 + $0xc0] sm:$0xff] }
  0x19   : > { %318 = vst.msk [vmem:[%s496_s24 + $0x20] sm:$0xff] %vm313_vm0, %v285_v35  ;;  %319 = vst.msk [vmem:[%s496_s24 + $0x28] sm:$0xff] %vm313_vm0, %v286_v36  ;;  %v257_v48 = vadd.f32 %v473_v1, %v218_v40  ;;  %v258_v49 = vadd.f32 %v473_v1, %v219_v41  ;;  %v259_v50 = vadd.f32 %v473_v1, %v220_v42  ;;  %v196_v27 = vld [vmem:[%s468_s19 + $0xc8] sm:$0xff]  ;;  %v197_v28 = vld [vmem:[%s468_s19 + $0xd0] sm:$0xff] }
  0x1a   : > { %320 = vst.msk [vmem:[%s496_s24 + $0x30] sm:$0xff] %vm313_vm0, %v287_v39  ;;  %v224_v51 = vmul.f32 %v463_v0, %v185_v38  ;;  %321 = vst.msk [vmem:[%s496_s24 + $0x38] sm:$0xff] %vm313_vm0, %v288_v44  ;;  %v260_v52 = vadd.f32 %v473_v1, %v221_v45  ;;  %v261_v53 = vadd.f32 %v473_v1, %v222_v46  ;;  %v198_v33 = vld [vmem:[%s468_s19 + $0xd8] sm:$0xff]  ;;  %v199_v34 = vld [vmem:[%s468_s19 + $0xe0] sm:$0xff] }
  0x1b   : > { %v262_v54 = vadd.f32 %v473_v1, %v223_v47  ;;  %v225_v55 = vmul.f32 %v463_v0, %v186_v43  ;;  %v289_v59 = vmax.f32 %v257_v48, 0.0  ;;  %v290_v60 = vmax.f32 %v258_v49, 0.0  ;;  %v200_v35 = vld [vmem:[%s468_s19 + $0xe8] sm:$0xff]  ;;  %v201_v40 = vld [vmem:[%s468_s19 + $0xf0] sm:$0xff]  ;;  %v202_v45 = vld [vmem:[%s468_s19 + $0xf8] sm:$0xff] }
  0x1c   : > { %v291_v61 = vmax.f32 %v259_v50, 0.0  ;;  %v263_v62 = vadd.f32 %v473_v1, %v224_v51  ;;  %v292_v4 = vmax.f32 %v260_v52, 0.0  ;;  %v293_v5 = vmax.f32 %v261_v53, 0.0 }
  0x1d   : > { %v294_v6 = vmax.f32 %v262_v54, 0.0  ;;  %v264_v7 = vadd.f32 %v473_v1, %v225_v55  ;;  %322 = vst.msk [vmem:[%s496_s24 + $0x40] sm:$0xff] %vm313_vm0, %v289_v59  ;;  %323 = vst.msk [vmem:[%s496_s24 + $0x48] sm:$0xff] %vm313_vm0, %v290_v60  ;;  %v226_v10 = vmul.f32 %v463_v0, %v187_v56  ;;  %v227_v11 = vmul.f32 %v463_v0, %v188_v57 }
  0x1e   : > { %324 = vst.msk [vmem:[%s496_s24 + $0x50] sm:$0xff] %vm313_vm0, %v291_v61  ;;  %v295_v9 = vmax.f32 %v263_v62, 0.0  ;;  %v228_v12 = vmul.f32 %v463_v0, %v189_v58  ;;  %325 = vst.msk [vmem:[%s496_s24 + $0x58] sm:$0xff] %vm313_vm0, %v292_v4  ;;  %v229_v15 = vmul.f32 %v463_v0, %v190_v63  ;;  %v230_v16 = vmul.f32 %v463_v0, %v191_v2 }
  0x1f   : > { %326 = vst.msk [vmem:[%s496_s24 + $0x60] sm:$0xff] %vm313_vm0, %v293_v5  ;;  %327 = vst.msk [vmem:[%s496_s24 + $0x68] sm:$0xff] %vm313_vm0, %v294_v6  ;;  %v296_v14 = vmax.f32 %v264_v7, 0.0  ;;  %v231_v17 = vmul.f32 %v463_v0, %v192_v3  ;;  %v265_v18 = vadd.f32 %v473_v1, %v226_v10  ;;  %v266_v19 = vadd.f32 %v473_v1, %v227_v11 }
  0x20   : > { %328 = vst.msk [vmem:[%s496_s24 + $0x70] sm:$0xff] %vm313_vm0, %v295_v9  ;;  %v267_v20 = vadd.f32 %v473_v1, %v228_v12  ;;  %v232_v21 = vmul.f32 %v463_v0, %v193_v8  ;;  %v268_v22 = vadd.f32 %v473_v1, %v229_v15  ;;  %v269_v23 = vadd.f32 %v473_v1, %v230_v16 }
  0x21   : > { %329 = vst.msk [vmem:[%s496_s24 + $0x78] sm:$0xff] %vm313_vm0, %v296_v14  ;;  %v270_v24 = vadd.f32 %v473_v1, %v231_v17  ;;  %v233_v25 = vmul.f32 %v463_v0, %v194_v13  ;;  %v297_v29 = vmax.f32 %v265_v18, 0.0  ;;  %v298_v30 = vmax.f32 %v266_v19, 0.0 }
  0x22   : > { %v299_v31 = vmax.f32 %v267_v20, 0.0  ;;  %v271_v32 = vadd.f32 %v473_v1, %v232_v21  ;;  %v300_v36 = vmax.f32 %v268_v22, 0.0  ;;  %v301_v37 = vmax.f32 %v269_v23, 0.0 }
  0x23   : > { %v302_v38 = vmax.f32 %v270_v24, 0.0  ;;  %v272_v39 = vadd.f32 %v473_v1, %v233_v25  ;;  %330 = vst.msk [vmem:[%s496_s24 + $0x80] sm:$0xff] %vm313_vm0, %v297_v29  ;;  %331 = vst.msk [vmem:[%s496_s24 + $0x88] sm:$0xff] %vm313_vm0, %v298_v30  ;;  %v234_v42 = vmul.f32 %v463_v0, %v195_v26  ;;  %v235_v43 = vmul.f32 %v463_v0, %v196_v27 }
  0x24   : > { %332 = vst.msk [vmem:[%s496_s24 + $0x90] sm:$0xff] %vm313_vm0, %v299_v31  ;;  %v303_v41 = vmax.f32 %v271_v32, 0.0  ;;  %v236_v44 = vmul.f32 %v463_v0, %v197_v28  ;;  %333 = vst.msk [vmem:[%s496_s24 + $0x98] sm:$0xff] %vm313_vm0, %v300_v36  ;;  %v237_v47 = vmul.f32 %v463_v0, %v198_v33  ;;  %v238_v48 = vmul.f32 %v463_v0, %v199_v34 }
  0x25   : > { %334 = vst.msk [vmem:[%s496_s24 + $0xa0] sm:$0xff] %vm313_vm0, %v301_v37  ;;  %335 = vst.msk [vmem:[%s496_s24 + $0xa8] sm:$0xff] %vm313_vm0, %v302_v38  ;;  %v304_v46 = vmax.f32 %v272_v39, 0.0  ;;  %v239_v49 = vmul.f32 %v463_v0, %v200_v35  ;;  %v273_v50 = vadd.f32 %v473_v1, %v234_v42  ;;  %v274_v51 = vadd.f32 %v473_v1, %v235_v43 }
  0x26   : > { %336 = vst.msk [vmem:[%s496_s24 + $0xb0] sm:$0xff] %vm313_vm0, %v303_v41  ;;  %v275_v52 = vadd.f32 %v473_v1, %v236_v44  ;;  %v240_v53 = vmul.f32 %v463_v0, %v201_v40  ;;  %v276_v54 = vadd.f32 %v473_v1, %v237_v47  ;;  %v277_v55 = vadd.f32 %v473_v1, %v238_v48 }
  0x27   : > { %337 = vst.msk [vmem:[%s496_s24 + $0xb8] sm:$0xff] %vm313_vm0, %v304_v46  ;;  %v278_v56 = vadd.f32 %v473_v1, %v239_v49  ;;  %v241_v57 = vmul.f32 %v463_v0, %v202_v45  ;;  %v305_v58 = vmax.f32 %v273_v50, 0.0  ;;  %v306_v59 = vmax.f32 %v274_v51, 0.0 }
  0x28   : > { %v307_v60 = vmax.f32 %v275_v52, 0.0  ;;  %v279_v61 = vadd.f32 %v473_v1, %v240_v53  ;;  %v308_v62 = vmax.f32 %v276_v54, 0.0  ;;  %v309_v63 = vmax.f32 %v277_v55, 0.0 }
  0x29   : > { %v310_v2 = vmax.f32 %v278_v56, 0.0  ;;  %v280_v3 = vadd.f32 %v473_v1, %v241_v57  ;;  %338 = vst.msk [vmem:[%s496_s24 + $0xc0] sm:$0xff] %vm313_vm0, %v305_v58  ;;  %339 = vst.msk [vmem:[%s496_s24 + $0xc8] sm:$0xff] %vm313_vm0, %v306_v59 }
  0x2a   : > { %340 = vst.msk [vmem:[%s496_s24 + $0xd0] sm:$0xff] %vm313_vm0, %v307_v60  ;;  %v311_v4 = vmax.f32 %v279_v61, 0.0  ;;  %341 = vst.msk [vmem:[%s496_s24 + $0xd8] sm:$0xff] %vm313_vm0, %v308_v62 }
  0x2b   : > { %342 = vst.msk [vmem:[%s496_s24 + $0xe0] sm:$0xff] %vm313_vm0, %v309_v63  ;;  %343 = vst.msk [vmem:[%s496_s24 + $0xe8] sm:$0xff] %vm313_vm0, %v310_v2  ;;  %v312_v0 = vmax.f32 %v280_v3, 0.0 }
  0x2c   : > { %344 = vst.msk [vmem:[%s496_s24 + $0xf0] sm:$0xff] %vm313_vm0, %v311_v4 }
  0x2d   : > { %345 = vst.msk [vmem:[%s496_s24 + $0xf8] sm:$0xff] %vm313_vm0, %v312_v0 }
  0x2e PF: > { %s13_s12 = sadd.s32 1, %s430_s12  }
  0x2f   : > { %p10_p4 = scmp.ge.s32.totalorder %s13_s12, 4  }
  0x31   :  { %12 = sbr.rel (!%p10_p4) target bundleno = 1 (0x1), region = 62 }

// kernel: up_forward.4
= control target key start
LH: loop header
LB: loop body
LE: loop exit
PB: predicated region body
PF: predicated region fallthrough
CT: control target
= control target key end

     0   :  { %s3197_s21 = smov 0   ;;  %s4733_s0 = inlined_call_operand.vmem [shape: f32[2,16,16,4], index: 0, kind: input, shape index: {}]   ;;  %s4734_s1 = inlined_call_operand.vmem [shape: f32[1,4], index: 1, kind: input, shape index: {}]   ;;  %s4735_s2 = inlined_call_operand.vmem [shape: f32[1,4], index: 2, kind: input, shape index: {}]   ;;  %s4736_s3 = inlined_call_operand.vmem [shape: bf16[36,4], index: 3, kind: input, shape index: {}]   ;;  %s4737_s4 = inlined_call_operand.vmem [shape: f32[1,4], index: 4, kind: input, shape index: {}]   ;;  %s4738_s5 = inlined_call_operand.vmem [shape: f32[2,16,16,4], index: 5, kind: output, shape index: {0}]   ;;  %s4739_s6 = inlined_call_operand.vmem [shape: f32[2,2,4], index: 6, kind: output, shape index: {1}]  }
   0x1 LB: > { %s2354_s22 = sadd.s32 4294967295, %s3151_s21   ;;  %p2358_p0 = scmp.ge.s32.totalorder %s3151_s21, 1  ;;  %s3151_s21 = sphi %s3197_s21, %s17_s21  }
   0x2   : > { %p215_p1 = scmp.lt.s32.totalorder %s3151_s21, 3 }
   0x4   : > { %p216_p2 = pnand %p2358_p0, %p215_p1 }
   0x6   : > { %219 = sbr.rel (%p216_p2) target bundleno = 667 (0x29b), region = 40 }
   0xd   : > { %vm406_vm0 = vcmask 31744   ;;  %vm409_vm1 = vcmask 25600   ;;  %vm415_vm2 = vcmask 24576   ;;  %p3207_p3 = scmp.lt.s32.totalorder %s2354_s22, 1  ;;  %v3153_v0 = vmov 0.0   ;;  %s3154_s8 = smov 4  }
   0xe   : > { %407 = vst.msk [vmem:[#allocation2] sm:$0xff] %vm406_vm0, %v3153_v0  ;;  %408 = vst.msk [vmem:[#allocation2 + $0x8] sm:$0xff] %vm406_vm0, %v3153_v0  ;;  %v3263_v1 = vld [vmem:[%s4734_s1] ss:$0 sm:$0xff]  ;;  %vm587_vm3 = vcmask 1046528   ;;  %vm764_vm4 = vcmask 1045504  }
   0xf   : > { %410 = vst.msk [vmem:[#allocation2 + $0x10] sm:$0x3] %vm409_vm1, %v3153_v0  ;;  %414 = vst.msk [vmem:[#allocation2 + $0x1a8] sm:$0x3] %vm409_vm1, %v3153_v0  ;;  %s4832_s22 = smov (!%p3207_p3, %s2354_s22), 1  ;;  %s3155_s9 = smov 8  }
  0x10   : > { %412 = vst.msk [vmem:[#allocation2 + $0x198] sm:$0xff] %vm406_vm0, %v3153_v0  ;;  %413 = vst.msk [vmem:[#allocation2 + $0x1a0] sm:$0xff] %vm406_vm0, %v3153_v0  ;;  %s2388_s24 = sshll.u32 %s4832_s22, 8  ;;  %v3275_v2 = vld [vmem:[%s4735_s2] ss:$0 sm:$0xff]  ;;  %s3156_s10 = smov 12  }
  0x11   : > { %417 = vst.msk [vmem:[#allocation2 + $0x18] sm:$0x1] %vm415_vm2, %v3153_v0  ;;  %418 = vst.msk [vmem:[#allocation2 + $0x30] sm:$0x1] %vm415_vm2, %v3153_v0  ;;  %s3270_s29 = scalar_lea.vmem %s4733_s0, %s2388_s24  ;;  %s3157_s13 = smov 16   ;;  %vm1898_vm5 = vcmask 1041408  }
  0x12   : > { %419 = vst.msk [vmem:[#allocation2 + $0x48] sm:$0x1] %vm415_vm2, %v3153_v0  ;;  %420 = vst.msk [vmem:[#allocation2 + $0x60] sm:$0x1] %vm415_vm2, %v3153_v0  ;;  %v266_v3 = vld [vmem:[%s3270_s29 + $0x10] sm:$0xff]  ;;  %v267_v4 = vld [vmem:[%s3270_s29 + $0x18] sm:$0xff] }
  0x13   : > { %421 = vst.msk [vmem:[#allocation2 + $0x78] sm:$0x1] %vm415_vm2, %v3153_v0  ;;  %422 = vst.msk [vmem:[#allocation2 + $0x90] sm:$0x1] %vm415_vm2, %v3153_v0  ;;  %v264_v5 = vld [vmem:[%s3270_s29] sm:$0xff]  ;;  %v305_v6 = vmul.f32 %v3263_v1, %v266_v3  ;;  %v306_v7 = vmul.f32 %v3263_v1, %v267_v4  ;;  %v265_v8 = vld [vmem:[%s3270_s29 + $0x8] sm:$0xff] }
  0x14   : > { %423 = vst.msk [vmem:[#allocation2 + $0xa8] sm:$0x1] %vm415_vm2, %v3153_v0  ;;  %424 = vst.msk [vmem:[#allocation2 + $0xc0] sm:$0x1] %vm415_vm2, %v3153_v0  ;;  %v303_v9 = vmul.f32 %v3263_v1, %v264_v5  ;;  %v268_v10 = vld [vmem:[%s3270_s29 + $0x20] sm:$0xff]  ;;  %v269_v11 = vld [vmem:[%s3270_s29 + $0x28] sm:$0xff]  ;;  %v304_v13 = vmul.f32 %v3263_v1, %v265_v8 }
  0x15   : > { %425 = vst.msk [vmem:[#allocation2 + $0xd8] sm:$0x1] %vm415_vm2, %v3153_v0  ;;  %426 = vst.msk [vmem:[#allocation2 + $0xf0] sm:$0x1] %vm415_vm2, %v3153_v0  ;;  %v3286_v12 = vld [vmem:[#allocation2 + $0x8] sm:$0xff]  ;;  %v307_v14 = vmul.f32 %v3263_v1, %v268_v10  ;;  %v308_v15 = vmul.f32 %v3263_v1, %v269_v11  ;;  %v344_v19 = vadd.f32 %v3275_v2, %v305_v6  ;;  %v270_v25 = vld [vmem:[%s3270_s29 + $0x30] sm:$0xff] }
  0x16   : > { %427 = vst.msk [vmem:[#allocation2 + $0x108] sm:$0x1] %vm415_vm2, %v3153_v0  ;;  %428 = vst.msk [vmem:[#allocation2 + $0x120] sm:$0x1] %vm415_vm2, %v3153_v0  ;;  %v589_v18 = vrot.slane %v3286_v12, 1  ;;  %v345_v20 = vadd.f32 %v3275_v2, %v306_v7  ;;  %v342_v21 = vadd.f32 %v3275_v2, %v303_v9  ;;  %v343_v24 = vadd.f32 %v3275_v2, %v304_v13  ;;  %v271_v26 = vld [vmem:[%s3270_s29 + $0x38] sm:$0xff] }
  0x17   : > { %429 = vst.msk [vmem:[#allocation2 + $0x138] sm:$0x1] %vm415_vm2, %v3153_v0  ;;  %430 = vst.msk [vmem:[#allocation2 + $0x150] sm:$0x1] %vm415_vm2, %v3153_v0  ;;  %v376_v27 = vmax.f32 %v344_v19, 0.0  ;;  %v346_v30 = vadd.f32 %v3275_v2, %v307_v14  ;;  %v272_v31 = vld [vmem:[%s3270_s29 + $0x40] sm:$0xff]  ;;  %v347_v37 = vadd.f32 %v3275_v2, %v308_v15  ;;  %v309_v42 = vmul.f32 %v3263_v1, %v270_v25 }
  0x18   : > { %431 = vst.msk [vmem:[#allocation2 + $0x168] sm:$0x1] %vm415_vm2, %v3153_v0  ;;  %432 = vst.msk [vmem:[#allocation2 + $0x180] sm:$0x1] %vm415_vm2, %v3153_v0  ;;  %v377_v28 = vmax.f32 %v345_v20, 0.0  ;;  %v374_v29 = vmax.f32 %v342_v21, 0.0  ;;  %v310_v43 = vmul.f32 %v3263_v1, %v271_v26  ;;  %v311_v46 = vmul.f32 %v3263_v1, %v272_v31 }
  0x19   : > { %435 = vst.msk [vmem:[#allocation2 + $0x29] sm:$0x1] %vm415_vm2, %v3153_v0  ;;  %436 = vst.msk [vmem:[#allocation2 + $0x41] sm:$0x1] %vm415_vm2, %v3153_v0  ;;  %v273_v32 = vld [vmem:[%s3270_s29 + $0x48] sm:$0xff]  ;;  %v274_v33 = vld [vmem:[%s3270_s29 + $0x50] sm:$0xff]  ;;  %v348_v49 = vadd.f32 %v3275_v2, %v309_v42 }
  0x1a   : > { %437 = vst.msk [vmem:[#allocation2 + $0x59] sm:$0x1] %vm415_vm2, %v3153_v0  ;;  %438 = vst.msk [vmem:[#allocation2 + $0x71] sm:$0x1] %vm415_vm2, %v3153_v0  ;;  %v375_v36 = vmax.f32 %v343_v24, 0.0  ;;  %v275_v38 = vld [vmem:[%s3270_s29 + $0x58] sm:$0xff]  ;;  %v312_v47 = vmul.f32 %v3263_v1, %v273_v32  ;;  %v313_v48 = vmul.f32 %v3263_v1, %v274_v33  ;;  %v349_v50 = vadd.f32 %v3275_v2, %v310_v43 }
  0x1b   : > { %439 = vst.msk [vmem:[#allocation2 + $0x89] sm:$0x1] %vm415_vm2, %v3153_v0  ;;  %440 = vst.msk [vmem:[#allocation2 + $0xa1] sm:$0x1] %vm415_vm2, %v3153_v0  ;;  %v276_v39 = vld [vmem:[%s3270_s29 + $0x60] sm:$0xff]  ;;  %v378_v41 = vmax.f32 %v346_v30, 0.0  ;;  %v314_v51 = vmul.f32 %v3263_v1, %v275_v38  ;;  %v350_v53 = vadd.f32 %v3275_v2, %v311_v46 }
  0x1c   : > { %441 = vst.msk [vmem:[#allocation2 + $0xb9] sm:$0x1] %vm415_vm2, %v3153_v0  ;;  %442 = vst.msk [vmem:[#allocation2 + $0xd1] sm:$0x1] %vm415_vm2, %v3153_v0  ;;  %v277_v44 = vld [vmem:[%s3270_s29 + $0x68] sm:$0xff]  ;;  %v379_v45 = vmax.f32 %v347_v37, 0.0  ;;  %v315_v52 = vmul.f32 %v3263_v1, %v276_v39  ;;  %v351_v54 = vadd.f32 %v3275_v2, %v312_v47  ;;  %v352_v55 = vadd.f32 %v3275_v2, %v313_v48 }
  0x1d   : > { %443 = vst.msk [vmem:[#allocation2 + $0xe9] sm:$0x1] %vm415_vm2, %v3153_v0  ;;  %444 = vst.msk [vmem:[#allocation2 + $0x101] sm:$0x1] %vm415_vm2, %v3153_v0  ;;  %v316_v56 = vmul.f32 %v3263_v1, %v277_v44  ;;  %v278_v57 = vld [vmem:[%s3270_s29 + $0x70] sm:$0xff]  ;;  %v279_v58 = vld [vmem:[%s3270_s29 + $0x78] sm:$0xff]  ;;  %v353_v61 = vadd.f32 %v3275_v2, %v314_v51 }
  0x1e   : > { %445 = vst.msk [vmem:[#allocation2 + $0x119] sm:$0x1] %vm415_vm2, %v3153_v0  ;;  %446 = vst.msk [vmem:[#allocation2 + $0x131] sm:$0x1] %vm415_vm2, %v3153_v0  ;;  %v380_v59 = vmax.f32 %v348_v49, 0.0  ;;  %v381_v60 = vmax.f32 %v349_v50, 0.0  ;;  %v354_v62 = vadd.f32 %v3275_v2, %v315_v52  ;;  %v317_v10 = vmul.f32 %v3263_v1, %v278_v57 }
  0x1f   : > { %447 = vst.msk [vmem:[#allocation2 + $0x149] sm:$0x1] %vm415_vm2, %v3153_v0  ;;  %448 = vst.msk [vmem:[#allocation2 + $0x161] sm:$0x1] %vm415_vm2, %v3153_v0  ;;  %v280_v63 = vld [vmem:[%s3270_s29 + $0x80] sm:$0xff]  ;;  %v382_v3 = vmax.f32 %v350_v53, 0.0  ;;  %v355_v6 = vadd.f32 %v3275_v2, %v316_v56  ;;  %v318_v11 = vmul.f32 %v3263_v1, %v279_v58 }
  0x20   : > { %449 = vst.msk [vmem:[#allocation2 + $0x179] sm:$0x1] %vm415_vm2, %v3153_v0  ;;  %450 = vst.msk [vmem:[#allocation2 + $0x191] sm:$0x1] %vm415_vm2, %v3153_v0  ;;  %v383_v4 = vmax.f32 %v351_v54, 0.0  ;;  %v384_v5 = vmax.f32 %v352_v55, 0.0  ;;  %v319_v19 = vmul.f32 %v3263_v1, %v280_v63  ;;  %v356_v31 = vadd.f32 %v3275_v2, %v317_v10 }
  0x21   : > { %416 = vst.msk [vmem:[#allocation2] sm:$0x1] %vm415_vm2, %v3153_v0  ;;  %434 = vst.msk [vmem:[#allocation2 + $0x11] sm:$0x1] %vm415_vm2, %v3153_v0  ;;  %v282_v7 = vld [vmem:[%s3270_s29 + $0x90] sm:$0xff]  ;;  %v385_v8 = vmax.f32 %v353_v61, 0.0  ;;  %v357_v32 = vadd.f32 %v3275_v2, %v318_v11 }
  0x22   : > { %451 = vst.msk [vmem:[#allocation2 + $0x1a9] sm:$0x1] %vm415_vm2, %v3153_v0  ;;  %433 = vst.msk [vmem:[#allocation2 + $0x198] sm:$0x1] %vm415_vm2, %v3153_v0  ;;  %v281_v0 = vld [vmem:[%s3270_s29 + $0x88] sm:$0xff]  ;;  %v386_v9 = vmax.f32 %v354_v62, 0.0  ;;  %v3367_v26 = vmul.f32 %v3263_v1, %v282_v7  ;;  %v3393_v46 = vadd.f32 %v3275_v2, %v319_v19 }
  0x23   : > { %455 = vst.msk [vmem:[#allocation2 + $0x31] sm:$0xff] %vm406_vm0, %v376_v27  ;;  %456 = vst.msk [vmem:[#allocation2 + $0x39] sm:$0xff] %vm406_vm0, %v377_v28  ;;  %v320_v20 = vmul.f32 %v3263_v1, %v281_v0  ;;  %v388_v44 = vmax.f32 %v356_v31, 0.0  ;;  %v283_v47 = vld [vmem:[%s3270_s29 + $0x98] sm:$0xff]  ;;  %s3158_s16 = smov 20   ;;  %s3159_s19 = smov 24  }
  0x24   : > { %453 = vst.msk [vmem:[#allocation2 + $0x19] sm:$0xff] %vm406_vm0, %v374_v29  ;;  %454 = vst.msk [vmem:[#allocation2 + $0x21] sm:$0xff] %vm406_vm0, %v375_v36  ;;  %s3160_s20 = smov 28   ;;  %s3161_s23 = smov 32   ;;  %vm1575_vm6 = vcmask 64512   ;;  %vm1608_vm7 = vcmask 97280  }
  0x25   : > { %457 = vst.msk [vmem:[#allocation2 + $0x49] sm:$0xff] %vm406_vm0, %v378_v41  ;;  %458 = vst.msk [vmem:[#allocation2 + $0x51] sm:$0xff] %vm406_vm0, %v379_v45  ;;  %v389_v45 = vmax.f32 %v357_v32, 0.0  ;;  %v359_v54 = vadd.f32 %v3275_v2, %v320_v20  ;;  %vm1641_vm8 = vcmask 130048   ;;  %vm1674_vm9 = vcmask 162816  }
  0x26   : > { %459 = vst.msk [vmem:[#allocation2 + $0x61] sm:$0xff] %vm406_vm0, %v380_v59  ;;  %460 = vst.msk [vmem:[#allocation2 + $0x69] sm:$0xff] %vm406_vm0, %v381_v60  ;;  %vm1707_vm10 = vcmask 195584   ;;  %vm1740_vm11 = vcmask 228352   ;;  %vm1773_vm12 = vcmask 261120   ;;  %vm1849_vm13 = vcmask 293888  }
  0x27   : > { %461 = vst.msk [vmem:[#allocation2 + $0x79] sm:$0xff] %vm406_vm0, %v382_v3  ;;  %462 = vst.msk [vmem:[#allocation2 + $0x81] sm:$0xff] %vm406_vm0, %v383_v4  ;;  %vm2265_vm14 = vcmask 1040384  }
  0x28   : > { %v3291_v16 = vld [vmem:[#allocation2] sm:$0xff]  ;;  %v3293_v17 = vld [vmem:[#allocation2 + $0x10] sm:$0x3]  ;;  %463 = vst.msk [vmem:[#allocation2 + $0x91] sm:$0xff] %vm406_vm0, %v384_v5  ;;  %464 = vst.msk [vmem:[#allocation2 + $0x99] sm:$0xff] %vm406_vm0, %v385_v8  ;;  %v322_v5 = vmul.f32 %v3263_v1, %v283_v47 }
  0x29   : > { %v588_v22 = vrot.slane %v3291_v16, 1  ;;  %v591_v23 = vrot.slane %v3293_v17, 1  ;;  %465 = vst.msk [vmem:[#allocation2 + $0xa9] sm:$0xff] %vm406_vm0, %v386_v9  ;;  %467 = vst.msk [vmem:[#allocation2 + $0xc1] sm:$0xff] %vm406_vm0, %v388_v44  ;;  %v286_v47 = vld [vmem:[%s3270_s29 + $0xb0] sm:$0xff] }
  0x2a   : > { %v3346_v13 = vld [vmem:[#allocation2 + $0x30] sm:$0xff]  ;;  %v3348_v14 = vld [vmem:[#allocation2 + $0x38] sm:$0xff]  ;;  %v3350_v15 = vld [vmem:[#allocation2 + $0x40] sm:$0x3]  ;;  %468 = vst.msk [vmem:[#allocation2 + $0xc9] sm:$0xff] %vm406_vm0, %v389_v45  ;;  %v360_v45 = vadd.f32 %v3275_v2, %v3367_v26  ;;  %v361_v26 = vadd.f32 %v3275_v2, %v322_v5 }
  0x2b   : > { %v590_v34 = vsel %vm587_vm3, %v588_v22, %v589_v18  ;;  %v592_v35 = vsel %vm587_vm3, %v589_v18, %v591_v23  ;;  %4773 = vst [vmem:[#allocation3_spill] sm:$0xff] %v3346_v13  ;;  %4774 = vst [vmem:[#allocation4_spill] sm:$0xff] %v3348_v14  ;;  %v387_v18 = vmax.f32 %v355_v6, 0.0  ;;  %v598_v21 = vrot.slane %v3346_v13, 1  ;;  %v3360_v24 = vld [vmem:[#allocation2 + $0x18] sm:$0xff]  ;;  %v3362_v25 = vld [vmem:[#allocation2 + $0x20] sm:$0xff] }
  0x2c   : > { %v2472_v40 = vpack.i.bf16 %v592_v35, %v590_v34  ;;  %v599_v22 = vrot.slane %v3348_v14, 1  ;;  %v601_v23 = vrot.slane %v3350_v15, 1  ;;  %4775 = vst [vmem:[#allocation5_spill] sm:$0xff] %v3360_v24  ;;  %4776 = vst [vmem:[#allocation6_spill] sm:$0xff] %v3362_v25  ;;  %v3369_v27 = vld [vmem:[#allocation2 + $0x28] sm:$0x3] }
  0x2d   : > { %v593_v28 = vrot.slane %v3360_v24, 1  ;;  %v594_v29 = vrot.slane %v3362_v25, 1  ;;  %v3373_v30 = vld [vmem:[#allocation2 + $0x48] sm:$0xff]  ;;  %466 = vst.msk [vmem:[#allocation2 + $0xb1] sm:$0xff] %vm406_vm0, %v387_v18  ;;  %v596_v35 = vrot.slane %v3369_v27, 1  ;;  %v3381_v36 = vld [vmem:[#allocation2 + $0x50] sm:$0xff] }
  0x2e   : > { %2473 = vrot.lane.b32.xlu0 %v2472_v40, %s3154_s8  ;;  %v600_v33 = vsel %vm587_vm3, %v598_v21, %v599_v22  ;;  %v602_v34 = vsel %vm587_vm3, %v599_v22, %v601_v23  ;;  %v3383_v37 = vld [vmem:[#allocation2 + $0x58] sm:$0x3]  ;;  %v603_v38 = vrot.slane %v3373_v30, 1  ;;  %v604_v41 = vrot.slane %v3381_v36, 1  ;;  %v3402_v51 = vld [vmem:[#allocation2 + $0x60] sm:$0xff]  ;;  %v3404_v52 = vld [vmem:[#allocation2 + $0x68] sm:$0xff] }
  0x2f   : > { %v3386_v39 = vpack.i.bf16 %v602_v34, %v600_v33  ;;  %v595_v40 = vsel %vm587_vm3, %v593_v28, %v594_v29  ;;  %v606_v42 = vrot.slane %v3383_v37, 1  ;;  %v597_v43 = vsel %vm587_vm3, %v594_v29, %v596_v35  ;;  %v3406_v53 = vld [vmem:[#allocation2 + $0x70] sm:$0x3]  ;;  %v3414_v59 = vld [vmem:[#allocation2 + $0x78] sm:$0xff]  ;;  %v3416_v60 = vld [vmem:[#allocation2 + $0x80] sm:$0xff] }
  0x30   : > { %v3398_v48 = vpack.i.bf16 %v597_v43, %v595_v40  ;;  %v605_v49 = vsel %vm587_vm3, %v603_v38, %v604_v41  ;;  %v608_v56 = vrot.slane %v3402_v51, 1  ;;  %v609_v57 = vrot.slane %v3404_v52, 1  ;;  %v3418_v61 = vld [vmem:[#allocation2 + $0x90] sm:$0xff]  ;;  %v3424_v62 = vld [vmem:[#allocation2 + $0x88] sm:$0x3]  ;;  %v3428_v3 = vld [vmem:[#allocation2 + $0x98] sm:$0xff] }
  0x31   : > { %4777 = vst [vmem:[#allocation7_spill] sm:$0xff] %v3386_v39  ;;  %2483 = vrot.lane.b32.xlu1 %v3386_v39, %s3154_s8  ;;  %v607_v50 = vsel %vm587_vm3, %v604_v41, %v606_v42  ;;  %v611_v58 = vrot.slane %v3406_v53, 1  ;;  %v613_v63 = vrot.slane %v3414_v59, 1  ;;  %v614_v0 = vrot.slane %v3416_v60, 1  ;;  %v3435_v9 = vld [vmem:[#allocation2 + $0xa0] sm:$0x3] }
  0x32   : > { %4778 = vst [vmem:[#allocation8_spill] sm:$0xff] %v3398_v48  ;;  %v3409_v55 = vpack.i.bf16 %v607_v50, %v605_v49  ;;  %2478 = vrot.lane.b32.xlu0 %v3398_v48, %s3154_s8  ;;  %v618_v4 = vrot.slane %v3418_v61, 1  ;;  %v610_v6 = vsel %vm587_vm3, %v608_v56, %v609_v57  ;;  %v616_v8 = vrot.slane %v3424_v62, 1  ;;  %v3438_v11 = vld [vmem:[#allocation2 + $0xa8] sm:$0xff]  ;;  %v284_v33 = vld [vmem:[%s3270_s29 + $0xa0] sm:$0xff]  ;;  %v287_v49 = vld [vmem:[%s3270_s29 + $0xb8] sm:$0xff] }
  0x33   : > { %v612_v7 = vsel %vm587_vm3, %v609_v57, %v611_v58  ;;  %v619_v10 = vrot.slane %v3428_v3, 1  ;;  %v615_v20 = vsel %vm587_vm3, %v613_v63, %v614_v0  ;;  %v621_v21 = vrot.slane %v3435_v9, 1  ;;  %v285_v34 = vld [vmem:[%s3270_s29 + $0xa8] sm:$0xff]  ;;  %v288_v50 = vld [vmem:[%s3270_s29 + $0xc0] sm:$0xff] }
  0x34   : > { %4779 = vst [vmem:[#allocation9_spill] sm:$0xff] %v3409_v55  ;;  %v3440_v18 = vld [vmem:[#allocation2 + $0xb0] sm:$0xff]  ;;  %v3444_v19 = vpack.i.bf16 %v612_v7, %v610_v6  ;;  %v3448_v22 = vld [vmem:[#allocation2 + $0xb8] sm:$0x3]  ;;  %v623_v23 = vrot.slane %v3438_v11, 1  ;;  %v617_v28 = vsel %vm587_vm3, %v614_v0, %v616_v8  ;;  %v390_v40 = vmax.f32 %v3393_v46, 0.0 }
  0x35   : > { %2488 = vrot.lane.b32.xlu1 %v3409_v55, %s3154_s8  ;;  %v620_v29 = vsel %vm587_vm3, %v618_v4, %v619_v10  ;;  %v624_v31 = vrot.slane %v3440_v18, 1  ;;  %v626_v32 = vrot.slane %v3448_v22, 1  ;;  %v3459_v35 = vpack.i.bf16 %v617_v28, %v615_v20  ;;  %v3476_v57 = vld [vmem:[#allocation2 + $0xc0] sm:$0xff]  ;;  %v3478_v46 = vld [vmem:[#allocation2 + $0xc8] sm:$0xff] }
  0x36   : > { %4780 = vst [vmem:[#allocation10_spill] sm:$0xff] %v3444_v19  ;;  %2493 = vrot.lane.b32.xlu0 %v3444_v19, %s3154_s8  ;;  %v622_v38 = vsel %vm587_vm3, %v619_v10, %v621_v21  ;;  %v391_v41 = vmax.f32 %v359_v54, 0.0  ;;  %v3480_v54 = vld [vmem:[#allocation2 + $0xd0] sm:$0x3]  ;;  %469 = vst.msk [vmem:[#allocation2 + $0xd9] sm:$0xff] %vm406_vm0, %v390_v40  ;;  %v323_v58 = vmul.f32 %v3263_v1, %v284_v33  ;;  %v628_v0 = vrot.slane %v3476_v57, 1 }
  0x37   : > { %4781 = vst [vmem:[#allocation11_spill] sm:$0xff] %v3459_v35  ;;  %v3463_v42 = vpack.i.bf16 %v622_v38, %v620_v29  ;;  %v625_v43 = vsel %vm587_vm3, %v623_v23, %v624_v31  ;;  %v627_v44 = vsel %vm587_vm3, %v624_v31, %v626_v32  ;;  %v324_v63 = vmul.f32 %v3263_v1, %v285_v34  ;;  %v289_v21 = vld [vmem:[%s3270_s29 + $0xc8] sm:$0xff]  ;;  %v290_v23 = vld [vmem:[%s3270_s29 + $0xd0] sm:$0xff]  ;;  %v291_v33 = vld [vmem:[%s3270_s29 + $0xd8] sm:$0xff] }
  0x38   : > { %v3474_v56 = vpack.i.bf16 %v627_v44, %v625_v43  ;;  %470 = vst.msk [vmem:[#allocation2 + $0xe1] sm:$0xff] %vm406_vm0, %v391_v41  ;;  %v629_v4 = vrot.slane %v3478_v46, 1  ;;  %v631_v6 = vrot.slane %v3480_v54, 1  ;;  %v392_v7 = vmax.f32 %v360_v45, 0.0  ;;  %v292_v34 = vld [vmem:[%s3270_s29 + $0xe0] sm:$0xff]  ;;  %v293_v38 = vld [vmem:[%s3270_s29 + $0xe8] sm:$0xff] }
  0x39   : > { %4782 = vst [vmem:[#allocation12_spill] sm:$0xff] %v3463_v42  ;;  %2498 = vrot.lane.b32.xlu1 %v3459_v35, %s3154_s8  ;;  %v393_v8 = vmax.f32 %v361_v26, 0.0  ;;  %v362_v5 = vadd.f32 %v3275_v2, %v323_v58  ;;  %v363_v10 = vadd.f32 %v3275_v2, %v324_v63  ;;  %v325_v20 = vmul.f32 %v3263_v1, %v286_v47 }
  0x3a   : > { %4783 = vst [vmem:[#allocation13_spill] sm:$0xff] %v3474_v56  ;;  %2503 = vrot.lane.b32.xlu0 %v3463_v42, %s3154_s8  ;;  %v630_v28 = vsel %vm587_vm3, %v628_v0, %v629_v4  ;;  %v632_v29 = vsel %vm587_vm3, %v629_v4, %v631_v6  ;;  %471 = vst.msk [vmem:[#allocation2 + $0xf1] sm:$0xff] %vm406_vm0, %v392_v7  ;;  %v326_v31 = vmul.f32 %v3263_v1, %v287_v49 }
  0x3b   : > { %v327_v32 = vmul.f32 %v3263_v1, %v288_v50  ;;  %v3507_v40 = vpack.i.bf16 %v632_v29, %v630_v28  ;;  %472 = vst.msk [vmem:[#allocation2 + $0xf9] sm:$0xff] %vm406_vm0, %v393_v8  ;;  %v394_v41 = vmax.f32 %v362_v5, 0.0  ;;  %v395_v43 = vmax.f32 %v363_v10, 0.0 }
  0x3c   : > { %v364_v44 = vadd.f32 %v3275_v2, %v325_v20  ;;  %v365_v45 = vadd.f32 %v3275_v2, %v326_v31  ;;  %v328_v47 = vmul.f32 %v3263_v1, %v289_v21  ;;  %v329_v50 = vmul.f32 %v3263_v1, %v290_v23 }
  0x3d   : > { %2508 = vrot.lane.b32.xlu1 %v3474_v56, %s3154_s8  ;;  %4784 = vst [vmem:[#allocation14_spill] sm:$0xff] %v3507_v40  ;;  %v366_v49 = vadd.f32 %v3275_v2, %v327_v32  ;;  %473 = vst.msk [vmem:[#allocation2 + $0x109] sm:$0xff] %vm406_vm0, %v394_v41  ;;  %v330_v58 = vmul.f32 %v3263_v1, %v291_v33  ;;  %v331_v63 = vmul.f32 %v3263_v1, %v292_v34  ;;  %v3522_v4 = vld [vmem:[#allocation2 + $0xd8] sm:$0xff] }
  0x3e   : > { %2513 = vrot.lane.b32.xlu0 %v3507_v40, %s3154_s8  ;;  %474 = vst.msk [vmem:[#allocation2 + $0x111] sm:$0xff] %vm406_vm0, %v395_v43  ;;  %v396_v26 = vmax.f32 %v364_v44, 0.0  ;;  %v332_v0 = vmul.f32 %v3263_v1, %v293_v38  ;;  %v397_v8 = vmax.f32 %v365_v45, 0.0  ;;  %v367_v5 = vadd.f32 %v3275_v2, %v328_v47 }
  0x3f   : > { %v3524_v6 = vld [vmem:[#allocation2 + $0xe0] sm:$0xff]  ;;  %v3526_v7 = vld [vmem:[#allocation2 + $0xe8] sm:$0x3]  ;;  %v398_v10 = vmax.f32 %v366_v49, 0.0  ;;  %v368_v20 = vadd.f32 %v3275_v2, %v329_v50  ;;  %v633_v21 = vrot.slane %v3522_v4, 1  ;;  %v369_v1 = vadd.f32 %v3275_v2, %v330_v58 }
  0x40   : > { %v634_v23 = vrot.slane %v3524_v6, 1  ;;  %v636_v28 = vrot.slane %v3526_v7, 1  ;;  %475 = vst.msk [vmem:[#allocation2 + $0x121] sm:$0xff] %vm406_vm0, %v396_v26  ;;  %476 = vst.msk [vmem:[#allocation2 + $0x129] sm:$0xff] %vm406_vm0, %v397_v8  ;;  %v399_v29 = vmax.f32 %v367_v5, 0.0  ;;  %v370_v32 = vadd.f32 %v3275_v2, %v331_v63 }
  0x41   : > { %477 = vst.msk [vmem:[#allocation2 + $0x139] sm:$0xff] %vm406_vm0, %v398_v10  ;;  %v400_v31 = vmax.f32 %v368_v20, 0.0  ;;  %v371_v33 = vadd.f32 %v3275_v2, %v332_v0  ;;  %v3541_v41 = vld [vmem:[#allocation2 + $0xf0] sm:$0xff]  ;;  %v401_v43 = vmax.f32 %v369_v1, 0.0  ;;  %v765_v20 = vrot.slane %v3291_v16, 2 }
  0x42   : > { %v635_v34 = vsel %vm587_vm3, %v633_v21, %v634_v23  ;;  %v637_v38 = vsel %vm587_vm3, %v634_v23, %v636_v28  ;;  %v3545_v45 = vld [vmem:[#allocation2 + $0xf8] sm:$0xff]  ;;  %v3547_v47 = vld [vmem:[#allocation2 + $0x100] sm:$0x3]  ;;  %v638_v49 = vrot.slane %v3541_v41, 1  ;;  %478 = vst.msk [vmem:[#allocation2 + $0x141] sm:$0xff] %vm406_vm0, %v399_v29  ;;  %v402_v2 = vmax.f32 %v370_v32, 0.0 }
  0x43   : > { %v3543_v44 = vpack.i.bf16 %v637_v38, %v635_v34  ;;  %479 = vst.msk [vmem:[#allocation2 + $0x151] sm:$0xff] %vm406_vm0, %v400_v31  ;;  %v403_v50 = vmax.f32 %v371_v33, 0.0  ;;  %v639_v63 = vrot.slane %v3545_v45, 1  ;;  %v641_v0 = vrot.slane %v3547_v47, 1  ;;  %480 = vst.msk [vmem:[#allocation2 + $0x159] sm:$0xff] %vm406_vm0, %v401_v43 }
  0x44   : > { %v3559_v8 = vld [vmem:[#allocation2 + $0x108] sm:$0xff]  ;;  %481 = vst.msk [vmem:[#allocation2 + $0x169] sm:$0xff] %vm406_vm0, %v402_v2  ;;  %v766_v21 = vrot.slane %v3286_v12, 2  ;;  %v770_v34 = vrot.slane %v3360_v24, 2  ;;  %v771_v16 = vrot.slane %v3362_v25, 2 }
  0x45   : > { %4785 = vst [vmem:[#allocation15_spill] sm:$0xff] %v3543_v44  ;;  %2518 = vrot.lane.b32.xlu1 %v3543_v44, %s3154_s8  ;;  %v3561_v5 = vld [vmem:[#allocation2 + $0x110] sm:$0xff]  ;;  %v3563_v10 = vld [vmem:[#allocation2 + $0x118] sm:$0x3]  ;;  %482 = vst.msk [vmem:[#allocation2 + $0x171] sm:$0xff] %vm406_vm0, %v403_v50  ;;  %v640_v23 = vsel %vm587_vm3, %v638_v49, %v639_v63  ;;  %v642_v28 = vsel %vm587_vm3, %v639_v63, %v641_v0  ;;  %v643_v1 = vrot.slane %v3559_v8, 1 }
  0x46   : > { %v644_v29 = vrot.slane %v3561_v5, 1  ;;  %v3573_v31 = vpack.i.bf16 %v642_v28, %v640_v23  ;;  %v646_v32 = vrot.slane %v3563_v10, 1  ;;  %v773_v50 = vrot.slane %v3369_v27, 2 }
  0x47   : > { %v3576_v33 = vld [vmem:[#allocation2 + $0x120] sm:$0xff]  ;;  %v3581_v38 = vld [vmem:[#allocation2 + $0x128] sm:$0xff]  ;;  %v3583_v43 = vld [vmem:[#allocation2 + $0x130] sm:$0x3]  ;;  %v767_v27 = vsel %vm764_vm4, %v765_v20, %v766_v21 }
  0x48   : > { %4786 = vst [vmem:[#allocation16_spill] sm:$0xff] %v3573_v31  ;;  %v645_v12 = vsel %vm587_vm3, %v643_v1, %v644_v29  ;;  %v648_v49 = vrot.slane %v3576_v33, 1  ;;  %v3586_v2 = vld [vmem:[#allocation2 + $0x138] sm:$0xff]  ;;  %2523 = vrot.lane.b32.xlu0 %v3573_v31, %s3154_s8  ;;  %v647_v63 = vsel %vm587_vm3, %v644_v29, %v646_v32  ;;  %v649_v0 = vrot.slane %v3581_v38, 1 }
  0x49   : > { %v651_v23 = vrot.slane %v3583_v43, 1  ;;  %v653_v28 = vrot.slane %v3586_v2, 1  ;;  %v3595_v1 = vpack.i.bf16 %v647_v63, %v645_v12  ;;  %v3597_v58 = vld [vmem:[#allocation2 + $0x140] sm:$0xff]  ;;  %v3599_v26 = vld [vmem:[#allocation2 + $0x148] sm:$0x3]  ;;  %v775_v31 = vrot.slane %v3346_v13, 2 }
  0x4a   : > { %v3601_v44 = vld [vmem:[#allocation2 + $0x150] sm:$0xff]  ;;  %v776_v29 = vrot.slane %v3348_v14, 2  ;;  %v650_v32 = vsel %vm587_vm3, %v648_v49, %v649_v0  ;;  %v654_v56 = vrot.slane %v3597_v58, 1  ;;  %v656_v12 = vrot.slane %v3599_v26, 1  ;;  %v3610_v63 = vld [vmem:[#allocation2 + $0x158] sm:$0xff] }
  0x4b   : > { %4787 = vst [vmem:[#allocation17_spill] sm:$0xff] %v3595_v1  ;;  %v652_v40 = vsel %vm587_vm3, %v649_v0, %v651_v23  ;;  %v3612_v42 = vld [vmem:[#allocation2 + $0x160] sm:$0x3]  ;;  %2528 = vrot.lane.b32.xlu1 %v3595_v1, %s3154_s8  ;;  %v658_v35 = vrot.slane %v3601_v44, 1  ;;  %v659_v19 = vrot.slane %v3610_v63, 1  ;;  %v3621_v0 = vld [vmem:[#allocation2 + $0x168] sm:$0xff] }
  0x4c   : > { %v3616_v20 = vpack.i.bf16 %v652_v40, %v650_v32  ;;  %v661_v49 = vrot.slane %v3612_v42, 1  ;;  %v3623_v23 = vld [vmem:[#allocation2 + $0x170] sm:$0xff]  ;;  %v655_v55 = vsel %vm587_vm3, %v653_v28, %v654_v56  ;;  %v657_v39 = vsel %vm587_vm3, %v654_v56, %v656_v12  ;;  %v3627_v48 = vld [vmem:[#allocation2 + $0x178] sm:$0x3] }
  0x4d   : > { %4788 = vst [vmem:[#allocation18_spill] sm:$0xff] %v3623_v23  ;;  %v663_v1 = vrot.slane %v3621_v0, 1  ;;  %v664_v40 = vrot.slane %v3623_v23, 1  ;;  %v3633_v32 = vpack.i.bf16 %v657_v39, %v655_v55  ;;  %v660_v14 = vsel %vm587_vm3, %v658_v35, %v659_v19 }
  0x4e   : > { %2533 = vrot.lane.b32.xlu0 %v3616_v20, %s3154_s8  ;;  %v662_v13 = vsel %vm587_vm3, %v659_v19, %v661_v49  ;;  %v666_v25 = vrot.slane %v3627_v48, 1  ;;  %v4789_v12 = vrot.slane %v3293_v17, 2  ;;  %v772_v23 = vsel %vm764_vm4, %v770_v34, %v771_v16 }
  0x4f   : > { %v3638_v28 = vpack.i.bf16 %v662_v13, %v660_v14  ;;  %v665_v56 = vsel %vm587_vm3, %v663_v1, %v664_v40  ;;  %2538 = vrot.lane.b32.xlu1 %v3633_v32, %s3154_s8  ;;  %v774_v55 = vsel %vm764_vm4, %v771_v16, %v773_v50  ;;  %v780_v19 = vrot.slane %v3373_v30, 2 }
  0x50   : > { %v769_v24 = vsel %vm764_vm4, %v766_v21, %v4789_v12  ;;  %v667_v39 = vsel %vm587_vm3, %v664_v40, %v666_v25  ;;  %v781_v13 = vrot.slane %v3381_v36, 2  ;;  %v777_v35 = vsel %vm764_vm4, %v775_v31, %v776_v29 }
  0x51   : > { %v3651_v14 = vpack.i.bf16 %v667_v39, %v665_v56  ;;  %v4790_v17 = vrot.slane %v3350_v15, 2  ;;  %v783_v34 = vrot.slane %v3383_v37, 2  ;;  %v2552_v25 = vpack.i.bf16 %v769_v24, %v767_v27 }
  0x52   : > { %2543 = vrot.lane.b32.xlu0 %v3638_v28, %s3154_s8  ;;  %v785_v16 = vrot.slane %v3402_v51, 2  ;;  %v786_v50 = vrot.slane %v3404_v52, 2  ;;  %v788_v1 = vrot.slane %v3406_v53, 2  ;;  %v3665_v31 = vpack.i.bf16 %v774_v55, %v772_v23 }
  0x53   : > { %v779_v21 = vsel %vm764_vm4, %v776_v29, %v4790_v17  ;;  %2548 = vrot.lane.b32.xlu1 %v3651_v14, %s3154_s8  ;;  %v782_v29 = vsel %vm764_vm4, %v780_v19, %v781_v13  ;;  %v784_v37 = vsel %vm764_vm4, %v781_v13, %v783_v34  ;;  %v790_v49 = vrot.slane %v3414_v59, 2 }
  0x54   : > { %v3667_v15 = vpack.i.bf16 %v779_v21, %v777_v35  ;;  %v791_v24 = vrot.slane %v3416_v60, 2  ;;  %v793_v27 = vrot.slane %v3424_v62, 2  ;;  %v787_v53 = vsel %vm764_vm4, %v785_v16, %v786_v50 }
  0x55   : > { %v795_v23 = vrot.slane %v3418_v61, 2  ;;  %v796_v40 = vrot.slane %v3428_v3, 2  ;;  %v798_v56 = vrot.slane %v3435_v9, 2  ;;  %v789_v12 = vsel %vm764_vm4, %v786_v50, %v788_v1 }
  0x56   : > { %2553 = vrot.lane.b32.xlu0 %v2552_v25, %s3155_s9  ;;  %v800_v39 = vrot.slane %v3438_v11, 2  ;;  %v801_v55 = vrot.slane %v3440_v18, 2  ;;  %v803_v19 = vrot.slane %v3448_v22, 2  ;;  %v3685_v62 = vpack.i.bf16 %v784_v37, %v782_v29 }
  0x57   : > { %2558 = vrot.lane.b32.xlu1 %v3665_v31, %s3155_s9  ;;  %v792_v13 = vsel %vm764_vm4, %v790_v49, %v791_v24  ;;  %v794_v35 = vsel %vm764_vm4, %v791_v24, %v793_v27  ;;  %v805_v17 = vrot.slane %v3476_v57, 2  ;;  %v806_v9 = vrot.slane %v3478_v46, 2 }
  0x58   : > { %v3693_v21 = vpack.i.bf16 %v789_v12, %v787_v53  ;;  %v797_v22 = vsel %vm764_vm4, %v795_v23, %v796_v40  ;;  %v799_v34 = vsel %vm764_vm4, %v796_v40, %v798_v56  ;;  %v808_v25 = vrot.slane %v3480_v54, 2 }
  0x59   : > { %v802_v16 = vsel %vm764_vm4, %v800_v39, %v801_v55  ;;  %v804_v50 = vsel %vm764_vm4, %v801_v55, %v803_v19  ;;  %v3702_v1 = vpack.i.bf16 %v794_v35, %v792_v13  ;;  %v810_v29 = vrot.slane %v3522_v4, 2 }
  0x5a   : > { %2563 = vrot.lane.b32.xlu0 %v3667_v15, %s3155_s9  ;;  %v811_v37 = vrot.slane %v3524_v6, 2  ;;  %v3706_v49 = vpack.i.bf16 %v799_v34, %v797_v22  ;;  %v807_v24 = vsel %vm764_vm4, %v805_v17, %v806_v9  ;;  %v813_v27 = vrot.slane %v3526_v7, 2 }
  0x5b   : > { %2568 = vrot.lane.b32.xlu1 %v3685_v62, %s3155_s9  ;;  %v3712_v54 = vpack.i.bf16 %v804_v50, %v802_v16  ;;  %v809_v53 = vsel %vm764_vm4, %v806_v9, %v808_v25  ;;  %v815_v23 = vrot.slane %v3541_v41, 2  ;;  %v816_v40 = vrot.slane %v3545_v45, 2 }
  0x5c   : > { %v818_v56 = vrot.slane %v3547_v47, 2  ;;  %v820_v12 = vrot.slane %v3559_v8, 2  ;;  %v821_v39 = vrot.slane %v3561_v5, 2  ;;  %v823_v55 = vrot.slane %v3563_v10, 2 }
  0x5d   : > { %v812_v7 = vsel %vm764_vm4, %v810_v29, %v811_v37  ;;  %v825_v19 = vrot.slane %v3576_v33, 2  ;;  %v826_v13 = vrot.slane %v3581_v38, 2  ;;  %v828_v35 = vrot.slane %v3583_v43, 2 }
  0x5e   : > { %2573 = vrot.lane.b32.xlu0 %v3693_v21, %s3155_s9  ;;  %v814_v17 = vsel %vm764_vm4, %v811_v37, %v813_v27  ;;  %v830_v47 = vrot.slane %v3586_v2, 2  ;;  %v831_v9 = vrot.slane %v3597_v58, 2  ;;  %v833_v22 = vrot.slane %v3599_v26, 2 }
  0x5f   : > { %2578 = vrot.lane.b32.xlu1 %v3702_v1, %s3155_s9  ;;  %v3733_v10 = vpack.i.bf16 %v809_v53, %v807_v24  ;;  %v817_v34 = vsel %vm764_vm4, %v815_v23, %v816_v40  ;;  %v819_v25 = vsel %vm764_vm4, %v816_v40, %v818_v56  ;;  %v822_v16 = vsel %vm764_vm4, %v820_v12, %v821_v39 }
  0x60   : > { %v824_v43 = vsel %vm764_vm4, %v821_v39, %v823_v55  ;;  %v3741_v50 = vpack.i.bf16 %v814_v17, %v812_v7  ;;  %v827_v26 = vsel %vm764_vm4, %v825_v19, %v826_v13  ;;  %v829_v29 = vsel %vm764_vm4, %v826_v13, %v828_v35  ;;  %v4791_v7 = vld [vmem:[#allocation18_spill] sm:$0xff] }
  0x61   : > { %v832_v37 = vsel %vm764_vm4, %v830_v47, %v831_v9  ;;  %v834_v24 = vsel %vm764_vm4, %v831_v9, %v833_v22  ;;  %v3749_v27 = vpack.i.bf16 %v819_v25, %v817_v34  ;;  %v3751_v53 = vpack.i.bf16 %v824_v43, %v822_v16  ;;  %v4792_v22 = vld [vmem:[#allocation5_spill] sm:$0xff]  ;;  %v4793_v34 = vld [vmem:[#allocation6_spill] sm:$0xff]  ;;  %v4794_v16 = vld [vmem:[#allocation3_spill] sm:$0xff] }
  0x62   : > { %2583 = vrot.lane.b32.xlu0 %v3706_v49, %s3155_s9  ;;  %v835_v23 = vrot.slane %v3601_v44, 2  ;;  %v836_v40 = vrot.slane %v3610_v63, 2  ;;  %v3755_v56 = vpack.i.bf16 %v829_v29, %v827_v26  ;;  %v838_v12 = vrot.slane %v3612_v42, 2  ;;  %v4795_v43 = vld [vmem:[#allocation4_spill] sm:$0xff] }
  0x63   : > { %2588 = vrot.lane.b32.xlu1 %v3712_v54, %s3155_s9  ;;  %v3760_v39 = vpack.i.bf16 %v834_v24, %v832_v37  ;;  %v840_v55 = vrot.slane %v3621_v0, 2  ;;  %v841_v19 = vrot.slane %v4791_v7, 2  ;;  %v843_v13 = vrot.slane %v3627_v48, 2 }
  0x64   : > { %v837_v35 = vsel %vm764_vm4, %v835_v23, %v836_v40  ;;  %v839_v17 = vsel %vm764_vm4, %v836_v40, %v838_v12  ;;  %v2632_v25 = vpack.i.bf16 %v4793_v34, %v4792_v22  ;;  %v2637_v26 = vpack.i.bf16 %v4795_v43, %v4794_v16  ;;  %v3115_v40 = vld [vmem:[%s4734_s1] ss:$0 sm:$0xff]  ;;  %v4800_v34 = vld [vmem:[#allocation11_spill] sm:$0xff]  ;;  %v4801_v43 = vld [vmem:[#allocation12_spill] sm:$0xff] }
  0x65   : > { %v842_v42 = vsel %vm764_vm4, %v840_v55, %v841_v19  ;;  %v844_v47 = vsel %vm764_vm4, %v841_v19, %v843_v13  ;;  %v3775_v9 = vpack.i.bf16 %v839_v17, %v837_v35  ;;  %v2642_v29 = vpack.i.bf16 %v3381_v36, %v3373_v30  ;;  %v3112_v30 = vld [vmem:[%s4736_s3] sm:$0xff]   ;;  %v4796_v36 = vld [vmem:[#allocation8_spill] sm:$0xff] }
  0x66   : > { %2593 = vrot.lane.b32.xlu0 %v3733_v10, %s3155_s9  ;;  %v3779_v48 = vpack.i.bf16 %v844_v47, %v842_v42  ;;  %v2647_v37 = vpack.i.bf16 %v3404_v52, %v3402_v51  ;;  %v2652_v24 = vpack.i.bf16 %v3416_v60, %v3414_v59  ;;  %v3801_v23 = vpack.i.bf16 %v3428_v3, %v3418_v61  ;;  %v4797_v51 = vld [vmem:[#allocation7_spill] sm:$0xff]  ;;  %v3113_v52 = vld [vmem:[%s4736_s3 + $0x8] sm:$0xff]   ;;  %v4798_v61 = vld [vmem:[#allocation9_spill] sm:$0xff] }
  0x67   : > { %2598 = vrot.lane.b32.xlu1 %v3741_v50, %s3155_s9  ;;  %2409 = vmatprep.subr.bf16.mxu0 %v3112_v30  ;;  %v3114_v59 = vld [vmem:[%s4736_s3 + $0x10] ss:$0 sps:$4 sm:$0x33]   ;;  %v3116_v19 = vld [vmem:[%s4735_s2] ss:$0 sm:$0xff]  ;;  %v4799_v42 = vld [vmem:[#allocation10_spill] sm:$0xff] }
  0x68   : > { %2410 = vmatpush3.bf16.msra.mxu0 %v3112_v30  ;;  %2447 = vmatprep.subr.bf16.mxu1 %v3112_v30  ;;  %v1900_v60 = vsel %vm1898_vm5, %v3114_v59, 0  ;;  %v294_v3 = vld [vmem:[%s3270_s29 + $0xf0] sm:$0xff] }
  0x69   : > { %2450 = vmatpush3.bf16.msra.mxu1 %v3112_v30  ;;  %2411 = vmatprep.subr.bf16.mxu0 %v3113_v52  ;;  %v333_v12 = vmul.f32 %v3115_v40, %v294_v3 }
  0x6a   : > { %2603 = vrot.lane.b32.xlu0 %v3749_v27, %s3155_s9  ;;  %2448 = vmatprep.subr.bf16.mxu1 %v3113_v52 }
  0x6b   : > { %2608 = vrot.lane.b32.xlu1 %v3751_v53, %s3155_s9  ;;  %v372_v13 = vadd.f32 %v3116_v19, %v333_v12 }
  0x6c   : > { %2412 = vmatpush3.bf16.msra.mxu0 %v3113_v52 }
  0x6d   : > { %2451 = vmatpush3.bf16.msra.mxu1 %v3113_v52  ;;  %2453 = vmatprep.subr.msk.bf16.mxu0 %vm1898_vm5, %v3114_v59  ;;  %v404_v17 = vmax.f32 %v372_v13, 0.0  ;;  %v4805_v52 = vld [vmem:[#allocation14_spill] sm:$0xff]  ;;  %v4807_v13 = vld [vmem:[#allocation16_spill] sm:$0xff] }
  0x6e   : > { %2613 = vrot.lane.b32.xlu0 %v3755_v56, %s3155_s9  ;;  %2454 = vmatprep.subr.msk.bf16.mxu1 %vm1898_vm5, %v3114_v59  ;;  %v2847_v59 = vpack.i.bf16 %v3524_v6, %v3522_v4 }
  0x6f   : > { %2618 = vrot.lane.b32.xlu1 %v3760_v39, %s3155_s9  ;;  %483 = vst.msk [vmem:[#allocation2 + $0x181] sm:$0xff] %vm406_vm0, %v404_v17 }
  0x70   : > { %2414 = vmatpush3.bf16.msra.mxu0 %v1900_v60 }
  0x71   : > { %2452 = vmatpush3.bf16.msra.mxu1 %v1900_v60 }
  0x72   : > { %2623 = vrot.lane.b32.xlu0 %v3775_v9, %s3155_s9 }
  0x73   : > { %2628 = vrot.lane.b32.xlu1 %v3779_v48, %s3155_s9  ;;  %s4563_s9 = scalar_lea.vmem %s4738_s5, %s2388_s24  ;;  %s2363_s24 = sshll.u32 %s4832_s22, 1 }
  0x74   : > { %s262_s12 = scalar_lea.vmem %s4739_s6, %s2363_s24 }
  0x76   : > { %2633 = vrot.lane.b32.xlu0 %v2632_v25, %s3156_s10 }
  0x77   : > { %2638 = vrot.lane.b32.xlu1 %v2637_v26, %s3156_s10 }
  0x7a   : > { %2643 = vrot.lane.b32.xlu0 %v2642_v29, %s3156_s10 }
  0x7b   : > { %2648 = vrot.lane.b32.xlu1 %v2647_v37, %s3156_s10 }
  0x7e   : > { %2653 = vrot.lane.b32.xlu0 %v2652_v24, %s3156_s10 }
  0x7f   : > { %2658 = vrot.lane.b32.xlu1 %v3801_v23, %s3156_s10 }
  0x82   : > { %2663 = vrot.lane.b32.xlu0 %v4796_v36, %s3157_s13 }
  0x83   : > { %2668 = vrot.lane.b32.xlu1 %v4797_v51, %s3157_s13 }
  0x86   : > { %2673 = vrot.lane.b32.xlu0 %v3665_v31, %s3158_s16  ;;  %v295_v31 = vld [vmem:[%s3270_s29 + $0xf8] sm:$0xff] }
  0x87   : > { %2678 = vrot.lane.b32.xlu1 %v3667_v15, %s3158_s16  ;;  %v334_v55 = vmul.f32 %v3115_v40, %v295_v31  ;;  %v4806_v31 = vld [vmem:[#allocation15_spill] sm:$0xff]  ;;  %v2877_v40 = vpack.i.bf16 %v3545_v45, %v3541_v41 }
  0x89   : > { %v373_v35 = vadd.f32 %v3116_v19, %v334_v55 }
  0x8a   : > { %2683 = vrot.lane.b32.xlu0 %v2637_v26, %s3159_s19 }
  0x8b   : > { %2688 = vrot.lane.b32.xlu1 %v2642_v29, %s3159_s19 }
  0x8e   : > { %2693 = vrot.lane.b32.xlu0 %v4797_v51, %s3160_s20 }
  0x8f   : > { %2698 = vrot.lane.b32.xlu1 %v4798_v61, %s3160_s20 }
  0x92   : > { %2703 = vrot.lane.b32.xlu0 %v3667_v15, %s3161_s23  ;;  %v405_v15 = vmax.f32 %v373_v35, 0.0  ;;  %v2907_v35 = vpack.i.bf16 %v3561_v5, %v3559_v8 }
  0x93   : > { %2708 = vrot.lane.b32.xlu1 %v3685_v62, %s3161_s23 }
  0x94   : > { %484 = vst.msk [vmem:[#allocation2 + $0x189] sm:$0xff] %vm406_vm0, %v405_v15 }
  0x96   : > { %2713 = vrot.lane.b32.xlu0 %v4798_v61, %s3157_s13 }
  0x97   : > { %2718 = vrot.lane.b32.xlu1 %v4799_v42, %s3157_s13 }
  0x9a   : > { %2723 = vrot.lane.b32.xlu0 %v3685_v62, %s3158_s16 }
  0x9b   : > { %2728 = vrot.lane.b32.xlu1 %v3693_v21, %s3158_s16 }
  0x9e   : > { %2733 = vrot.lane.b32.xlu0 %v2647_v37, %s3159_s19 }
  0x9f   : > { %2738 = vrot.lane.b32.xlu1 %v2652_v24, %s3159_s19 }
  0xa0   : > { %v3852_v47 = vpop.permute.xlu0 %2473 }
  0xa2   : > { %2743 = vrot.lane.b32.xlu0 %v4799_v42, %s3160_s20 }
  0xa3   : > { %v3857_v22 = vpop.permute.xlu1 %2483  ;;  %2748 = vrot.lane.b32.xlu1 %v4800_v34, %s3160_s20 }
  0xa4   : > { %v3861_v25 = vpop.permute.xlu0 %2478 }
  0xa6   : > { %2753 = vrot.lane.b32.xlu0 %v3693_v21, %s3161_s23  ;;  %v2787_v21 = vpack.i.bf16 %v3440_v18, %v3438_v11  ;;  %v2817_v18 = vpack.i.bf16 %v3478_v46, %v3476_v57 }
  0xa7   : > { %v3865_v62 = vpop.permute.xlu1 %2488  ;;  %2758 = vrot.lane.b32.xlu1 %v3702_v1, %s3161_s23 }
  0xa8   : > { %v3869_v16 = vpop.permute.xlu0 %2493 }
  0xaa   : > { %2763 = vrot.lane.b32.xlu0 %v4800_v34, %s3157_s13 }
  0xab   : > { %2768 = vrot.lane.b32.xlu1 %v4801_v43, %s3157_s13  ;;  %v3875_v26 = vpop.permute.xlu1 %2498 }
  0xac   : > { %v3879_v29 = vpop.permute.xlu0 %2503 }
  0xae   : > { %2773 = vrot.lane.b32.xlu0 %v3702_v1, %s3158_s16  ;;  %v4802_v1 = vld [vmem:[#allocation13_spill] sm:$0xff] }
  0xaf   : > { %2778 = vrot.lane.b32.xlu1 %v3706_v49, %s3158_s16  ;;  %v3887_v37 = vpop.permute.xlu1 %2508 }
  0xb0   : > { %v3890_v24 = vpop.permute.xlu0 %2513 }
  0xb2   : > { %2783 = vrot.lane.b32.xlu0 %v3801_v23, %s3159_s19 }
  0xb3   : > { %2788 = vrot.lane.b32.xlu1 %v2787_v21, %s3159_s19 }
  0xb6   : > { %2793 = vrot.lane.b32.xlu0 %v4801_v43, %s3160_s20 }
  0xb7   : > { %2798 = vrot.lane.b32.xlu1 %v4802_v1, %s3160_s20  ;;  %v3896_v30 = vpop.permute.xlu1 %2518 }
  0xba   : > { %2803 = vrot.lane.b32.xlu0 %v3706_v49, %s3161_s23  ;;  %v3900_v11 = vpop.permute.xlu0 %2523 }
  0xbb   : > { %2808 = vrot.lane.b32.xlu1 %v3712_v54, %s3161_s23 }
  0xbd   : > { %v3907_v23 = vpop.permute.xlu1 %2528 }
  0xbe   : > { %2813 = vrot.lane.b32.xlu0 %v2787_v21, %s3156_s10 }
  0xbf   : > { %2818 = vrot.lane.b32.xlu1 %v2817_v18, %s3156_s10 }
  0xc0   : > { %v3909_v36 = vpop.permute.xlu0 %2533 }
  0xc1   : > { %4803 = vst [vmem:[#allocation18_spill] sm:$0xff] %v3909_v36  ;;  %v3914_v49 = vpop.permute.xlu1 %2538 }
  0xc2   : > { %2823 = vrot.lane.b32.xlu0 %v4802_v1, %s3157_s13  ;;  %4804 = vst [vmem:[#allocation5_spill] sm:$0xff] %v3914_v49 }
  0xc3   : > { %2828 = vrot.lane.b32.xlu1 %v4805_v52, %s3157_s13 }
  0xc4   : > { %v2544_v51 = vpop.permute.xlu0 %2543 }
  0xc5   : > { %v2549_v57 = vpop.permute.xlu1 %2548  ;;  %v2546_v17 = vunpack.i.h.bf16 %v2544_v51  ;;  %v2545_v15 = vunpack.i.l.bf16 %v2544_v51 }
  0xc6   : > { %2833 = vrot.lane.b32.xlu0 %v3712_v54, %s3158_s16  ;;  %v2551_v34 = vunpack.i.h.bf16 %v2549_v57  ;;  %v2550_v43 = vunpack.i.l.bf16 %v2549_v57 }
  0xc7   : > { %2838 = vrot.lane.b32.xlu1 %v3733_v10, %s3158_s16 }
  0xc8   : > { %v3920_v46 = vpop.permute.xlu0 %2553 }
  0xc9   : > { %v3927_v60 = vpop.permute.xlu1 %2558 }
  0xca   : > { %2843 = vrot.lane.b32.xlu0 %v2817_v18, %s3159_s19  ;;  %v1572_v18 = vsel %vm406_vm0, %v3610_v63, %v2546_v17 }
  0xcb   : > { %2848 = vrot.lane.b32.xlu1 %v2847_v59, %s3159_s19 }
  0xcc   : > { %v3929_v61 = vpop.permute.xlu0 %2563 }
  0xcd   : > { %v3934_v54 = vpop.permute.xlu1 %2568 }
  0xce   : > { %2853 = vrot.lane.b32.xlu0 %v4805_v52, %s3160_s20  ;;  %v1571_v52 = vsel %vm406_vm0, %v3601_v44, %v2545_v15  ;;  %v4813_v15 = vld [vmem:[#allocation17_spill] sm:$0xff] }
  0xcf   : > { %2858 = vrot.lane.b32.xlu1 %v4806_v31, %s3160_s20 }
  0xd0   : > { %v3936_v3 = vpop.permute.xlu0 %2573 }
  0xd1   : > { %v3942_v4 = vpop.permute.xlu1 %2578 }
  0xd2   : > { %2863 = vrot.lane.b32.xlu0 %v3733_v10, %s3161_s23 }
  0xd3   : > { %2868 = vrot.lane.b32.xlu1 %v3741_v50, %s3161_s23 }
  0xd4   : > { %v3944_v6 = vpop.permute.xlu0 %2583 }
  0xd5   : > { %v3951_v12 = vpop.permute.xlu1 %2588 }
  0xd6   : > { %2873 = vrot.lane.b32.xlu0 %v2847_v59, %s3156_s10 }
  0xd7   : > { %2878 = vrot.lane.b32.xlu1 %v2877_v40, %s3156_s10 }
  0xd8   : > { %v3953_v55 = vpop.permute.xlu0 %2593 }
  0xd9   : > { %v3958_v10 = vpop.permute.xlu1 %2598 }
  0xda   : > { %2883 = vrot.lane.b32.xlu0 %v4806_v31, %s3157_s13  ;;  %v1574_v31 = vsel %vm406_vm0, %v4791_v7, %v2551_v34 }
  0xdb   : > { %2888 = vrot.lane.b32.xlu1 %v4807_v13, %s3157_s13 }
  0xdc   : > { %v3960_v19 = vpop.permute.xlu0 %2603 }
  0xdd   : > { %v3966_v41 = vpop.permute.xlu1 %2608 }
  0xde   : > { %2893 = vrot.lane.b32.xlu0 %v3741_v50, %s3158_s16  ;;  %4808 = vst [vmem:[#allocation6_spill] sm:$0xff] %v3966_v41 }
  0xdf   : > { %2898 = vrot.lane.b32.xlu1 %v3749_v27, %s3158_s16 }
  0xe0   : > { %v3968_v45 = vpop.permute.xlu0 %2613 }
  0xe1   : > { %4809 = vst [vmem:[#allocation3_spill] sm:$0xff] %v3968_v45  ;;  %v3975_v42 = vpop.permute.xlu1 %2618  ;;  %v3120_v45 = vld [vmem:[#allocation2 + $0x18] sm:$0xff] }
  0xe2   : > { %2903 = vrot.lane.b32.xlu0 %v2877_v40, %s3159_s19  ;;  %4810 = vst [vmem:[#allocation4_spill] sm:$0xff] %v3975_v42  ;;  %v1573_v40 = vsel %vm406_vm0, %v3621_v0, %v2550_v43  ;;  %v2937_v43 = vpack.i.bf16 %v3581_v38, %v3576_v33  ;;  %v2475_v33 = vunpack.i.l.bf16 %v3852_v47  ;;  %v3119_v42 = vld [vmem:[#allocation2 + $0x20] sm:$0xff] }
  0xe3   : > { %2908 = vrot.lane.b32.xlu1 %v2907_v35, %s3159_s19 }
  0xe4   : > { %v2624_v21 = vpop.permute.xlu0 %2623 }
  0xe5   : > { %v2626_v50 = vunpack.i.h.bf16 %v2624_v21  ;;  %v2625_v1 = vunpack.i.l.bf16 %v2624_v21  ;;  %v2629_v8 = vpop.permute.xlu1 %2628 }
  0xe6   : > { %2913 = vrot.lane.b32.xlu0 %v4807_v13, %s3160_s20  ;;  %v2631_v57 = vunpack.i.h.bf16 %v2629_v8  ;;  %v2630_v59 = vunpack.i.l.bf16 %v2629_v8 }
  0xe7   : > { %v3985_v5 = vsel %vm1575_vm6, %v1571_v52, %v2625_v1  ;;  %v3988_v51 = vsel %vm1575_vm6, %v1572_v18, %v2626_v50  ;;  %2918 = vrot.lane.b32.xlu1 %v4813_v15, %s3160_s20  ;;  %v2476_v52 = vunpack.i.h.bf16 %v3852_v47  ;;  %v4046_v47 = vpack.i.bf16 %v4791_v7, %v3621_v0 }
  0xe8   : > { %4811 = vst [vmem:[#allocation8_spill] sm:$0xff] %v3985_v5  ;;  %4812 = vst [vmem:[#allocation7_spill] sm:$0xff] %v3988_v51  ;;  %v3994_v17 = vpop.permute.xlu0 %2633  ;;  %v3999_v13 = vsel %vm1575_vm6, %v1574_v31, %v2631_v57  ;;  %v4002_v21 = vsel %vm1575_vm6, %v1573_v40, %v2630_v59  ;;  %v4040_v57 = vpack.i.bf16 %v3610_v63, %v3601_v44  ;;  %v4042_v59 = vld [vmem:[#allocation2 + $0x180] sm:$0xff]  ;;  %v3117_v31 = vld [vmem:[#allocation2 + $0x8] sm:$0xff]  ;;  %v2556_v7 = vunpack.i.h.bf16 %v3920_v46 }
  0xe9   : > { %4814 = vst [vmem:[#allocation9_spill] sm:$0xff] %v3999_v13  ;;  %4815 = vst [vmem:[#allocation10_spill] sm:$0xff] %v4002_v21  ;;  %v4006_v50 = vpop.permute.xlu1 %2638  ;;  %v1544_v40 = vsel %vm406_vm0, %v3117_v31, %v2476_v52  ;;  %v4055_v44 = vld [vmem:[#allocation2 + $0x188] sm:$0xff]  ;;  %v3118_v63 = vld [vmem:[#allocation2] sm:$0xff]  ;;  %v2555_v52 = vunpack.i.l.bf16 %v3920_v46  ;;  %v2560_v13 = vunpack.i.l.bf16 %v3927_v60  ;;  %v2636_v21 = vunpack.i.h.bf16 %v3994_v17 }
  0xea   : > { %2923 = vrot.lane.b32.xlu0 %v3749_v27, %s3161_s23  ;;  %v1543_v0 = vsel %vm406_vm0, %v3118_v63, %v2475_v33  ;;  %v2635_v51 = vunpack.i.l.bf16 %v3994_v17  ;;  %v2641_v17 = vunpack.i.h.bf16 %v4006_v50  ;;  %v1577_v63 = vsel %vm1575_vm6, %v1544_v40, %v2556_v7 }
  0xeb   : > { %2928 = vrot.lane.b32.xlu1 %v3751_v53, %s3161_s23  ;;  %v1576_v33 = vsel %vm1575_vm6, %v1543_v0, %v2555_v52 }
  0xec   : > { %v4008_v34 = vpop.permute.xlu0 %2643 }
  0xed   : > { %v4015_v1 = vpop.permute.xlu1 %2648 }
  0xee   : > { %2933 = vrot.lane.b32.xlu0 %v2907_v35, %s3156_s10  ;;  %v4036_v35 = vpack.i.bf16 %v3597_v58, %v3586_v2  ;;  %v4057_v2 = vld [vmem:[#allocation2 + $0x190] sm:$0x3] }
  0xef   : > { %2938 = vrot.lane.b32.xlu1 %v2937_v43, %s3156_s10 }
  0xf0   : > { %v4017_v18 = vpop.permute.xlu0 %2653 }
  0xf1   : > { %v4022_v27 = vpop.permute.xlu1 %2658 }
  0xf2   : > { %2943 = vrot.lane.b32.xlu0 %v4813_v15, %s3157_s13  ;;  %v2480_v15 = vunpack.i.l.bf16 %v3861_v25 }
  0xf3   : > { %2948 = vrot.lane.b32.xlu1 %v3616_v20, %s3157_s13 }
  0xf4   : > { %v4025_v8 = vpop.permute.xlu0 %2663  ;;  %v1545_v49 = vsel %vm406_vm0, %v3120_v45, %v2480_v15  ;;  %v1609_v15 = vsel %vm1608_vm7, %v1576_v33, %v2635_v51 }
  0xf5   : > { %v4032_v38 = vpop.permute.xlu1 %2668  ;;  %v2666_v31 = vunpack.i.h.bf16 %v4025_v8 }
  0xf6   : > { %2953 = vrot.lane.b32.xlu0 %v3751_v53, %s3158_s16  ;;  %v2481_v53 = vunpack.i.h.bf16 %v3861_v25  ;;  %v2561_v25 = vunpack.i.h.bf16 %v3927_v60  ;;  %v2671_v40 = vunpack.i.h.bf16 %v4032_v38  ;;  %v2670_v0 = vunpack.i.l.bf16 %v4032_v38 }
  0xf7   : > { %2958 = vrot.lane.b32.xlu1 %v3755_v56, %s3158_s16 }
  0xf8   : > { %v4051_v58 = vpop.permute.xlu0 %2673  ;;  %v1546_v60 = vsel %vm406_vm0, %v3119_v42, %v2481_v53  ;;  %v2665_v42 = vunpack.i.l.bf16 %v4025_v8  ;;  %v1578_v53 = vsel %vm1575_vm6, %v1545_v49, %v2560_v13 }
  0xf9   : > { %v2679_v5 = vpop.permute.xlu1 %2678  ;;  %v1579_v45 = vsel %vm1575_vm6, %v1546_v60, %v2561_v25  ;;  %v2676_v7 = vunpack.i.h.bf16 %v4051_v58  ;;  %v2675_v8 = vunpack.i.l.bf16 %v4051_v58 }
  0xfa   : > { %2963 = vrot.lane.b32.xlu0 %v2937_v43, %s3159_s19  ;;  %v2640_v43 = vunpack.i.l.bf16 %v4006_v50  ;;  %v1610_v50 = vsel %vm1608_vm7, %v1577_v63, %v2636_v21  ;;  %v1612_v13 = vsel %vm1608_vm7, %v1579_v45, %v2641_v17  ;;  %v2681_v51 = vunpack.i.h.bf16 %v2679_v5 }
  0xfb   : > { %2968 = vrot.lane.b32.xlu1 %v4036_v35, %s3159_s19  ;;  %v2680_v52 = vunpack.i.l.bf16 %v2679_v5  ;;  %v1643_v25 = vsel %vm1641_vm8, %v1610_v50, %v2666_v31 }
  0xfc   : > { %v2684_v36 = vpop.permute.xlu0 %2683  ;;  %v1611_v49 = vsel %vm1608_vm7, %v1578_v53, %v2640_v43  ;;  %v1645_v43 = vsel %vm1641_vm8, %v1612_v13, %v2671_v40 }
  0xfd   : > { %v2689_v46 = vpop.permute.xlu1 %2688  ;;  %v2686_v38 = vunpack.i.h.bf16 %v2684_v36  ;;  %v2685_v33 = vunpack.i.l.bf16 %v2684_v36  ;;  %v1644_v5 = vsel %vm1641_vm8, %v1611_v49, %v2670_v0  ;;  %v1678_v36 = vsel %vm1674_vm9, %v1645_v43, %v2681_v51 }
  0xfe   : > { %2973 = vrot.lane.b32.xlu0 %v3616_v20, %s3160_s20  ;;  %v1642_v20 = vsel %vm1641_vm8, %v1609_v15, %v2665_v42  ;;  %v2691_v63 = vunpack.i.h.bf16 %v2689_v46  ;;  %v2690_v60 = vunpack.i.l.bf16 %v2689_v46  ;;  %v1676_v42 = vsel %vm1674_vm9, %v1643_v25, %v2676_v7 }
  0xff   : > { %2978 = vrot.lane.b32.xlu1 %v3633_v32, %s3160_s20  ;;  %v1675_v53 = vsel %vm1674_vm9, %v1642_v20, %v2675_v8  ;;  %v1677_v31 = vsel %vm1674_vm9, %v1644_v5, %v2680_v52  ;;  %v1709_v50 = vsel %vm1707_vm10, %v1676_v42, %v2686_v38  ;;  %v1144_v5 = vrot.slane %v4057_v2, 2 }
 0x100   : > { %v2694_v21 = vpop.permute.xlu0 %2693  ;;  %v1710_v8 = vsel %vm1707_vm10, %v1677_v31, %v2690_v60  ;;  %v1711_v7 = vsel %vm1707_vm10, %v1678_v36, %v2691_v63  ;;  %v4136_v42 = vpack.i.bf16 %v4055_v44, %v4042_v59  ;;  %v2491_v31 = vunpack.i.h.bf16 %v3865_v62 }
 0x101   : > { %v2696_v58 = vunpack.i.h.bf16 %v2694_v21  ;;  %v2695_v41 = vunpack.i.l.bf16 %v2694_v21  ;;  %v2699_v17 = vpop.permute.xlu1 %2698  ;;  %v2490_v36 = vunpack.i.l.bf16 %v3865_v62  ;;  %v4820_v62 = vrot.slane %v4057_v2, 1 }
 0x102   : > { %2983 = vrot.lane.b32.xlu0 %v3755_v56, %s3161_s23  ;;  %v2701_v45 = vunpack.i.h.bf16 %v2699_v17  ;;  %v2700_v46 = vunpack.i.l.bf16 %v2699_v17  ;;  %v1708_v56 = vsel %vm1707_vm10, %v1675_v53, %v2685_v33  ;;  %v1142_v17 = vrot.slane %v4055_v44, 2 }
 0x103   : > { %2988 = vrot.lane.b32.xlu1 %v3760_v39, %s3161_s23  ;;  %v1741_v13 = vsel %vm1740_vm11, %v1708_v56, %v2695_v41  ;;  %v1742_v51 = vsel %vm1740_vm11, %v1709_v50, %v2696_v58  ;;  %v1141_v41 = vrot.slane %v4042_v59, 2  ;;  %v4818_v56 = vunpack.i.h.bf16 %v3857_v22 }
 0x104   : > { %v2704_v15 = vpop.permute.xlu0 %2703  ;;  %v1743_v38 = vsel %vm1740_vm11, %v1710_v8, %v2700_v46  ;;  %v1744_v33 = vsel %vm1740_vm11, %v1711_v7, %v2701_v45  ;;  %v4816_v45 = vrot.slane %v4055_v44, 1  ;;  %v4817_v46 = vrot.slane %v4042_v59, 1 }
 0x105   : > { %v2706_v0 = vunpack.i.h.bf16 %v2704_v15  ;;  %v2705_v40 = vunpack.i.l.bf16 %v2704_v15  ;;  %v2709_v49 = vpop.permute.xlu1 %2708  ;;  %v2571_v2 = vunpack.i.h.bf16 %v3934_v54  ;;  %v2570_v44 = vunpack.i.l.bf16 %v3934_v54 }
 0x106   : > { %2993 = vrot.lane.b32.xlu0 %v4036_v35, %s3156_s10  ;;  %v2711_v52 = vunpack.i.h.bf16 %v2709_v49  ;;  %v2710_v21 = vunpack.i.l.bf16 %v2709_v49  ;;  %v4145_v15 = vsel %vm587_vm3, %v4817_v46, %v4816_v45  ;;  %v4821_v59 = vmov %v4816_v45 }
 0x107   : > { %v1774_v20 = vsel %vm1773_vm12, %v1741_v13, %v2705_v40  ;;  %v1775_v25 = vsel %vm1773_vm12, %v1742_v51, %v2706_v0  ;;  %2998 = vrot.lane.b32.xlu1 %v4040_v57, %s3156_s10  ;;  %v3122_v0 = vld [vmem:[#allocation2 + $0x30] sm:$0xff]  ;;  %v4819_v40 = vunpack.i.l.bf16 %v3857_v22  ;;  %v4163_v49 = vsel %vm587_vm3, %v4821_v59, %v4820_v62 }
 0x108   : > { %v4120_v60 = vpop.permute.xlu0 %2713  ;;  %v1806_v35 = vpack.c.bf16 %v1775_v25, %v1774_v20  ;;  %v1776_v63 = vsel %vm1773_vm12, %v1743_v38, %v2710_v21  ;;  %v1777_v58 = vsel %vm1773_vm12, %v1744_v33, %v2711_v52  ;;  %v2566_v13 = vunpack.i.h.bf16 %v3929_v61  ;;  %v4173_v21 = vld [vmem:[#allocation2 + $0x198] sm:$0xff]  ;;  %v4175_v20 = vld [vmem:[#allocation2 + $0x1a0] sm:$0xff]  ;;  %v3123_v33 = vld [vmem:[#allocation2 + $0x50] sm:$0xff] }
 0x109   : > { %v1807_v43 = vpack.c.bf16 %v1777_v58, %v1776_v63  ;;  %v4132_v53 = vpop.permute.xlu1 %2718  ;;  %v1547_v8 = vsel %vm406_vm0, %v3122_v0, %v4819_v40  ;;  %v2565_v22 = vunpack.i.l.bf16 %v3929_v61  ;;  %v4168_v51 = vsel %vm764_vm4, %v1141_v41, %v1142_v17  ;;  %v3124_v41 = vld [vmem:[#allocation2 + $0x48] sm:$0xff] }
 0x10a   : > { %3003 = vrot.lane.b32.xlu0 %v3633_v32, %s3157_s13  ;;  %2415 = vmatprep.mubr.msk.bf16.mxu0 %vm1849_vm13, %v1806_v35  ;;  %v3121_v32 = vld [vmem:[#allocation2 + $0x38] sm:$0xff]  ;;  %v4171_v52 = vsel %vm764_vm4, %v1142_v17, %v1144_v5  ;;  %v2646_v25 = vunpack.i.h.bf16 %v4008_v34  ;;  %v2645_v38 = vunpack.i.l.bf16 %v4008_v34  ;;  %v1550_v35 = vsel %vm406_vm0, %v3123_v33, %v2491_v31 }
 0x10b   : > { %v1548_v50 = vsel %vm406_vm0, %v3121_v32, %v4818_v56  ;;  %3008 = vrot.lane.b32.xlu1 %v3638_v28, %s3157_s13  ;;  %2416 = vmatmul.mubr.msk.bf16.vlgmr.msra.gmra.mrb[0].mxu0 %vm1849_vm13, %v1807_v43  ;;  %v1549_v63 = vsel %vm406_vm0, %v3124_v41, %v2490_v36  ;;  %v2496_v58 = vunpack.i.h.bf16 %v3869_v16  ;;  %v2495_v17 = vunpack.i.l.bf16 %v3869_v16 }
 0x10c   : > { %v4153_v7 = vpop.permute.xlu0 %2723  ;;  %v2651_v54 = vunpack.i.h.bf16 %v4015_v1  ;;  %v2650_v5 = vunpack.i.l.bf16 %v4015_v1  ;;  %v1341_v34 = vrot.slane %v4173_v21, 1  ;;  %v1581_v31 = vsel %vm1575_vm6, %v1548_v50, %v2566_v13 }
 0x10d   : > { %v2729_v61 = vpop.permute.xlu1 %2728  ;;  %v1580_v36 = vsel %vm1575_vm6, %v1547_v8, %v2565_v22  ;;  %v2716_v45 = vunpack.i.h.bf16 %v4120_v60  ;;  %v2715_v46 = vunpack.i.l.bf16 %v4120_v60  ;;  %v1583_v32 = vsel %vm1575_vm6, %v1550_v35, %v2571_v2 }
 0x10e   : > { %3013 = vrot.lane.b32.xlu0 %v3760_v39, %s3158_s16  ;;  %v1342_v39 = vrot.slane %v4175_v20, 1  ;;  %v1582_v1 = vsel %vm1575_vm6, %v1549_v63, %v2570_v44  ;;  %v1613_v56 = vsel %vm1608_vm7, %v1580_v36, %v2645_v38  ;;  %v1614_v0 = vsel %vm1608_vm7, %v1581_v31, %v2646_v25 }
 0x10f   : > { %3018 = vrot.lane.b32.xlu1 %v3775_v9, %s3158_s16  ;;  %v2721_v50 = vunpack.i.h.bf16 %v4132_v53  ;;  %v2720_v8 = vunpack.i.l.bf16 %v4132_v53  ;;  %v2726_v62 = vunpack.i.h.bf16 %v4153_v7  ;;  %v2725_v60 = vunpack.i.l.bf16 %v4153_v7 }
 0x110   : > { %v2734_v43 = vpop.permute.xlu0 %2733  ;;  %v1615_v59 = vsel %vm1608_vm7, %v1582_v1, %v2650_v5  ;;  %v1616_v13 = vsel %vm1608_vm7, %v1583_v32, %v2651_v54  ;;  %v2731_v22 = vunpack.i.h.bf16 %v2729_v61  ;;  %v2730_v2 = vunpack.i.l.bf16 %v2729_v61 }
 0x111   : > { %v2739_v40 = vpop.permute.xlu1 %2738  ;;  %v1647_v25 = vsel %vm1641_vm8, %v1614_v0, %v2716_v45  ;;  %v2736_v38 = vunpack.i.h.bf16 %v2734_v43  ;;  %v2735_v53 = vunpack.i.l.bf16 %v2734_v43  ;;  %v1648_v61 = vsel %vm1641_vm8, %v1615_v59, %v2720_v8 }
 0x112   : > { %3023 = vrot.lane.b32.xlu0 %v4040_v57, %s3159_s19  ;;  %v1646_v57 = vsel %vm1641_vm8, %v1613_v56, %v2715_v46  ;;  %v2741_v33 = vunpack.i.h.bf16 %v2739_v40  ;;  %v2740_v35 = vunpack.i.l.bf16 %v2739_v40  ;;  %v1649_v54 = vsel %vm1641_vm8, %v1616_v13, %v2721_v50  ;;  %v538_v40 = vld [vmem:[#allocation2 + $0x1a8] sm:$0x3] }
 0x113   : > { %3028 = vrot.lane.b32.xlu1 %v4046_v47, %s3159_s19  ;;  %v1679_v5 = vsel %vm1674_vm9, %v1646_v57, %v2725_v60  ;;  %v1680_v31 = vsel %vm1674_vm9, %v1647_v25, %v2726_v62  ;;  %v1681_v36 = vsel %vm1674_vm9, %v1648_v61, %v2730_v2  ;;  %v1682_v43 = vsel %vm1674_vm9, %v1649_v54, %v2731_v22 }
 0x114   : > { %v2744_v44 = vpop.permute.xlu0 %2743  ;;  %v1713_v1 = vsel %vm1707_vm10, %v1680_v31, %v2736_v38  ;;  %v1714_v50 = vsel %vm1707_vm10, %v1681_v36, %v2740_v35  ;;  %v1715_v8 = vsel %vm1707_vm10, %v1682_v43, %v2741_v33  ;;  %v1344_v33 = vrot.slane %v538_v40, 1  ;;  %v3126_v31 = vld [vmem:[#allocation2 + $0x60] sm:$0xff] }
 0x115   : > { %v2746_v41 = vunpack.i.h.bf16 %v2744_v44  ;;  %v2745_v7 = vunpack.i.l.bf16 %v2744_v44  ;;  %v2749_v63 = vpop.permute.xlu1 %2748  ;;  %v1443_v36 = vrot.slane %v4175_v20, 2  ;;  %v4272_v16 = vsel %vm587_vm3, %v1341_v34, %v1342_v39 }
 0x116   : > { %3033 = vrot.lane.b32.xlu0 %v3638_v28, %s3160_s20  ;;  %v2751_v45 = vunpack.i.h.bf16 %v2749_v63  ;;  %v2750_v46 = vunpack.i.l.bf16 %v2749_v63  ;;  %v1712_v28 = vsel %vm1707_vm10, %v1679_v5, %v2735_v53  ;;  %v4255_v5 = vpack.i.bf16 %v4171_v52, %v4168_v51 }
 0x117   : > { %3038 = vrot.lane.b32.xlu1 %v3651_v14, %s3160_s20  ;;  %v1745_v62 = vsel %vm1740_vm11, %v1712_v28, %v2745_v7  ;;  %v1746_v60 = vsel %vm1740_vm11, %v1713_v1, %v2746_v41  ;;  %v4243_v41 = vpack.i.bf16 %v4163_v49, %v4145_v15  ;;  %v3125_v7 = vld [vmem:[#allocation2 + $0x68] sm:$0xff]  ;;  %v1551_v15 = vsel %vm406_vm0, %v3126_v31, %v2495_v17  ;;  %v3127_v1 = vld [vmem:[#allocation2 + $0x80] sm:$0xff] }
 0x118   : > { %v2754_v32 = vpop.permute.xlu0 %2753  ;;  %v1747_v57 = vsel %vm1740_vm11, %v1714_v50, %v2750_v46  ;;  %v1748_v25 = vsel %vm1740_vm11, %v1715_v8, %v2751_v45  ;;  %v1552_v63 = vsel %vm406_vm0, %v3125_v7, %v2496_v58  ;;  %v2501_v49 = vunpack.i.h.bf16 %v3875_v26 }
 0x119   : > { %v2756_v56 = vunpack.i.h.bf16 %v2754_v32  ;;  %v2755_v0 = vunpack.i.l.bf16 %v2754_v32  ;;  %v2759_v59 = vpop.permute.xlu1 %2758  ;;  %v2500_v58 = vunpack.i.l.bf16 %v3875_v26  ;;  %v1442_v51 = vrot.slane %v4173_v21, 2 }
 0x11a   : > { %3043 = vrot.lane.b32.xlu0 %v3775_v9, %s3161_s23  ;;  %v2761_v2 = vunpack.i.h.bf16 %v2759_v59  ;;  %v2760_v44 = vunpack.i.l.bf16 %v2759_v59  ;;  %v4277_v26 = vsel %vm587_vm3, %v1342_v39, %v1344_v33  ;;  %v1445_v52 = vrot.slane %v538_v40, 2 }
 0x11b   : > { %v1778_v13 = vsel %vm1773_vm12, %v1745_v62, %v2755_v0  ;;  %v1779_v22 = vsel %vm1773_vm12, %v1746_v60, %v2756_v56  ;;  %3048 = vrot.lane.b32.xlu1 %v3779_v48, %s3161_s23  ;;  %v2576_v17 = vunpack.i.h.bf16 %v3936_v3  ;;  %v2575_v43 = vunpack.i.l.bf16 %v3936_v3  ;;  %v3128_v0 = vld [vmem:[#allocation2 + $0x78] sm:$0xff] }
 0x11c   : > { %v1808_v38 = vpack.c.bf16 %v1779_v22, %v1778_v13  ;;  %v4235_v53 = vpop.permute.xlu0 %2763  ;;  %v1780_v9 = vsel %vm1773_vm12, %v1747_v57, %v2760_v44  ;;  %v1781_v35 = vsel %vm1773_vm12, %v1748_v25, %v2761_v2  ;;  %v3087_v45 = vpack.i.bf16 %v4175_v20, %v4173_v21 }
 0x11d   : > { %v1809_v61 = vpack.c.bf16 %v1781_v35, %v1780_v9  ;;  %v4251_v54 = vpop.permute.xlu1 %2768  ;;  %v2581_v46 = vunpack.i.h.bf16 %v3942_v4  ;;  %v2580_v32 = vunpack.i.l.bf16 %v3942_v4  ;;  %v2656_v34 = vunpack.i.h.bf16 %v4017_v18 }
 0x11e   : > { %3053 = vrot.lane.b32.xlu0 %v4046_v47, %s3156_s10  ;;  %2419 = vmatprep.mubr.msk.bf16.mxu0 %vm1849_vm13, %v1808_v38  ;;  %v2655_v28 = vunpack.i.l.bf16 %v4017_v18  ;;  %v1554_v56 = vsel %vm406_vm0, %v3127_v1, %v2501_v49  ;;  %v1553_v3 = vsel %vm406_vm0, %v3128_v0, %v2500_v58  ;;  %v3097_v21 = vpack.i.bf16 %v4277_v26, %v4272_v16 }
 0x11f   : > { %3058 = vrot.lane.b32.xlu1 %v4136_v42, %s3156_s10  ;;  %2420 = vmatmul.mubr.msk.bf16.gmra.mrb[4].mxu0 %vm1849_vm13, %v1809_v61  ;;  %v2661_v20 = vunpack.i.h.bf16 %v4022_v27  ;;  %v2660_v4 = vunpack.i.l.bf16 %v4022_v27  ;;  %v4301_v18 = vsel %vm764_vm4, %v1443_v36, %v1445_v52  ;;  %v1584_v50 = vsel %vm1575_vm6, %v1551_v15, %v2575_v43 }
 0x120   : > { %v2774_v47 = vpop.permute.xlu0 %2773  ;;  %v1585_v8 = vsel %vm1575_vm6, %v1552_v63, %v2576_v17  ;;  %v2766_v62 = vunpack.i.h.bf16 %v4235_v53  ;;  %v2765_v60 = vunpack.i.l.bf16 %v4235_v53  ;;  %v1587_v27 = vsel %vm1575_vm6, %v1554_v56, %v2581_v46 }
 0x121   : > { %v2779_v39 = vpop.permute.xlu1 %2778  ;;  %v1586_v59 = vsel %vm1575_vm6, %v1553_v3, %v2580_v32  ;;  %v1617_v13 = vsel %vm1608_vm7, %v1584_v50, %v2655_v28  ;;  %v1618_v22 = vsel %vm1608_vm7, %v1585_v8, %v2656_v34  ;;  %v2771_v44 = vunpack.i.h.bf16 %v4251_v54 }
 0x122   : > { %3063 = vrot.lane.b32.xlu0 %v3651_v14, %s3157_s13  ;;  %v4298_v14 = vsel %vm764_vm4, %v1442_v51, %v1443_v36  ;;  %v2770_v57 = vunpack.i.l.bf16 %v4251_v54  ;;  %v2776_v25 = vunpack.i.h.bf16 %v2774_v47  ;;  %v2775_v38 = vunpack.i.l.bf16 %v2774_v47 }
 0x123   : > { %3068 = vrot.lane.b32.xlu1 %v4243_v41, %s3157_s13  ;;  %v1619_v53 = vsel %vm1608_vm7, %v1586_v59, %v2660_v4  ;;  %v1620_v33 = vsel %vm1608_vm7, %v1587_v27, %v2661_v20  ;;  %v2781_v9 = vunpack.i.h.bf16 %v2779_v39  ;;  %v2780_v35 = vunpack.i.l.bf16 %v2779_v39 }
 0x124   : > { %v2784_v40 = vpop.permute.xlu0 %2783  ;;  %v1650_v63 = vsel %vm1641_vm8, %v1617_v13, %v2765_v60  ;;  %v1652_v47 = vsel %vm1641_vm8, %v1619_v53, %v2770_v57  ;;  %v1653_v51 = vsel %vm1641_vm8, %v1620_v33, %v2771_v44  ;;  %v2506_v26 = vunpack.i.h.bf16 %v3879_v29 }
 0x125   : > { %v2789_v2 = vpop.permute.xlu1 %2788  ;;  %v2786_v61 = vunpack.i.h.bf16 %v2784_v40  ;;  %v2785_v31 = vunpack.i.l.bf16 %v2784_v40  ;;  %v1683_v52 = vsel %vm1674_vm9, %v1650_v63, %v2775_v38  ;;  %v1685_v43 = vsel %vm1674_vm9, %v1652_v47, %v2780_v35 }
 0x126   : > { %3073 = vrot.lane.b32.xlu0 %v3779_v48, %s3158_s16  ;;  %v1651_v48 = vsel %vm1641_vm8, %v1618_v22, %v2766_v62  ;;  %v2791_v15 = vunpack.i.h.bf16 %v2789_v2  ;;  %v2790_v54 = vunpack.i.l.bf16 %v2789_v2  ;;  %v1686_v46 = vsel %vm1674_vm9, %v1653_v51, %v2781_v9 }
 0x127   : > { %3078 = vrot.lane.b32.xlu1 %v4255_v5, %s3158_s16  ;;  %v1684_v17 = vsel %vm1674_vm9, %v1651_v48, %v2776_v25  ;;  %v2585_v53 = vunpack.i.l.bf16 %v3944_v6  ;;  %v2591_v33 = vunpack.i.h.bf16 %v3951_v12  ;;  %v2590_v9 = vunpack.i.l.bf16 %v3951_v12  ;;  %v3129_v48 = vld [vmem:[#allocation2 + $0x98] sm:$0xff] }
 0x128   : > { %v2794_v7 = vpop.permute.xlu0 %2793  ;;  %v1717_v39 = vsel %vm1707_vm10, %v1684_v17, %v2786_v61  ;;  %v1718_v0 = vsel %vm1707_vm10, %v1685_v43, %v2790_v54  ;;  %v1719_v3 = vsel %vm1707_vm10, %v1686_v46, %v2791_v15  ;;  %v1556_v61 = vsel %vm406_vm0, %v3129_v48, %v2506_v26  ;;  %v3131_v15 = vld [vmem:[#allocation2 + $0xb0] sm:$0xff]  ;;  %v3132_v54 = vld [vmem:[#allocation2 + $0xa8] sm:$0xff] }
 0x129   : > { %v2796_v49 = vunpack.i.h.bf16 %v2794_v7  ;;  %v2795_v58 = vunpack.i.l.bf16 %v2794_v7  ;;  %v2799_v36 = vpop.permute.xlu1 %2798 }
 0x12a   : > { %3083 = vrot.lane.b32.xlu0 %v4136_v42, %s3159_s19  ;;  %v2801_v32 = vunpack.i.h.bf16 %v2799_v36  ;;  %v2800_v34 = vunpack.i.l.bf16 %v2799_v36  ;;  %v1716_v42 = vsel %vm1707_vm10, %v1683_v52, %v2785_v31 }
 0x12b   : > { %3088 = vrot.lane.b32.xlu1 %v3087_v45, %s3159_s19  ;;  %v1749_v20 = vsel %vm1740_vm11, %v1716_v42, %v2795_v58  ;;  %v1750_v4 = vsel %vm1740_vm11, %v1717_v39, %v2796_v49 }
 0x12c   : > { %v2804_v28 = vpop.permute.xlu0 %2803  ;;  %v1751_v60 = vsel %vm1740_vm11, %v1718_v0, %v2800_v34  ;;  %v1752_v27 = vsel %vm1740_vm11, %v1719_v3, %v2801_v32 }
 0x12d   : > { %v2806_v1 = vunpack.i.h.bf16 %v2804_v28  ;;  %v2805_v56 = vunpack.i.l.bf16 %v2804_v28  ;;  %v2809_v40 = vpop.permute.xlu1 %2808 }
 0x12e   : > { %3093 = vrot.lane.b32.xlu0 %v4243_v41, %s3160_s20  ;;  %v2811_v8 = vunpack.i.h.bf16 %v2809_v40  ;;  %v2810_v62 = vunpack.i.l.bf16 %v2809_v40  ;;  %v3107_v41 = vpack.i.bf16 %v4301_v18, %v4298_v14  ;;  %v2511_v14 = vunpack.i.h.bf16 %v3887_v37 }
 0x12f   : > { %v1782_v45 = vsel %vm1773_vm12, %v1749_v20, %v2805_v56  ;;  %v1783_v50 = vsel %vm1773_vm12, %v1750_v4, %v2806_v1  ;;  %3098 = vrot.lane.b32.xlu1 %v3097_v21, %s3160_s20  ;;  %v2505_v21 = vunpack.i.l.bf16 %v3879_v29  ;;  %v2510_v18 = vunpack.i.l.bf16 %v3887_v37  ;;  %v3130_v29 = vld [vmem:[#allocation2 + $0x90] sm:$0xff] }
 0x130   : > { %v1810_v59 = vpack.c.bf16 %v1783_v50, %v1782_v45  ;;  %v2814_v13 = vpop.permute.xlu0 %2813  ;;  %v1784_v22 = vsel %vm1773_vm12, %v1751_v60, %v2810_v62  ;;  %v1785_v2 = vsel %vm1773_vm12, %v1752_v27, %v2811_v8  ;;  %v1558_v37 = vsel %vm406_vm0, %v3131_v15, %v2511_v14 }
 0x131   : > { %v1811_v44 = vpack.c.bf16 %v1785_v2, %v1784_v22  ;;  %v2819_v57 = vpop.permute.xlu1 %2818  ;;  %v2816_v35 = vunpack.i.h.bf16 %v2814_v13  ;;  %v2815_v7 = vunpack.i.l.bf16 %v2814_v13  ;;  %v1555_v31 = vsel %vm406_vm0, %v3130_v29, %v2505_v21 }
 0x132   : > { %3103 = vrot.lane.b32.xlu0 %v4255_v5, %s3161_s23  ;;  %2423 = vmatprep.mubr.msk.bf16.mxu0 %vm1849_vm13, %v1810_v59  ;;  %v2586_v5 = vunpack.i.h.bf16 %v3944_v6  ;;  %v1557_v49 = vsel %vm406_vm0, %v3132_v54, %v2510_v18  ;;  %v2821_v6 = vunpack.i.h.bf16 %v2819_v57  ;;  %v2820_v58 = vunpack.i.l.bf16 %v2819_v57 }
 0x133   : > { %3108 = vrot.lane.b32.xlu1 %v3107_v41, %s3161_s23  ;;  %2424 = vmatmul.mubr.msk.bf16.gmra.mrb[8].mxu0 %vm1849_vm13, %v1811_v44  ;;  %v1588_v12 = vsel %vm1575_vm6, %v1555_v31, %v2585_v53  ;;  %v1591_v17 = vsel %vm1575_vm6, %v1558_v37, %v2591_v33  ;;  %v1590_v43 = vsel %vm1575_vm6, %v1557_v49, %v2590_v9 }
 0x134   : > { %v2824_v25 = vpop.permute.xlu0 %2823  ;;  %v1589_v47 = vsel %vm1575_vm6, %v1556_v61, %v2586_v5  ;;  %v1621_v46 = vsel %vm1608_vm7, %v1588_v12, %v2815_v7  ;;  %v1623_v56 = vsel %vm1608_vm7, %v1590_v43, %v2820_v58  ;;  %v1624_v0 = vsel %vm1608_vm7, %v1591_v17, %v2821_v6 }
 0x135   : > { %v2829_v16 = vpop.permute.xlu1 %2828  ;;  %v2826_v51 = vunpack.i.h.bf16 %v2824_v25  ;;  %v2825_v52 = vunpack.i.l.bf16 %v2824_v25  ;;  %v1622_v32 = vsel %vm1608_vm7, %v1589_v47, %v2816_v35  ;;  %v2521_v17 = vunpack.i.h.bf16 %v3896_v30 }
 0x136   : > { %v2831_v28 = vunpack.i.h.bf16 %v2829_v16  ;;  %v2830_v42 = vunpack.i.l.bf16 %v2829_v16  ;;  %v2520_v43 = vunpack.i.l.bf16 %v3896_v30 }
 0x137   : > { %v1654_v40 = vsel %vm1641_vm8, %v1621_v46, %v2825_v52  ;;  %v1655_v45 = vsel %vm1641_vm8, %v1622_v32, %v2826_v51  ;;  %v2516_v51 = vunpack.i.h.bf16 %v3890_v24  ;;  %v2515_v52 = vunpack.i.l.bf16 %v3890_v24  ;;  %v3134_v24 = vld [vmem:[#allocation2 + $0xc0] sm:$0xff] }
 0x138   : > { %v2834_v38 = vpop.permute.xlu0 %2833  ;;  %v1656_v41 = vsel %vm1641_vm8, %v1623_v56, %v2830_v42  ;;  %v1657_v22 = vsel %vm1641_vm8, %v1624_v0, %v2831_v28  ;;  %v2596_v32 = vunpack.i.h.bf16 %v3953_v55  ;;  %v2601_v28 = vunpack.i.h.bf16 %v3958_v10  ;;  %v3133_v0 = vld [vmem:[#allocation2 + $0xc8] sm:$0xff] }
 0x139   : > { %v2839_v63 = vpop.permute.xlu1 %2838  ;;  %v2836_v39 = vunpack.i.h.bf16 %v2834_v38  ;;  %v2835_v1 = vunpack.i.l.bf16 %v2834_v38  ;;  %v2600_v42 = vunpack.i.l.bf16 %v3958_v10 }
 0x13a   : > { %v2841_v3 = vunpack.i.h.bf16 %v2839_v63  ;;  %v2840_v20 = vunpack.i.l.bf16 %v2839_v63 }
 0x13b   : > { %v1687_v2 = vsel %vm1674_vm9, %v1654_v40, %v2835_v1  ;;  %v1688_v44 = vsel %vm1674_vm9, %v1655_v45, %v2836_v39  ;;  %v3136_v40 = vld [vmem:[#allocation2 + $0xd8] sm:$0xff] }
 0x13c   : > { %v2844_v36 = vpop.permute.xlu0 %2843  ;;  %v1689_v57 = vsel %vm1674_vm9, %v1656_v41, %v2840_v20  ;;  %v1690_v25 = vsel %vm1674_vm9, %v1657_v22, %v2841_v3  ;;  %v1560_v3 = vsel %vm406_vm0, %v3133_v0, %v2516_v51  ;;  %v1559_v20 = vsel %vm406_vm0, %v3134_v24, %v2515_v52 }
 0x13d   : > { %v2849_v34 = vpop.permute.xlu1 %2848  ;;  %v2846_v50 = vunpack.i.h.bf16 %v2844_v36  ;;  %v2845_v8 = vunpack.i.l.bf16 %v2844_v36  ;;  %v1561_v45 = vsel %vm406_vm0, %v3136_v40, %v2520_v43 }
 0x13e   : > { %v2851_v62 = vunpack.i.h.bf16 %v2849_v34  ;;  %v2850_v60 = vunpack.i.l.bf16 %v2849_v34  ;;  %v2595_v34 = vunpack.i.l.bf16 %v3953_v55 }
 0x13f   : > { %v1720_v14 = vsel %vm1707_vm10, %v1687_v2, %v2845_v8  ;;  %v1721_v18 = vsel %vm1707_vm10, %v1688_v44, %v2846_v50 }
 0x140   : > { %v2854_v4 = vpop.permute.xlu0 %2853  ;;  %v1722_v53 = vsel %vm1707_vm10, %v1689_v57, %v2850_v60  ;;  %v1723_v33 = vsel %vm1707_vm10, %v1690_v25, %v2851_v62  ;;  %v1592_v10 = vsel %vm1575_vm6, %v1559_v20, %v2595_v34  ;;  %v1593_v62 = vsel %vm1575_vm6, %v1560_v3, %v2596_v32 }
 0x141   : > { %v2856_v27 = vunpack.i.h.bf16 %v2854_v4  ;;  %v2855_v59 = vunpack.i.l.bf16 %v2854_v4  ;;  %v2859_v13 = vpop.permute.xlu1 %2858  ;;  %v3135_v4 = vld [vmem:[#allocation2 + $0xe0] sm:$0xff] }
 0x142   : > { %v2861_v16 = vunpack.i.h.bf16 %v2859_v13  ;;  %v2860_v26 = vunpack.i.l.bf16 %v2859_v13  ;;  %v1562_v30 = vsel %vm406_vm0, %v3135_v4, %v2521_v17  ;;  %v1594_v13 = vsel %vm1575_vm6, %v1561_v45, %v2600_v42 }
 0x143   : > { %v1753_v9 = vsel %vm1740_vm11, %v1720_v14, %v2855_v59  ;;  %v1754_v35 = vsel %vm1740_vm11, %v1721_v18, %v2856_v27  ;;  %v1595_v59 = vsel %vm1575_vm6, %v1562_v30, %v2601_v28 }
 0x144   : > { %v2864_v21 = vpop.permute.xlu0 %2863  ;;  %v1755_v31 = vsel %vm1740_vm11, %v1722_v53, %v2860_v26  ;;  %v1756_v15 = vsel %vm1740_vm11, %v1723_v33, %v2861_v16 }
 0x145   : > { %v2866_v38 = vunpack.i.h.bf16 %v2864_v21  ;;  %v2865_v5 = vunpack.i.l.bf16 %v2864_v21  ;;  %v2869_v7 = vpop.permute.xlu1 %2868 }
 0x146   : > { %v2871_v61 = vunpack.i.h.bf16 %v2869_v7  ;;  %v2870_v29 = vunpack.i.l.bf16 %v2869_v7 }
 0x147   : > { %v1786_v63 = vsel %vm1773_vm12, %v1753_v9, %v2865_v5  ;;  %v1787_v48 = vsel %vm1773_vm12, %v1754_v35, %v2866_v38 }
 0x148   : > { %v1812_v37 = vpack.c.bf16 %v1787_v48, %v1786_v63  ;;  %v2874_v54 = vpop.permute.xlu0 %2873  ;;  %v1788_v49 = vsel %vm1773_vm12, %v1755_v31, %v2870_v29  ;;  %v1789_v6 = vsel %vm1773_vm12, %v1756_v15, %v2871_v61 }
 0x149   : > { %v1813_v58 = vpack.c.bf16 %v1789_v6, %v1788_v49  ;;  %v2879_v36 = vpop.permute.xlu1 %2878  ;;  %v2876_v39 = vunpack.i.h.bf16 %v2874_v54  ;;  %v2875_v1 = vunpack.i.l.bf16 %v2874_v54 }
 0x14a   : > { %2427 = vmatprep.mubr.msk.bf16.mxu0 %vm1849_vm13, %v1812_v37  ;;  %v2881_v55 = vunpack.i.h.bf16 %v2879_v36  ;;  %v2880_v50 = vunpack.i.l.bf16 %v2879_v36 }
 0x14b   : > { %2428 = vmatmul.mubr.msk.bf16.gmra.mrb[12].mxu0 %vm1849_vm13, %v1813_v58  ;;  %v1625_v41 = vsel %vm1608_vm7, %v1592_v10, %v2875_v1  ;;  %v1626_v22 = vsel %vm1608_vm7, %v1593_v62, %v2876_v39  ;;  %v2531_v10 = vunpack.i.h.bf16 %v3907_v23  ;;  %v2530_v62 = vunpack.i.l.bf16 %v3907_v23 }
 0x14c   : > { %v2884_v12 = vpop.permute.xlu0 %2883  ;;  %v1627_v26 = vsel %vm1608_vm7, %v1594_v13, %v2880_v50  ;;  %v1628_v21 = vsel %vm1608_vm7, %v1595_v59, %v2881_v55  ;;  %v2526_v50 = vunpack.i.h.bf16 %v3900_v11  ;;  %v2605_v59 = vunpack.i.l.bf16 %v3960_v19  ;;  %v4822_v13 = vld [vmem:[#allocation6_spill] sm:$0xff] }
 0x14d   : > { %v2889_v47 = vpop.permute.xlu1 %2888  ;;  %v2886_v60 = vunpack.i.h.bf16 %v2884_v12  ;;  %v2885_v27 = vunpack.i.l.bf16 %v2884_v12 }
 0x14e   : > { %v2891_v44 = vunpack.i.h.bf16 %v2889_v47  ;;  %v2890_v57 = vunpack.i.l.bf16 %v2889_v47 }
 0x14f   : > { %v1658_v5 = vsel %vm1641_vm8, %v1625_v41, %v2885_v27  ;;  %v1659_v53 = vsel %vm1641_vm8, %v1626_v22, %v2886_v60  ;;  %v2606_v27 = vunpack.i.h.bf16 %v3960_v19  ;;  %v2611_v41 = vunpack.i.h.bf16 %v4822_v13 }
 0x150   : > { %v2894_v46 = vpop.permute.xlu0 %2893  ;;  %v1660_v29 = vsel %vm1641_vm8, %v1627_v26, %v2890_v57  ;;  %v1661_v31 = vsel %vm1641_vm8, %v1628_v21, %v2891_v44  ;;  %v2610_v22 = vunpack.i.l.bf16 %v4822_v13  ;;  %v3139_v21 = vld [vmem:[#allocation2 + $0x110] sm:$0xff] }
 0x151   : > { %v2899_v56 = vpop.permute.xlu1 %2898  ;;  %v2896_v25 = vunpack.i.h.bf16 %v2894_v46  ;;  %v2895_v16 = vunpack.i.l.bf16 %v2894_v46  ;;  %v1566_v23 = vsel %vm406_vm0, %v3139_v21, %v2531_v10 }
 0x152   : > { %v2901_v14 = vunpack.i.h.bf16 %v2899_v56  ;;  %v2900_v18 = vunpack.i.l.bf16 %v2899_v56 }
 0x153   : > { %v1691_v15 = vsel %vm1674_vm9, %v1658_v5, %v2895_v16  ;;  %v1692_v37 = vsel %vm1674_vm9, %v1659_v53, %v2896_v25  ;;  %v3137_v25 = vld [vmem:[#allocation2 + $0xf8] sm:$0xff] }
 0x154   : > { %v2904_v8 = vpop.permute.xlu0 %2903  ;;  %v1693_v54 = vsel %vm1674_vm9, %v1660_v29, %v2900_v18  ;;  %v1694_v49 = vsel %vm1674_vm9, %v1661_v31, %v2901_v14  ;;  %v1564_v16 = vsel %vm406_vm0, %v3137_v25, %v2526_v50  ;;  %v3140_v14 = vld [vmem:[#allocation2 + $0x108] sm:$0xff] }
 0x155   : > { %v2909_v2 = vpop.permute.xlu1 %2908  ;;  %v2906_v33 = vunpack.i.h.bf16 %v2904_v8  ;;  %v2905_v9 = vunpack.i.l.bf16 %v2904_v8  ;;  %v2525_v8 = vunpack.i.l.bf16 %v3900_v11  ;;  %v3138_v11 = vld [vmem:[#allocation2 + $0xf0] sm:$0xff]  ;;  %v1565_v18 = vsel %vm406_vm0, %v3140_v14, %v2530_v62  ;;  %v4823_v14 = vld [vmem:[#allocation18_spill] sm:$0xff] }
 0x156   : > { %v2911_v35 = vunpack.i.h.bf16 %v2909_v2  ;;  %v2910_v7 = vunpack.i.l.bf16 %v2909_v2 }
 0x157   : > { %v1724_v12 = vsel %vm1707_vm10, %v1691_v15, %v2905_v9  ;;  %v1725_v47 = vsel %vm1707_vm10, %v1692_v37, %v2906_v33  ;;  %v1563_v26 = vsel %vm406_vm0, %v3138_v11, %v2525_v8  ;;  %v1597_v33 = vsel %vm1575_vm6, %v1564_v16, %v2606_v27 }
 0x158   : > { %v2914_v38 = vpop.permute.xlu0 %2913  ;;  %v1726_v17 = vsel %vm1707_vm10, %v1693_v54, %v2910_v7  ;;  %v1727_v43 = vsel %vm1707_vm10, %v1694_v49, %v2911_v35  ;;  %v1596_v53 = vsel %vm1575_vm6, %v1563_v26, %v2605_v59  ;;  %v1599_v7 = vsel %vm1575_vm6, %v1566_v23, %v2611_v41 }
 0x159   : > { %v2916_v63 = vunpack.i.h.bf16 %v2914_v38  ;;  %v2915_v48 = vunpack.i.l.bf16 %v2914_v38  ;;  %v2919_v61 = vpop.permute.xlu1 %2918 }
 0x15a   : > { %v2921_v6 = vunpack.i.h.bf16 %v2919_v61  ;;  %v2920_v58 = vunpack.i.l.bf16 %v2919_v61 }
 0x15b   : > { %v1757_v32 = vsel %vm1740_vm11, %v1724_v12, %v2915_v48  ;;  %v1758_v34 = vsel %vm1740_vm11, %v1725_v47, %v2916_v63  ;;  %v1598_v63 = vsel %vm1575_vm6, %v1565_v18, %v2610_v22  ;;  %v2536_v18 = vunpack.i.h.bf16 %v4823_v14 }
 0x15c   : > { %v2924_v36 = vpop.permute.xlu0 %2923  ;;  %v1759_v56 = vsel %vm1740_vm11, %v1726_v17, %v2920_v58  ;;  %v1760_v0 = vsel %vm1740_vm11, %v1727_v43, %v2921_v6 }
 0x15d   : > { %v2926_v51 = vunpack.i.h.bf16 %v2924_v36  ;;  %v2925_v52 = vunpack.i.l.bf16 %v2924_v36  ;;  %v2929_v46 = vpop.permute.xlu1 %2928 }
 0x15e   : > { %v2931_v28 = vunpack.i.h.bf16 %v2929_v46  ;;  %v2930_v42 = vunpack.i.l.bf16 %v2929_v46 }
 0x15f   : > { %v1790_v39 = vsel %vm1773_vm12, %v1757_v32, %v2925_v52  ;;  %v1791_v1 = vsel %vm1773_vm12, %v1758_v34, %v2926_v51 }
 0x160   : > { %v2934_v3 = vpop.permute.xlu0 %2933  ;;  %v1814_v24 = vpack.c.bf16 %v1791_v1, %v1790_v39  ;;  %v1792_v20 = vsel %vm1773_vm12, %v1759_v56, %v2930_v42  ;;  %v1793_v4 = vsel %vm1773_vm12, %v1760_v0, %v2931_v28 }
 0x161   : > { %v1815_v30 = vpack.c.bf16 %v1793_v4, %v1792_v20  ;;  %v2939_v40 = vpop.permute.xlu1 %2938  ;;  %v2936_v2 = vunpack.i.h.bf16 %v2934_v3  ;;  %v2935_v44 = vunpack.i.l.bf16 %v2934_v3 }
 0x162   : > { %2431 = vmatprep.mubr.msk.bf16.mxu1 %vm1849_vm13, %v1814_v24  ;;  %v2941_v19 = vunpack.i.h.bf16 %v2939_v40  ;;  %v2940_v38 = vunpack.i.l.bf16 %v2939_v40 }
 0x163   : > { %2432 = vmatmul.mubr.msk.bf16.vlgmr.msra.gmra.mrb[0].mxu1 %vm1849_vm13, %v1815_v30  ;;  %v1629_v48 = vsel %vm1608_vm7, %v1596_v53, %v2935_v44  ;;  %v1630_v61 = vsel %vm1608_vm7, %v1597_v33, %v2936_v2 }
 0x164   : > { %v2944_v45 = vpop.permute.xlu0 %2943  ;;  %v1631_v49 = vsel %vm1608_vm7, %v1598_v63, %v2940_v38  ;;  %v1632_v6 = vsel %vm1608_vm7, %v1599_v7, %v2941_v19  ;;  %v2535_v19 = vunpack.i.l.bf16 %v4823_v14  ;;  %v4824_v38 = vld [vmem:[#allocation5_spill] sm:$0xff]  ;;  %v4826_v63 = vld [vmem:[#allocation4_spill] sm:$0xff] }
 0x165   : > { %v2949_v55 = vpop.permute.xlu1 %2948  ;;  %v2946_v9 = vunpack.i.h.bf16 %v2944_v45  ;;  %v2945_v35 = vunpack.i.l.bf16 %v2944_v45  ;;  %v2540_v53 = vunpack.i.l.bf16 %v4824_v38 }
 0x166   : > { %v2951_v31 = vunpack.i.h.bf16 %v2949_v55  ;;  %v2950_v15 = vunpack.i.l.bf16 %v2949_v55 }
 0x167   : > { %v1662_v47 = vsel %vm1641_vm8, %v1629_v48, %v2945_v35  ;;  %v1663_v51 = vsel %vm1641_vm8, %v1630_v61, %v2946_v9  ;;  %v4825_v9 = vld [vmem:[#allocation3_spill] sm:$0xff]  ;;  %v2621_v48 = vunpack.i.h.bf16 %v4826_v63  ;;  %v2620_v61 = vunpack.i.l.bf16 %v4826_v63 }
 0x168   : > { %v2954_v60 = vpop.permute.xlu0 %2953  ;;  %v1664_v42 = vsel %vm1641_vm8, %v1631_v49, %v2950_v15  ;;  %v1665_v39 = vsel %vm1641_vm8, %v1632_v6, %v2951_v31  ;;  %v2616_v35 = vunpack.i.h.bf16 %v4825_v9  ;;  %v2615_v7 = vunpack.i.l.bf16 %v4825_v9  ;;  %v3142_v49 = vld [vmem:[#allocation2 + $0x120] sm:$0xff] }
 0x169   : > { %v2959_v57 = vpop.permute.xlu1 %2958  ;;  %v2956_v37 = vunpack.i.h.bf16 %v2954_v60  ;;  %v2955_v54 = vunpack.i.l.bf16 %v2954_v60  ;;  %v1567_v6 = vsel %vm406_vm0, %v3142_v49, %v2535_v19 }
 0x16a   : > { %v2961_v58 = vunpack.i.h.bf16 %v2959_v57  ;;  %v2960_v36 = vunpack.i.l.bf16 %v2959_v57 }
 0x16b   : > { %v1695_v1 = vsel %vm1674_vm9, %v1662_v47, %v2955_v54  ;;  %v1696_v56 = vsel %vm1674_vm9, %v1663_v51, %v2956_v37  ;;  %v3141_v37 = vld [vmem:[#allocation2 + $0x128] sm:$0xff] }
 0x16c   : > { %v2964_v5 = vpop.permute.xlu0 %2963  ;;  %v1697_v0 = vsel %vm1674_vm9, %v1664_v42, %v2960_v36  ;;  %v1698_v3 = vsel %vm1674_vm9, %v1665_v39, %v2961_v58  ;;  %v1568_v54 = vsel %vm406_vm0, %v3141_v37, %v2536_v18  ;;  %v3143_v58 = vld [vmem:[#allocation2 + $0x140] sm:$0xff] }
 0x16d   : > { %v2969_v29 = vpop.permute.xlu1 %2968  ;;  %v2966_v52 = vunpack.i.h.bf16 %v2964_v5  ;;  %v2965_v17 = vunpack.i.l.bf16 %v2964_v5  ;;  %v2541_v5 = vunpack.i.h.bf16 %v4824_v38 }
 0x16e   : > { %v2971_v43 = vunpack.i.h.bf16 %v2969_v29  ;;  %v2970_v46 = vunpack.i.l.bf16 %v2969_v29 }
 0x16f   : > { %v1728_v30 = vsel %vm1707_vm10, %v1695_v1, %v2965_v17  ;;  %v1729_v40 = vsel %vm1707_vm10, %v1696_v56, %v2966_v52  ;;  %v1570_v36 = vsel %vm406_vm0, %v3143_v58, %v2541_v5 }
 0x170   : > { %v2974_v12 = vpop.permute.xlu0 %2973  ;;  %v1730_v50 = vsel %vm1707_vm10, %v1697_v0, %v2970_v46  ;;  %v1731_v8 = vsel %vm1707_vm10, %v1698_v3, %v2971_v43  ;;  %v1600_v43 = vsel %vm1575_vm6, %v1567_v6, %v2615_v7  ;;  %v1601_v46 = vsel %vm1575_vm6, %v1568_v54, %v2616_v35 }
 0x171   : > { %v2976_v32 = vunpack.i.h.bf16 %v2974_v12  ;;  %v2975_v34 = vunpack.i.l.bf16 %v2974_v12  ;;  %v2979_v28 = vpop.permute.xlu1 %2978  ;;  %v3144_v12 = vld [vmem:[#allocation2 + $0x138] sm:$0xff] }
 0x172   : > { %v2981_v24 = vunpack.i.h.bf16 %v2979_v28  ;;  %v2980_v20 = vunpack.i.l.bf16 %v2979_v28  ;;  %v1569_v47 = vsel %vm406_vm0, %v3144_v12, %v2540_v53  ;;  %v1603_v28 = vsel %vm1575_vm6, %v1570_v36, %v2621_v48 }
 0x173   : > { %v1761_v10 = vsel %vm1740_vm11, %v1728_v30, %v2975_v34  ;;  %v1762_v62 = vsel %vm1740_vm11, %v1729_v40, %v2976_v32  ;;  %v1602_v42 = vsel %vm1575_vm6, %v1569_v47, %v2620_v61 }
 0x174   : > { %v2984_v4 = vpop.permute.xlu0 %2983  ;;  %v1763_v22 = vsel %vm1740_vm11, %v1730_v50, %v2980_v20  ;;  %v1764_v2 = vsel %vm1740_vm11, %v1731_v8, %v2981_v24 }
 0x175   : > { %v2986_v45 = vunpack.i.h.bf16 %v2984_v4  ;;  %v2985_v55 = vunpack.i.l.bf16 %v2984_v4  ;;  %v2989_v60 = vpop.permute.xlu1 %2988 }
 0x176   : > { %v2991_v13 = vunpack.i.h.bf16 %v2989_v60  ;;  %v2990_v41 = vunpack.i.l.bf16 %v2989_v60 }
 0x177   : > { %v1794_v27 = vsel %vm1773_vm12, %v1761_v10, %v2985_v55  ;;  %v1795_v59 = vsel %vm1773_vm12, %v1762_v62, %v2986_v45 }
 0x178   : > { %v1816_v44 = vpack.c.bf16 %v1795_v59, %v1794_v27  ;;  %v2994_v57 = vpop.permute.xlu0 %2993  ;;  %v1796_v25 = vsel %vm1773_vm12, %v1763_v22, %v2990_v41  ;;  %v1797_v16 = vsel %vm1773_vm12, %v1764_v2, %v2991_v13 }
 0x179   : > { %v1817_v11 = vpack.c.bf16 %v1797_v16, %v1796_v25  ;;  %v2999_v26 = vpop.permute.xlu1 %2998  ;;  %v2996_v29 = vunpack.i.h.bf16 %v2994_v57  ;;  %v2995_v31 = vunpack.i.l.bf16 %v2994_v57 }
 0x17a   : > { %2435 = vmatprep.mubr.msk.bf16.mxu1 %vm1849_vm13, %v1816_v44  ;;  %v3001_v51 = vunpack.i.h.bf16 %v2999_v26  ;;  %v3000_v52 = vunpack.i.l.bf16 %v2999_v26 }
 0x17b   : > { %2436 = vmatmul.mubr.msk.bf16.gmra.mrb[4].mxu1 %vm1849_vm13, %v1817_v11  ;;  %v1633_v39 = vsel %vm1608_vm7, %v1600_v43, %v2995_v31  ;;  %v1634_v1 = vsel %vm1608_vm7, %v1601_v46, %v2996_v29 }
 0x17c   : > { %v3004_v21 = vpop.permute.xlu0 %3003  ;;  %v1635_v4 = vsel %vm1608_vm7, %v1602_v42, %v3000_v52  ;;  %v1636_v30 = vsel %vm1608_vm7, %v1603_v28, %v3001_v51  ;;  %v4827_v28 = vld [vmem:[#allocation8_spill] sm:$0xff] }
 0x17d   : > { %v3009_v23 = vpop.permute.xlu1 %3008  ;;  %v3006_v32 = vunpack.i.h.bf16 %v3004_v21  ;;  %v3005_v34 = vunpack.i.l.bf16 %v3004_v21 }
 0x17e   : > { %v3011_v0 = vunpack.i.h.bf16 %v3009_v23  ;;  %v3010_v3 = vunpack.i.l.bf16 %v3009_v23 }
 0x17f   : > { %v1666_v50 = vsel %vm1641_vm8, %v1633_v39, %v3005_v34  ;;  %v1667_v8 = vsel %vm1641_vm8, %v1634_v1, %v3006_v32  ;;  %v4828_v39 = vld [vmem:[#allocation7_spill] sm:$0xff] }
 0x180   : > { %v3014_v33 = vpop.permute.xlu0 %3013  ;;  %v1668_v22 = vsel %vm1641_vm8, %v1635_v4, %v3010_v3  ;;  %v1669_v2 = vsel %vm1641_vm8, %v1636_v30, %v3011_v0  ;;  %v4829_v4 = vld [vmem:[#allocation10_spill] sm:$0xff] }
 0x181   : > { %v3019_v15 = vpop.permute.xlu1 %3018  ;;  %v3016_v24 = vunpack.i.h.bf16 %v3014_v33  ;;  %v3015_v20 = vunpack.i.l.bf16 %v3014_v33 }
 0x182   : > { %v3021_v40 = vunpack.i.h.bf16 %v3019_v15  ;;  %v3020_v45 = vunpack.i.l.bf16 %v3019_v15 }
 0x183   : > { %v1699_v44 = vsel %vm1674_vm9, %v1666_v50, %v3015_v20  ;;  %v1700_v57 = vsel %vm1674_vm9, %v1667_v8, %v3016_v24 }
 0x184   : > { %v3024_v17 = vpop.permute.xlu0 %3023  ;;  %v1701_v25 = vsel %vm1674_vm9, %v1668_v22, %v3020_v45  ;;  %v1702_v16 = vsel %vm1674_vm9, %v1669_v2, %v3021_v40  ;;  %v4830_v40 = vld [vmem:[#allocation9_spill] sm:$0xff] }
 0x185   : > { %v3029_v56 = vpop.permute.xlu1 %3028  ;;  %v3026_v10 = vunpack.i.h.bf16 %v3024_v17  ;;  %v3025_v62 = vunpack.i.l.bf16 %v3024_v17 }
 0x186   : > { %v3031_v60 = vunpack.i.h.bf16 %v3029_v56  ;;  %v3030_v27 = vunpack.i.l.bf16 %v3029_v56 }
 0x187   : > { %v1732_v23 = vsel %vm1707_vm10, %v1699_v44, %v3025_v62  ;;  %v1733_v14 = vsel %vm1707_vm10, %v1700_v57, %v3026_v10 }
 0x188   : > { %v3034_v55 = vpop.permute.xlu0 %3033  ;;  %v1734_v38 = vsel %vm1707_vm10, %v1701_v25, %v3030_v27  ;;  %v1735_v5 = vsel %vm1707_vm10, %v1702_v16, %v3031_v60 }
 0x189   : > { %v3036_v59 = vunpack.i.h.bf16 %v3034_v55  ;;  %v3035_v13 = vunpack.i.l.bf16 %v3034_v55  ;;  %v3039_v41 = vpop.permute.xlu1 %3038 }
 0x18a   : > { %v3041_v11 = vunpack.i.h.bf16 %v3039_v41  ;;  %v3040_v26 = vunpack.i.l.bf16 %v3039_v41 }
 0x18b   : > { %v1765_v53 = vsel %vm1740_vm11, %v1732_v23, %v3035_v13  ;;  %v1766_v33 = vsel %vm1740_vm11, %v1733_v14, %v3036_v59 }
 0x18c   : > { %v3044_v21 = vpop.permute.xlu0 %3043  ;;  %v1767_v61 = vsel %vm1740_vm11, %v1734_v38, %v3040_v26  ;;  %v1768_v29 = vsel %vm1740_vm11, %v1735_v5, %v3041_v11 }
 0x18d   : > { %v3046_v18 = vunpack.i.h.bf16 %v3044_v21  ;;  %v3045_v19 = vunpack.i.l.bf16 %v3044_v21  ;;  %v3049_v9 = vpop.permute.xlu1 %3048 }
 0x18e   : > { %v3051_v63 = vunpack.i.h.bf16 %v3049_v9  ;;  %v3050_v48 = vunpack.i.l.bf16 %v3049_v9 }
 0x18f   : > { %v1798_v35 = vsel %vm1773_vm12, %v1765_v53, %v3045_v19  ;;  %v1799_v7 = vsel %vm1773_vm12, %v1766_v33, %v3046_v18 }
 0x190   : > { %v1818_v31 = vpack.c.bf16 %v1799_v7, %v1798_v35  ;;  %v3054_v15 = vpop.permute.xlu0 %3053  ;;  %v1800_v37 = vsel %vm1773_vm12, %v1767_v61, %v3050_v48  ;;  %v1801_v54 = vsel %vm1773_vm12, %v1768_v29, %v3051_v63 }
 0x191   : > { %v1819_v49 = vpack.c.bf16 %v1801_v54, %v1800_v37  ;;  %v3059_v6 = vpop.permute.xlu1 %3058  ;;  %v3056_v47 = vunpack.i.h.bf16 %v3054_v15  ;;  %v3055_v51 = vunpack.i.l.bf16 %v3054_v15 }
 0x192   : > { %2439 = vmatprep.mubr.msk.bf16.mxu1 %vm1849_vm13, %v1818_v31  ;;  %v3061_v17 = vunpack.i.h.bf16 %v3059_v6  ;;  %v3060_v43 = vunpack.i.l.bf16 %v3059_v6 }
 0x193   : > { %2440 = vmatmul.mubr.msk.bf16.gmra.mrb[8].mxu1 %vm1849_vm13, %v1819_v49  ;;  %v1637_v42 = vsel %vm1608_vm7, %v4827_v28, %v3055_v51  ;;  %v1638_v1 = vsel %vm1608_vm7, %v4828_v39, %v3056_v47 }
 0x194   : > { %v3064_v58 = vpop.permute.xlu0 %3063  ;;  %v1639_v30 = vsel %vm1608_vm7, %v4829_v4, %v3060_v43  ;;  %v1640_v45 = vsel %vm1608_vm7, %v4830_v40, %v3061_v17 }
 0x195   : > { %v3069_v36 = vpop.permute.xlu1 %3068  ;;  %v3066_v32 = vunpack.i.h.bf16 %v3064_v58  ;;  %v3065_v34 = vunpack.i.l.bf16 %v3064_v58  ;;  %v4556_v58 = vld [vmem:[%s4737_s4] ss:$0 sm:$0xff] }
 0x196   : > { %v3071_v0 = vunpack.i.h.bf16 %v3069_v36  ;;  %v3070_v3 = vunpack.i.l.bf16 %v3069_v36 }
 0x197   : > { %v1670_v10 = vsel %vm1641_vm8, %v1637_v42, %v3065_v34  ;;  %v1671_v62 = vsel %vm1641_vm8, %v1638_v1, %v3066_v32 }
 0x198   : > { %v3074_v12 = vpop.permute.xlu0 %3073  ;;  %v1672_v44 = vsel %vm1641_vm8, %v1639_v30, %v3070_v3  ;;  %v1673_v57 = vsel %vm1641_vm8, %v1640_v45, %v3071_v0 }
 0x199   : > { %v3079_v52 = vpop.permute.xlu1 %3078  ;;  %v3076_v24 = vunpack.i.h.bf16 %v3074_v12  ;;  %v3075_v20 = vunpack.i.l.bf16 %v3074_v12 }
 0x19a   : > { %v3081_v55 = vunpack.i.h.bf16 %v3079_v52  ;;  %v3080_v50 = vunpack.i.l.bf16 %v3079_v52 }
 0x19b   : > { %v1703_v25 = vsel %vm1674_vm9, %v1670_v10, %v3075_v20  ;;  %v1704_v16 = vsel %vm1674_vm9, %v1671_v62, %v3076_v24 }
 0x19c   : > { %v3084_v46 = vpop.permute.xlu0 %3083  ;;  %v1705_v11 = vsel %vm1674_vm9, %v1672_v44, %v3080_v50  ;;  %v1706_v26 = vsel %vm1674_vm9, %v1673_v57, %v3081_v55 }
 0x19d   : > { %v3089_v56 = vpop.permute.xlu1 %3088  ;;  %v3086_v60 = vunpack.i.h.bf16 %v3084_v46  ;;  %v3085_v27 = vunpack.i.l.bf16 %v3084_v46 }
 0x19e   : > { %v3091_v59 = vunpack.i.h.bf16 %v3089_v56  ;;  %v3090_v13 = vunpack.i.l.bf16 %v3089_v56 }
 0x19f   : > { %v1736_v18 = vsel %vm1707_vm10, %v1703_v25, %v3085_v27  ;;  %v1737_v19 = vsel %vm1707_vm10, %v1704_v16, %v3086_v60 }
 0x1a0   : > { %v3094_v8 = vpop.permute.xlu0 %3093  ;;  %v1738_v53 = vsel %vm1707_vm10, %v1705_v11, %v3090_v13  ;;  %v1739_v33 = vsel %vm1707_vm10, %v1706_v26, %v3091_v59 }
 0x1a1   : > { %v3096_v41 = vunpack.i.h.bf16 %v3094_v8  ;;  %v3095_v22 = vunpack.i.l.bf16 %v3094_v8  ;;  %v3099_v2 = vpop.permute.xlu1 %3098 }
 0x1a2   : > { %v3101_v21 = vunpack.i.h.bf16 %v3099_v2  ;;  %v3100_v23 = vunpack.i.l.bf16 %v3099_v2 }
 0x1a3   : > { %v1769_v9 = vsel %vm1740_vm11, %v1736_v18, %v3095_v22  ;;  %v1770_v35 = vsel %vm1740_vm11, %v1737_v19, %v3096_v41 }
 0x1a4   : > { %v3104_v14 = vpop.permute.xlu0 %3103  ;;  %v1771_v31 = vsel %vm1740_vm11, %v1738_v53, %v3100_v23  ;;  %v1772_v15 = vsel %vm1740_vm11, %v1739_v33, %v3101_v21 }
 0x1a5   : > { %v3106_v38 = vunpack.i.h.bf16 %v3104_v14  ;;  %v3105_v5 = vunpack.i.l.bf16 %v3104_v14  ;;  %v3109_v7 = vpop.permute.xlu1 %3108 }
 0x1a6   : > { %v3111_v61 = vunpack.i.h.bf16 %v3109_v7  ;;  %v3110_v29 = vunpack.i.l.bf16 %v3109_v7 }
 0x1a7   : > { %v1802_v63 = vsel %vm1773_vm12, %v1769_v9, %v3105_v5  ;;  %v1803_v48 = vsel %vm1773_vm12, %v1770_v35, %v3106_v38 }
 0x1a8   : > { %v1820_v37 = vpack.c.bf16 %v1803_v48, %v1802_v63  ;;  %v1804_v54 = vsel %vm1773_vm12, %v1771_v31, %v3110_v29  ;;  %v1805_v49 = vsel %vm1773_vm12, %v1772_v15, %v3111_v61 }
 0x1a9   : > { %v1821_v6 = vpack.c.bf16 %v1805_v49, %v1804_v54 }
 0x1aa   : > { %2443 = vmatprep.mubr.msk.bf16.mxu1 %vm1849_vm13, %v1820_v37 }
 0x1ab   : > { %2444 = vmatmul.mubr.msk.bf16.gmra.mrb[12].mxu1 %vm1849_vm13, %v1821_v6 }
 0x1de   : > { %v2417_v36 = vpop.f32.mrb[0].mxu0 }
 0x1df   : > { %v1945_v12 = vadd.f32 %v2417_v36, %v4556_v58  ;;  %v1936_v47 = vpop.f32.mrb[1].mxu0 }
 0x1e0   : > { %v1937_v51 = vadd.f32 %v4556_v58, %v1936_v47  ;;  %v2418_v52 = vpop.f32.mrb[2].mxu0 }
 0x1e1   : > { %2065 = vst.msk [vmem:[%s4563_s9 + $0x10] sm:$0xff] %vm406_vm0, %v1945_v12  ;;  %v1948_v17 = vadd.f32 %v2418_v52, %v4556_v58  ;;  %v1939_v43 = vpop.f32.mrb[3].mxu0  ;;  %v2166_v34 = vmul.f32 %v1945_v12, %v1945_v12  ;;  %v2098_v56 = vsel %vm406_vm0, %v1945_v12, 0.0 }
 0x1e2   : > { %2063 = vst.msk [vmem:[%s4563_s9] sm:$0xff] %vm406_vm0, %v1937_v51  ;;  %v2164_v46 = vmul.f32 %v1937_v51, %v1937_v51  ;;  %v1940_v32 = vadd.f32 %v4556_v58, %v1939_v43  ;;  %v2095_v28 = vsel %vm406_vm0, %v1937_v51, 0.0 }
 0x1e3   : > { %2066 = vst.msk [vmem:[%s4563_s9 + $0x18] sm:$0xff] %vm406_vm0, %v1948_v17  ;;  %v2167_v3 = vmul.f32 %v1948_v17, %v1948_v17  ;;  %v2199_v30 = vsel %vm406_vm0, %v2166_v34, 0.0  ;;  %v2100_v40 = vsel %vm406_vm0, %v1948_v17, 0.0 }
 0x1e4   : > { %2064 = vst.msk [vmem:[%s4563_s9 + $0x8] sm:$0xff] %vm406_vm0, %v1940_v32  ;;  %v2096_v42 = vsel %vm406_vm0, %v1940_v32, 0.0  ;;  %v2165_v39 = vmul.f32 %v1940_v32, %v1940_v32  ;;  %v2196_v0 = vsel %vm406_vm0, %v2164_v46, 0.0 }
 0x1e5   : > { %v2097_v1 = vadd.f32 %v2096_v42, %v2095_v28  ;;  %v2201_v50 = vsel %vm406_vm0, %v2167_v3, 0.0 }
 0x1e6   : > { %v2197_v24 = vsel %vm406_vm0, %v2165_v39, 0.0 }
 0x1e7   : > { %v2099_v20 = vadd.f32 %v2098_v56, %v2097_v1  ;;  %v2198_v4 = vadd.f32 %v2197_v24, %v2196_v0 }
 0x1e9   : > { %v2200_v45 = vadd.f32 %v2199_v30, %v2198_v4  ;;  %v2101_v55 = vadd.f32 %v2100_v40, %v2099_v20 }
 0x1eb   : > { %v2202_v8 = vadd.f32 %v2201_v50, %v2200_v45 }
 0x1f2   : > { %v2421_v10 = vpop.f32.mrb[4].mxu0 }
 0x1f3   : > { %v1961_v62 = vadd.f32 %v2421_v10, %v4556_v58  ;;  %v1952_v60 = vpop.f32.mrb[5].mxu0 }
 0x1f4   : > { %v1953_v27 = vadd.f32 %v4556_v58, %v1952_v60  ;;  %v2422_v59 = vpop.f32.mrb[6].mxu0 }
 0x1f5   : > { %2069 = vst.msk [vmem:[%s4563_s9 + $0x30] sm:$0xff] %vm406_vm0, %v1961_v62  ;;  %v1964_v13 = vadd.f32 %v2422_v59, %v4556_v58  ;;  %v1955_v41 = vpop.f32.mrb[7].mxu0  ;;  %v2170_v25 = vmul.f32 %v1961_v62, %v1961_v62  ;;  %v2106_v14 = vsel %vm406_vm0, %v1961_v62, 0.0 }
 0x1f6   : > { %2067 = vst.msk [vmem:[%s4563_s9 + $0x20] sm:$0xff] %vm406_vm0, %v1953_v27  ;;  %v2102_v22 = vsel %vm406_vm0, %v1953_v27, 0.0  ;;  %v2168_v2 = vmul.f32 %v1953_v27, %v1953_v27  ;;  %v1956_v44 = vadd.f32 %v4556_v58, %v1955_v41 }
 0x1f7   : > { %v2103_v57 = vadd.f32 %v2102_v22, %v2101_v55  ;;  %2070 = vst.msk [vmem:[%s4563_s9 + $0x38] sm:$0xff] %vm406_vm0, %v1964_v13  ;;  %v2171_v18 = vmul.f32 %v1964_v13, %v1964_v13  ;;  %v2207_v53 = vsel %vm406_vm0, %v2170_v25, 0.0  ;;  %v2108_v33 = vsel %vm406_vm0, %v1964_v13, 0.0 }
 0x1f8   : > { %v2203_v16 = vsel %vm406_vm0, %v2168_v2, 0.0  ;;  %2068 = vst.msk [vmem:[%s4563_s9 + $0x28] sm:$0xff] %vm406_vm0, %v1956_v44  ;;  %v2104_v11 = vsel %vm406_vm0, %v1956_v44, 0.0  ;;  %v2169_v26 = vmul.f32 %v1956_v44, %v1956_v44 }
 0x1f9   : > { %v2204_v21 = vadd.f32 %v2203_v16, %v2202_v8  ;;  %v2105_v23 = vadd.f32 %v2104_v11, %v2103_v57  ;;  %v2209_v7 = vsel %vm406_vm0, %v2171_v18, 0.0 }
 0x1fa   : > { %v2205_v19 = vsel %vm406_vm0, %v2169_v26, 0.0 }
 0x1fb   : > { %v2107_v38 = vadd.f32 %v2106_v14, %v2105_v23  ;;  %v2206_v5 = vadd.f32 %v2205_v19, %v2204_v21 }
 0x1fd   : > { %v2208_v9 = vadd.f32 %v2207_v53, %v2206_v5  ;;  %v2109_v35 = vadd.f32 %v2108_v33, %v2107_v38 }
 0x1ff   : > { %v2210_v63 = vadd.f32 %v2209_v7, %v2208_v9 }
 0x206   : > { %v2425_v48 = vpop.f32.mrb[8].mxu0 }
 0x207   : > { %v1977_v61 = vadd.f32 %v2425_v48, %v4556_v58  ;;  %v1968_v29 = vpop.f32.mrb[9].mxu0 }
 0x208   : > { %v1969_v31 = vadd.f32 %v4556_v58, %v1968_v29  ;;  %v2426_v15 = vpop.f32.mrb[10].mxu0 }
 0x209   : > { %2073 = vst.msk [vmem:[%s4563_s9 + $0x50] sm:$0xff] %vm406_vm0, %v1977_v61  ;;  %v1980_v37 = vadd.f32 %v2426_v15, %v4556_v58  ;;  %v1971_v54 = vpop.f32.mrb[11].mxu0  ;;  %v2174_v47 = vmul.f32 %v1977_v61, %v1977_v61  ;;  %v2114_v32 = vsel %vm406_vm0, %v1977_v61, 0.0 }
 0x20a   : > { %2071 = vst.msk [vmem:[%s4563_s9 + $0x40] sm:$0xff] %vm406_vm0, %v1969_v31  ;;  %v2110_v49 = vsel %vm406_vm0, %v1969_v31, 0.0  ;;  %v2172_v6 = vmul.f32 %v1969_v31, %v1969_v31  ;;  %v1972_v36 = vadd.f32 %v4556_v58, %v1971_v54 }
 0x20b   : > { %v2111_v12 = vadd.f32 %v2110_v49, %v2109_v35  ;;  %2074 = vst.msk [vmem:[%s4563_s9 + $0x58] sm:$0xff] %vm406_vm0, %v1980_v37  ;;  %v2175_v34 = vmul.f32 %v1980_v37, %v1980_v37  ;;  %v2215_v1 = vsel %vm406_vm0, %v2174_v47, 0.0  ;;  %v2116_v56 = vsel %vm406_vm0, %v1980_v37, 0.0 }
 0x20c   : > { %v2211_v51 = vsel %vm406_vm0, %v2172_v6, 0.0  ;;  %2072 = vst.msk [vmem:[%s4563_s9 + $0x48] sm:$0xff] %vm406_vm0, %v1972_v36  ;;  %v2112_v52 = vsel %vm406_vm0, %v1972_v36, 0.0  ;;  %v2173_v17 = vmul.f32 %v1972_v36, %v1972_v36 }
 0x20d   : > { %v2212_v43 = vadd.f32 %v2211_v51, %v2210_v63  ;;  %v2113_v46 = vadd.f32 %v2112_v52, %v2111_v12  ;;  %v2217_v24 = vsel %vm406_vm0, %v2175_v34, 0.0 }
 0x20e   : > { %v2213_v28 = vsel %vm406_vm0, %v2173_v17, 0.0 }
 0x20f   : > { %v2115_v42 = vadd.f32 %v2114_v32, %v2113_v46  ;;  %v2214_v39 = vadd.f32 %v2213_v28, %v2212_v43 }
 0x211   : > { %v2216_v0 = vadd.f32 %v2215_v1, %v2214_v39  ;;  %v2117_v3 = vadd.f32 %v2116_v56, %v2115_v42 }
 0x213   : > { %v2218_v20 = vadd.f32 %v2217_v24, %v2216_v0 }
 0x21e   : > { %v2429_v4 = vpop.f32.mrb[12].mxu0 }
 0x21f   : > { %v1993_v30 = vadd.f32 %v2429_v4, %v4556_v58  ;;  %v1984_v40 = vpop.f32.mrb[13].mxu0 }
 0x220   : > { %v1985_v45 = vadd.f32 %v4556_v58, %v1984_v40  ;;  %v2430_v55 = vpop.f32.mrb[14].mxu0 }
 0x221   : > { %2077 = vst.msk [vmem:[%s4563_s9 + $0x70] sm:$0xff] %vm406_vm0, %v1993_v30  ;;  %v1996_v50 = vadd.f32 %v2430_v55, %v4556_v58  ;;  %v1987_v8 = vpop.f32.mrb[15].mxu0  ;;  %v2178_v59 = vmul.f32 %v1993_v30, %v1993_v30  ;;  %v2122_v57 = vsel %vm406_vm0, %v1993_v30, 0.0 }
 0x222   : > { %2075 = vst.msk [vmem:[%s4563_s9 + $0x60] sm:$0xff] %vm406_vm0, %v1985_v45  ;;  %v2118_v10 = vsel %vm406_vm0, %v1985_v45, 0.0  ;;  %v2176_v62 = vmul.f32 %v1985_v45, %v1985_v45  ;;  %v1988_v60 = vadd.f32 %v4556_v58, %v1987_v8 }
 0x223   : > { %v2119_v27 = vadd.f32 %v2118_v10, %v2117_v3  ;;  %2078 = vst.msk [vmem:[%s4563_s9 + $0x78] sm:$0xff] %vm406_vm0, %v1996_v50  ;;  %v2179_v25 = vmul.f32 %v1996_v50, %v1996_v50  ;;  %v2223_v21 = vsel %vm406_vm0, %v2178_v59, 0.0  ;;  %v2124_v23 = vsel %vm406_vm0, %v1996_v50, 0.0 }
 0x224   : > { %v2219_v13 = vsel %vm406_vm0, %v2176_v62, 0.0  ;;  %2076 = vst.msk [vmem:[%s4563_s9 + $0x68] sm:$0xff] %vm406_vm0, %v1988_v60  ;;  %v2120_v41 = vsel %vm406_vm0, %v1988_v60, 0.0  ;;  %v2177_v22 = vmul.f32 %v1988_v60, %v1988_v60 }
 0x225   : > { %v2220_v2 = vadd.f32 %v2219_v13, %v2218_v20  ;;  %v2121_v44 = vadd.f32 %v2120_v41, %v2119_v27  ;;  %v2225_v19 = vsel %vm406_vm0, %v2179_v25, 0.0 }
 0x226   : > { %v2221_v16 = vsel %vm406_vm0, %v2177_v22, 0.0 }
 0x227   : > { %v2123_v11 = vadd.f32 %v2122_v57, %v2121_v44  ;;  %v2222_v26 = vadd.f32 %v2221_v16, %v2220_v2 }
 0x229   : > { %v2224_v14 = vadd.f32 %v2223_v21, %v2222_v26  ;;  %v2125_v18 = vadd.f32 %v2124_v23, %v2123_v11 }
 0x22b   : > { %v2226_v38 = vadd.f32 %v2225_v19, %v2224_v14 }
 0x236   : > { %v2433_v5 = vpop.f32.mrb[0].mxu1 }
 0x237   : > { %v2009_v53 = vadd.f32 %v2433_v5, %v4556_v58  ;;  %v2000_v33 = vpop.f32.mrb[1].mxu1 }
 0x238   : > { %v2001_v9 = vadd.f32 %v4556_v58, %v2000_v33  ;;  %v2434_v35 = vpop.f32.mrb[2].mxu1 }
 0x239   : > { %2081 = vst.msk [vmem:[%s4563_s9 + $0x90] sm:$0xff] %vm406_vm0, %v2009_v53  ;;  %v2012_v7 = vadd.f32 %v2434_v35, %v4556_v58  ;;  %v2003_v63 = vpop.f32.mrb[3].mxu1  ;;  %v2182_v15 = vmul.f32 %v2009_v53, %v2009_v53  ;;  %v2130_v12 = vsel %vm406_vm0, %v2009_v53, 0.0 }
 0x23a   : > { %2079 = vst.msk [vmem:[%s4563_s9 + $0x80] sm:$0xff] %vm406_vm0, %v2001_v9  ;;  %v2126_v48 = vsel %vm406_vm0, %v2001_v9, 0.0  ;;  %v2180_v61 = vmul.f32 %v2001_v9, %v2001_v9  ;;  %v2004_v29 = vadd.f32 %v4556_v58, %v2003_v63 }
 0x23b   : > { %v2127_v31 = vadd.f32 %v2126_v48, %v2125_v18  ;;  %2082 = vst.msk [vmem:[%s4563_s9 + $0x98] sm:$0xff] %vm406_vm0, %v2012_v7  ;;  %v2183_v47 = vmul.f32 %v2012_v7, %v2012_v7  ;;  %v2231_v43 = vsel %vm406_vm0, %v2182_v15, 0.0  ;;  %v2132_v46 = vsel %vm406_vm0, %v2012_v7, 0.0 }
 0x23c   : > { %v2227_v37 = vsel %vm406_vm0, %v2180_v61, 0.0  ;;  %2080 = vst.msk [vmem:[%s4563_s9 + $0x88] sm:$0xff] %vm406_vm0, %v2004_v29  ;;  %v2128_v54 = vsel %vm406_vm0, %v2004_v29, 0.0  ;;  %v2181_v49 = vmul.f32 %v2004_v29, %v2004_v29 }
 0x23d   : > { %v2228_v6 = vadd.f32 %v2227_v37, %v2226_v38  ;;  %v2129_v36 = vadd.f32 %v2128_v54, %v2127_v31  ;;  %v2233_v28 = vsel %vm406_vm0, %v2183_v47, 0.0 }
 0x23e   : > { %v2229_v51 = vsel %vm406_vm0, %v2181_v49, 0.0 }
 0x23f   : > { %v2131_v52 = vadd.f32 %v2130_v12, %v2129_v36  ;;  %v2230_v17 = vadd.f32 %v2229_v51, %v2228_v6 }
 0x241   : > { %v2232_v32 = vadd.f32 %v2231_v43, %v2230_v17  ;;  %v2133_v34 = vadd.f32 %v2132_v46, %v2131_v52 }
 0x243   : > { %v2234_v42 = vadd.f32 %v2233_v28, %v2232_v32 }
 0x24e   : > { %v2437_v39 = vpop.f32.mrb[4].mxu1 }
 0x24f   : > { %v2025_v1 = vadd.f32 %v2437_v39, %v4556_v58  ;;  %v2016_v56 = vpop.f32.mrb[5].mxu1 }
 0x250   : > { %v2017_v0 = vadd.f32 %v4556_v58, %v2016_v56  ;;  %v2438_v3 = vpop.f32.mrb[6].mxu1 }
 0x251   : > { %2085 = vst.msk [vmem:[%s4563_s9 + $0xb0] sm:$0xff] %vm406_vm0, %v2025_v1  ;;  %v2028_v24 = vadd.f32 %v2438_v3, %v4556_v58  ;;  %v2019_v20 = vpop.f32.mrb[7].mxu1  ;;  %v2186_v55 = vmul.f32 %v2025_v1, %v2025_v1  ;;  %v2138_v27 = vsel %vm406_vm0, %v2025_v1, 0.0 }
 0x252   : > { %2083 = vst.msk [vmem:[%s4563_s9 + $0xa0] sm:$0xff] %vm406_vm0, %v2017_v0  ;;  %v2134_v4 = vsel %vm406_vm0, %v2017_v0, 0.0  ;;  %v2184_v30 = vmul.f32 %v2017_v0, %v2017_v0  ;;  %v2020_v40 = vadd.f32 %v4556_v58, %v2019_v20 }
 0x253   : > { %v2135_v45 = vadd.f32 %v2134_v4, %v2133_v34  ;;  %2086 = vst.msk [vmem:[%s4563_s9 + $0xb8] sm:$0xff] %vm406_vm0, %v2028_v24  ;;  %v2187_v59 = vmul.f32 %v2028_v24, %v2028_v24  ;;  %v2239_v2 = vsel %vm406_vm0, %v2186_v55, 0.0  ;;  %v2140_v44 = vsel %vm406_vm0, %v2028_v24, 0.0 }
 0x254   : > { %v2235_v50 = vsel %vm406_vm0, %v2184_v30, 0.0  ;;  %2084 = vst.msk [vmem:[%s4563_s9 + $0xa8] sm:$0xff] %vm406_vm0, %v2020_v40  ;;  %v2136_v8 = vsel %vm406_vm0, %v2020_v40, 0.0  ;;  %v2185_v10 = vmul.f32 %v2020_v40, %v2020_v40 }
 0x255   : > { %v2236_v62 = vadd.f32 %v2235_v50, %v2234_v42  ;;  %v2137_v60 = vadd.f32 %v2136_v8, %v2135_v45  ;;  %v2241_v16 = vsel %vm406_vm0, %v2187_v59, 0.0 }
 0x256   : > { %v2237_v13 = vsel %vm406_vm0, %v2185_v10, 0.0 }
 0x257   : > { %v2139_v41 = vadd.f32 %v2138_v27, %v2137_v60  ;;  %v2238_v22 = vadd.f32 %v2237_v13, %v2236_v62 }
 0x259   : > { %v2240_v57 = vadd.f32 %v2239_v2, %v2238_v22  ;;  %v2141_v25 = vadd.f32 %v2140_v44, %v2139_v41 }
 0x25b   : > { %v2242_v11 = vadd.f32 %v2241_v16, %v2240_v57 }
 0x266   : > { %v2441_v26 = vpop.f32.mrb[8].mxu1 }
 0x267   : > { %v2041_v21 = vadd.f32 %v2441_v26, %v4556_v58  ;;  %v2032_v23 = vpop.f32.mrb[9].mxu1 }
 0x268   : > { %v2033_v14 = vadd.f32 %v4556_v58, %v2032_v23  ;;  %v2442_v18 = vpop.f32.mrb[10].mxu1 }
 0x269   : > { %2089 = vst.msk [vmem:[%s4563_s9 + $0xd0] sm:$0xff] %vm406_vm0, %v2041_v21  ;;  %v2044_v19 = vadd.f32 %v2442_v18, %v4556_v58  ;;  %v2035_v38 = vpop.f32.mrb[11].mxu1  ;;  %v2190_v35 = vmul.f32 %v2041_v21, %v2041_v21  ;;  %v2146_v31 = vsel %vm406_vm0, %v2041_v21, 0.0 }
 0x26a   : > { %2087 = vst.msk [vmem:[%s4563_s9 + $0xc0] sm:$0xff] %vm406_vm0, %v2033_v14  ;;  %v2142_v5 = vsel %vm406_vm0, %v2033_v14, 0.0  ;;  %v2188_v53 = vmul.f32 %v2033_v14, %v2033_v14  ;;  %v2036_v33 = vadd.f32 %v4556_v58, %v2035_v38 }
 0x26b   : > { %v2143_v9 = vadd.f32 %v2142_v5, %v2141_v25  ;;  %2090 = vst.msk [vmem:[%s4563_s9 + $0xd8] sm:$0xff] %vm406_vm0, %v2044_v19  ;;  %v2191_v15 = vmul.f32 %v2044_v19, %v2044_v19  ;;  %v2247_v6 = vsel %vm406_vm0, %v2190_v35, 0.0  ;;  %v2148_v36 = vsel %vm406_vm0, %v2044_v19, 0.0 }
 0x26c   : > { %v2243_v7 = vsel %vm406_vm0, %v2188_v53, 0.0  ;;  %2088 = vst.msk [vmem:[%s4563_s9 + $0xc8] sm:$0xff] %vm406_vm0, %v2036_v33  ;;  %v2144_v63 = vsel %vm406_vm0, %v2036_v33, 0.0  ;;  %v2189_v48 = vmul.f32 %v2036_v33, %v2036_v33 }
 0x26d   : > { %v2244_v61 = vadd.f32 %v2243_v7, %v2242_v11  ;;  %v2145_v29 = vadd.f32 %v2144_v63, %v2143_v9  ;;  %v2249_v51 = vsel %vm406_vm0, %v2191_v15, 0.0 }
 0x26e   : > { %v2245_v37 = vsel %vm406_vm0, %v2189_v48, 0.0 }
 0x26f   : > { %v2147_v54 = vadd.f32 %v2146_v31, %v2145_v29  ;;  %v2246_v49 = vadd.f32 %v2245_v37, %v2244_v61 }
 0x271   : > { %v2248_v12 = vadd.f32 %v2247_v6, %v2246_v49  ;;  %v2149_v47 = vadd.f32 %v2148_v36, %v2147_v54 }
 0x273   : > { %v2250_v52 = vadd.f32 %v2249_v51, %v2248_v12 }
 0x27e   : > { %v2445_v17 = vpop.f32.mrb[12].mxu1 }
 0x27f   : > { %v2057_v43 = vadd.f32 %v2445_v17, %v4556_v58  ;;  %v2048_v46 = vpop.f32.mrb[13].mxu1 }
 0x280   : > { %v2049_v32 = vadd.f32 %v4556_v58, %v2048_v46  ;;  %v2446_v34 = vpop.f32.mrb[14].mxu1 }
 0x281   : > { %2093 = vst.msk [vmem:[%s4563_s9 + $0xf0] sm:$0xff] %vm406_vm0, %v2057_v43  ;;  %v2060_v28 = vadd.f32 %v2446_v34, %v4556_v58  ;;  %v2051_v42 = vpop.f32.mrb[15].mxu1  ;;  %v2194_v3 = vmul.f32 %v2057_v43, %v2057_v43  ;;  %v2154_v45 = vsel %vm406_vm0, %v2057_v43, 0.0 }
 0x282   : > { %2091 = vst.msk [vmem:[%s4563_s9 + $0xe0] sm:$0xff] %vm406_vm0, %v2049_v32  ;;  %v2150_v39 = vsel %vm406_vm0, %v2049_v32, 0.0  ;;  %v2192_v1 = vmul.f32 %v2049_v32, %v2049_v32  ;;  %v2052_v56 = vadd.f32 %v4556_v58, %v2051_v42 }
 0x283   : > { %v2151_v0 = vadd.f32 %v2150_v39, %v2149_v47  ;;  %2094 = vst.msk [vmem:[%s4563_s9 + $0xf8] sm:$0xff] %vm406_vm0, %v2060_v28  ;;  %v2195_v55 = vmul.f32 %v2060_v28, %v2060_v28  ;;  %v2255_v10 = vsel %vm406_vm0, %v2194_v3, 0.0  ;;  %v2156_v62 = vsel %vm406_vm0, %v2060_v28, 0.0 }
 0x284   : > { %v2251_v24 = vsel %vm406_vm0, %v2192_v1, 0.0  ;;  %2092 = vst.msk [vmem:[%s4563_s9 + $0xe8] sm:$0xff] %vm406_vm0, %v2052_v56  ;;  %v2152_v20 = vsel %vm406_vm0, %v2052_v56, 0.0  ;;  %v2193_v4 = vmul.f32 %v2052_v56, %v2052_v56 }
 0x285   : > { %v2252_v30 = vadd.f32 %v2251_v24, %v2250_v52  ;;  %v2153_v40 = vadd.f32 %v2152_v20, %v2151_v0  ;;  %v2257_v59 = vsel %vm406_vm0, %v2195_v55, 0.0 }
 0x286   : > { %v2253_v50 = vsel %vm406_vm0, %v2193_v4, 0.0 }
 0x287   : > { %v2155_v8 = vadd.f32 %v2154_v45, %v2153_v40  ;;  %v2254_v58 = vadd.f32 %v2253_v50, %v2252_v30 }
 0x289   : > { %v2157_v60 = vadd.f32 %v2156_v62, %v2155_v8  ;;  %v2256_v27 = vadd.f32 %v2255_v10, %v2254_v58 }
 0x28b   : > { %v2158_v13 = vrot.slane %v2157_v60, 4  ;;  %v2258_v41 = vadd.f32 %v2257_v59, %v2256_v27 }
 0x28d   : > { %v2159_v22 = vadd.f32 %v2158_v13, %v2157_v60  ;;  %v2259_v2 = vrot.slane %v2258_v41, 4 }
 0x28f   : > { %v2160_v44 = vrot.slane %v2159_v22, 2  ;;  %v2260_v57 = vadd.f32 %v2259_v2, %v2258_v41 }
 0x291   : > { %v2161_v25 = vadd.f32 %v2160_v44, %v2159_v22  ;;  %v2261_v16 = vrot.slane %v2260_v57, 2 }
 0x293   : > { %v2162_v11 = vrot.slane %v2161_v25, 1  ;;  %v2262_v26 = vadd.f32 %v2261_v16, %v2260_v57 }
 0x295   : > { %v2263_v21 = vrot.slane %v2262_v26, 1  ;;  %v2163_v23 = vadd.f32 %v2162_v11, %v2161_v25 }
 0x297   : > { %v2264_v14 = vadd.f32 %v2263_v21, %v2262_v26 }
 0x299   : > { %v2266_v18 = vsel %vm2265_vm14, %v2163_v23, %v2264_v14 }
 0x29a   : > { %2267 = vst.msk [vmem:[%s262_s12] sm:$0x3] %vm409_vm1, %v2266_v18 }
 0x29b PF: > { %s17_s21 = sadd.s32 1, %s3151_s21  }
 0x29c   : > { %p14_p4 = scmp.ge.s32.totalorder %s17_s21, 4  }
 0x29e   :  { %16 = sbr.rel (!%p14_p4) target bundleno = 1 (0x1), region = 84 }

// kernel: up_forward.3
= control target key start
LH: loop header
LB: loop body
LE: loop exit
PB: predicated region body
PF: predicated region fallthrough
CT: control target
= control target key end

     0   :  { %s3508_s18 = smov 0   ;;  %s4952_s0 = inlined_call_operand.vmem [shape: bf16[2,16,16,4], index: 0, kind: input, shape index: {}]   ;;  %s4953_s1 = inlined_call_operand.vmem [shape: bf16[2,16,16,4], index: 1, kind: input, shape index: {}]   ;;  %s4954_s2 = inlined_call_operand.vmem [shape: bf16[72,4], index: 2, kind: input, shape index: {}]   ;;  %s4955_s3 = inlined_call_operand.vmem [shape: f32[1,4], index: 3, kind: input, shape index: {}]   ;;  %s4956_s4 = inlined_call_operand.vmem [shape: f32[2,16,16,4], index: 4, kind: output, shape index: {0}]   ;;  %s4957_s5 = inlined_call_operand.vmem [shape: f32[2,2,4], index: 5, kind: output, shape index: {1}]  }
   0x1 LB: > { %s2587_s19 = sadd.s32 4294967295, %s3466_s18   ;;  %p2591_p0 = scmp.ge.s32.totalorder %s3466_s18, 1  ;;  %s3466_s18 = sphi %s3508_s18, %s16_s18  }
   0x2   : > { %p200_p1 = scmp.lt.s32.totalorder %s3466_s18, 3 }
   0x4   : > { %p201_p2 = pnand %p2591_p0, %p200_p1 }
   0x6   : > { %204 = sbr.rel (%p201_p2) target bundleno = 764 (0x2fc), region = 36 }
   0xd   : > { %p237_p3 = scmp.lt.s32.totalorder %s2587_s19, 1  ;;  %vm257_vm0 = vcmask 64512   ;;  %vm260_vm1 = vcmask 58368   ;;  %v3468_v0 = vmov 0.0   ;;  %vm266_vm2 = vcmask 57344   ;;  %s3469_s24 = smov 4  }
   0xe   : > { %258 = vst.msk [vmem:[#allocation2] sm:$0xff] %vm257_vm0, %v3468_v0  ;;  %259 = vst.msk [vmem:[#allocation2 + $0x8] sm:$0xff] %vm257_vm0, %v3468_v0  ;;  %vm791_vm3 = vcmask 1046528   ;;  %vm968_vm4 = vcmask 1045504   ;;  %s3470_s28 = smov 8   ;;  %s3471_s29 = smov 16  }
   0xf   : > { %261 = vst.msk [vmem:[#allocation2 + $0x10] sm:$0x3] %vm260_vm1, %v3468_v0  ;;  %265 = vst.msk [vmem:[#allocation2 + $0x1a8] sm:$0x3] %vm260_vm1, %v3468_v0  ;;  %s5025_s19 = smov (!%p237_p3, %s2587_s19), 1  ;;  %vm559_vm5 = vcmask 31744  }
  0x10   : > { %263 = vst.msk [vmem:[#allocation2 + $0x198] sm:$0xff] %vm257_vm0, %v3468_v0  ;;  %264 = vst.msk [vmem:[#allocation2 + $0x1a0] sm:$0xff] %vm257_vm0, %v3468_v0  ;;  %s2655_s20 = sshll.u32 %s5025_s19, 7  ;;  %s3472_s30 = smov 24   ;;  %vm2118_vm6 = vcmask 1043456   ;;  %vm1779_vm7 = vcmask 130048  }
  0x11   : > { %267 = vst.msk [vmem:[#allocation2] sm:$0x1] %vm266_vm2, %v3468_v0  ;;  %285 = vst.msk [vmem:[#allocation2 + $0x11] sm:$0x1] %vm266_vm2, %v3468_v0  ;;  %s3562_s23 = scalar_lea.vmem %s4953_s1, %s2655_s20  ;;  %s3581_s27 = scalar_lea.vmem %s4952_s0, %s2655_s20  ;;  %vm1812_vm8 = vcmask 195584   ;;  %vm1845_vm9 = vcmask 261120  }
  0x12   : > { %268 = vst.msk [vmem:[#allocation2 + $0x18] sm:$0x1] %vm266_vm2, %v3468_v0  ;;  %269 = vst.msk [vmem:[#allocation2 + $0x30] sm:$0x1] %vm266_vm2, %v3468_v0  ;;  %v3391_v1 = vld [vmem:[%s3562_s23] sm:$0xff]   ;;  %v3392_v2 = vld [vmem:[%s3562_s23 + $0x10] sm:$0xff]  }
  0x13   : > { %270 = vst.msk [vmem:[#allocation2 + $0x48] sm:$0x1] %vm266_vm2, %v3468_v0  ;;  %271 = vst.msk [vmem:[#allocation2 + $0x60] sm:$0x1] %vm266_vm2, %v3468_v0  ;;  %527 = vrot.lane.b32.xlu0 %v3391_v1, %s3469_s24  ;;  %v3393_v3 = vld [vmem:[%s3562_s23 + $0x8] sm:$0xff]   ;;  %531 = vrot.lane.b32.xlu1 %v3392_v2, %s3469_s24  ;;  %v3394_v4 = vld [vmem:[%s3562_s23 + $0x18] sm:$0xff]  }
  0x14   : > { %272 = vst.msk [vmem:[#allocation2 + $0x78] sm:$0x1] %vm266_vm2, %v3468_v0  ;;  %273 = vst.msk [vmem:[#allocation2 + $0x90] sm:$0x1] %vm266_vm2, %v3468_v0  ;;  %v3395_v5 = vld [vmem:[%s3562_s23 + $0x20] sm:$0xff]   ;;  %v3396_v6 = vld [vmem:[%s3562_s23 + $0x28] sm:$0xff]  }
  0x15   : > { %274 = vst.msk [vmem:[#allocation2 + $0xa8] sm:$0x1] %vm266_vm2, %v3468_v0  ;;  %275 = vst.msk [vmem:[#allocation2 + $0xc0] sm:$0x1] %vm266_vm2, %v3468_v0  ;;  %v3399_v7 = vld [vmem:[%s3562_s23 + $0x30] sm:$0xff]   ;;  %v3397_v8 = vld [vmem:[%s3562_s23 + $0x38] sm:$0xff]  }
  0x16   : > { %276 = vst.msk [vmem:[#allocation2 + $0xd8] sm:$0x1] %vm266_vm2, %v3468_v0  ;;  %277 = vst.msk [vmem:[#allocation2 + $0xf0] sm:$0x1] %vm266_vm2, %v3468_v0  ;;  %v3401_v9 = vld [vmem:[%s3562_s23 + $0x40] sm:$0xff]   ;;  %v3398_v10 = vld [vmem:[%s3562_s23 + $0x48] sm:$0xff]  }
  0x17   : > { %278 = vst.msk [vmem:[#allocation2 + $0x108] sm:$0x1] %vm266_vm2, %v3468_v0  ;;  %279 = vst.msk [vmem:[#allocation2 + $0x120] sm:$0x1] %vm266_vm2, %v3468_v0  ;;  %529 = vrot.lane.b32.xlu0 %v3393_v3, %s3469_s24  ;;  %533 = vrot.lane.b32.xlu1 %v3394_v4, %s3469_s24  ;;  %v3400_v11 = vld [vmem:[%s3562_s23 + $0x58] sm:$0xff]   ;;  %v3403_v12 = vld [vmem:[%s3562_s23 + $0x50] sm:$0xff]  }
  0x18   : > { %280 = vst.msk [vmem:[#allocation2 + $0x138] sm:$0x1] %vm266_vm2, %v3468_v0  ;;  %281 = vst.msk [vmem:[#allocation2 + $0x150] sm:$0x1] %vm266_vm2, %v3468_v0  ;;  %v689_v13 = vld [vmem:[#allocation2] sm:$0xff]  ;;  %v690_v14 = vld [vmem:[#allocation2 + $0x8] sm:$0xff] }
  0x19   : > { %282 = vst.msk [vmem:[#allocation2 + $0x168] sm:$0x1] %vm266_vm2, %v3468_v0  ;;  %283 = vst.msk [vmem:[#allocation2 + $0x180] sm:$0x1] %vm266_vm2, %v3468_v0  ;;  %v691_v15 = vld [vmem:[#allocation2 + $0x10] sm:$0x3] }
  0x1a   : > { %286 = vst.msk [vmem:[#allocation2 + $0x29] sm:$0x1] %vm266_vm2, %v3468_v0  ;;  %287 = vst.msk [vmem:[#allocation2 + $0x41] sm:$0x1] %vm266_vm2, %v3468_v0  ;;  %v3402_v16 = vld [vmem:[%s3562_s23 + $0x68] sm:$0xff]   ;;  %v3404_v17 = vld [vmem:[%s3562_s23 + $0x60] sm:$0xff]  }
  0x1b   : > { %288 = vst.msk [vmem:[#allocation2 + $0x59] sm:$0x1] %vm266_vm2, %v3468_v0  ;;  %289 = vst.msk [vmem:[#allocation2 + $0x71] sm:$0x1] %vm266_vm2, %v3468_v0  ;;  %535 = vrot.lane.b32.xlu0 %v3395_v5, %s3469_s24  ;;  %537 = vrot.lane.b32.xlu1 %v3396_v6, %s3469_s24  ;;  %v792_v18 = vrot.slane %v689_v13, 1  ;;  %v793_v19 = vrot.slane %v690_v14, 1 }
  0x1c   : > { %290 = vst.msk [vmem:[#allocation2 + $0x89] sm:$0x1] %vm266_vm2, %v3468_v0  ;;  %291 = vst.msk [vmem:[#allocation2 + $0xa1] sm:$0x1] %vm266_vm2, %v3468_v0  ;;  %v795_v20 = vrot.slane %v691_v15, 1  ;;  %v3405_v21 = vld [vmem:[%s3562_s23 + $0x70] sm:$0xff]  }
  0x1d   : > { %292 = vst.msk [vmem:[#allocation2 + $0xb9] sm:$0x1] %vm266_vm2, %v3468_v0  ;;  %293 = vst.msk [vmem:[#allocation2 + $0xd1] sm:$0x1] %vm266_vm2, %v3468_v0  ;;  %v969_v22 = vrot.slane %v689_v13, 2  ;;  %v970_v23 = vrot.slane %v690_v14, 2  ;;  %v794_v24 = vsel %vm791_vm3, %v792_v18, %v793_v19 }
  0x1e   : > { %294 = vst.msk [vmem:[#allocation2 + $0xe9] sm:$0x1] %vm266_vm2, %v3468_v0  ;;  %295 = vst.msk [vmem:[#allocation2 + $0x101] sm:$0x1] %vm266_vm2, %v3468_v0  ;;  %v796_v25 = vsel %vm791_vm3, %v793_v19, %v795_v20  ;;  %v972_v26 = vrot.slane %v691_v15, 2  ;;  %v3412_v27 = vld [vmem:[%s3562_s23 + $0x78] sm:$0xff]  }
  0x1f   : > { %296 = vst.msk [vmem:[#allocation2 + $0x119] sm:$0x1] %vm266_vm2, %v3468_v0  ;;  %297 = vst.msk [vmem:[#allocation2 + $0x131] sm:$0x1] %vm266_vm2, %v3468_v0  ;;  %539 = vrot.lane.b32.xlu0 %v3399_v7, %s3469_s24  ;;  %541 = vrot.lane.b32.xlu1 %v3397_v8, %s3469_s24  ;;  %v2751_v28 = vpack.i.bf16 %v796_v25, %v794_v24  ;;  %v971_v29 = vsel %vm968_vm4, %v969_v22, %v970_v23  ;;  %v3406_v32 = vld [vmem:[%s3581_s27] sm:$0xff]   ;;  %v3407_v33 = vld [vmem:[%s3581_s27 + $0x10] sm:$0xff]  }
  0x20   : > { %298 = vst.msk [vmem:[#allocation2 + $0x149] sm:$0x1] %vm266_vm2, %v3468_v0  ;;  %299 = vst.msk [vmem:[#allocation2 + $0x161] sm:$0x1] %vm266_vm2, %v3468_v0  ;;  %v973_v30 = vsel %vm968_vm4, %v970_v23, %v972_v26  ;;  %v3408_v37 = vld [vmem:[%s3581_s27 + $0x8] sm:$0xff]   ;;  %v3409_v41 = vld [vmem:[%s3581_s27 + $0x18] sm:$0xff]  }
  0x21   : > { %300 = vst.msk [vmem:[#allocation2 + $0x179] sm:$0x1] %vm266_vm2, %v3468_v0  ;;  %301 = vst.msk [vmem:[#allocation2 + $0x191] sm:$0x1] %vm266_vm2, %v3468_v0  ;;  %v2756_v31 = vpack.i.bf16 %v973_v30, %v971_v29  ;;  %v3410_v47 = vld [vmem:[%s3581_s27 + $0x20] sm:$0xff]   ;;  %v3411_v51 = vld [vmem:[%s3581_s27 + $0x28] sm:$0xff]  }
  0x22   : > { %302 = vst.msk [vmem:[#allocation2 + $0x1a9] sm:$0x1] %vm266_vm2, %v3468_v0  ;;  %284 = vst.msk [vmem:[#allocation2 + $0x198] sm:$0x1] %vm266_vm2, %v3468_v0  ;;  %v3415_v57 = vld [vmem:[%s3581_s27 + $0x30] sm:$0xff]   ;;  %v3413_v61 = vld [vmem:[%s3581_s27 + $0x38] sm:$0xff]  }
  0x23   : > { %543 = vrot.lane.b32.xlu0 %v3401_v9, %s3469_s24  ;;  %545 = vrot.lane.b32.xlu1 %v3398_v10, %s3469_s24  ;;  %v3417_v8 = vld [vmem:[%s3581_s27 + $0x40] sm:$0xff]   ;;  %v3419_v24 = vld [vmem:[%s3581_s27 + $0x50] sm:$0xff]   ;;  %s3473_s6 = smov 48   ;;  %s3474_s9 = smov 32   ;;  %vm1878_vm10 = vcmask 326656   ;;  %vm1911_vm11 = vcmask 392192  }
  0x24   : > { %s3475_s12 = smov 40   ;;  %s3476_s15 = smov 56   ;;  %vm1944_vm12 = vcmask 457728   ;;  %vm1977_vm13 = vcmask 523264   ;;  %vm2069_vm14 = vcmask 588800   ;;  %vm2485_vm15 = vcmask 1040384  }
  0x25   : > { %s3477_s20 = smov 64   ;;  %s2657_s23 = sshll.u32 %s5025_s19, 8 }
  0x27   : > { %547 = vrot.lane.b32.xlu0 %v3403_v12, %s3469_s24  ;;  %549 = vrot.lane.b32.xlu1 %v3400_v11, %s3469_s24  ;;  %v3414_v11 = vld [vmem:[%s3581_s27 + $0x48] sm:$0xff]  }
  0x2b   : > { %551 = vrot.lane.b32.xlu0 %v3404_v17, %s3469_s24  ;;  %553 = vrot.lane.b32.xlu1 %v3402_v16, %s3469_s24 }
  0x2f   : > { %555 = vrot.lane.b32.xlu0 %v3405_v21, %s3469_s24  ;;  %557 = vrot.lane.b32.xlu1 %v3412_v27, %s3469_s24  ;;  %v3416_v27 = vld [vmem:[%s3581_s27 + $0x58] sm:$0xff]  }
  0x33   : > { %2752 = vrot.lane.b32.xlu0 %v2751_v28, %s3470_s28 }
  0x37   : > { %2757 = vrot.lane.b32.xlu0 %v2756_v31, %s3471_s29 }
  0x85   : > { %v528_v34 = vpop.permute.xlu0 %527  ;;  %v532_v36 = vpop.permute.xlu1 %531 }
  0x86   : > { %v562_v35 = vsel %vm559_vm5, %v3406_v32, %v528_v34  ;;  %v570_v40 = vsel %vm559_vm5, %v3407_v33, %v532_v36 }
  0x87   : > { %v624_v38 = vunpack.c.l.bf16 %v562_v35  ;;  %v625_v39 = vunpack.c.h.bf16 %v562_v35  ;;  %v628_v42 = vunpack.c.l.bf16 %v570_v40  ;;  %v629_v43 = vunpack.c.h.bf16 %v570_v40 }
  0x89   : > { %657 = vst.msk [vmem:[#allocation2 + $0x19] sm:$0xff] %vm257_vm0, %v624_v38  ;;  %658 = vst.msk [vmem:[#allocation2 + $0x21] sm:$0xff] %vm257_vm0, %v625_v39  ;;  %v530_v44 = vpop.permute.xlu0 %529  ;;  %v534_v46 = vpop.permute.xlu1 %533 }
  0x8a   : > { %661 = vst.msk [vmem:[#allocation2 + $0x49] sm:$0xff] %vm257_vm0, %v628_v42  ;;  %662 = vst.msk [vmem:[#allocation2 + $0x51] sm:$0xff] %vm257_vm0, %v629_v43  ;;  %v566_v45 = vsel %vm559_vm5, %v3408_v37, %v530_v44  ;;  %v574_v50 = vsel %vm559_vm5, %v3409_v41, %v534_v46  ;;  %v3420_v43 = vld [vmem:[%s3581_s27 + $0x60] sm:$0xff]  }
  0x8b   : > { %v626_v48 = vunpack.c.l.bf16 %v566_v45  ;;  %v627_v49 = vunpack.c.h.bf16 %v566_v45  ;;  %v630_v52 = vunpack.c.l.bf16 %v574_v50  ;;  %v631_v53 = vunpack.c.h.bf16 %v574_v50 }
  0x8d   : > { %659 = vst.msk [vmem:[#allocation2 + $0x31] sm:$0xff] %vm257_vm0, %v626_v48  ;;  %660 = vst.msk [vmem:[#allocation2 + $0x39] sm:$0xff] %vm257_vm0, %v627_v49  ;;  %v536_v54 = vpop.permute.xlu0 %535  ;;  %v538_v56 = vpop.permute.xlu1 %537 }
  0x8e   : > { %663 = vst.msk [vmem:[#allocation2 + $0x61] sm:$0xff] %vm257_vm0, %v630_v52  ;;  %664 = vst.msk [vmem:[#allocation2 + $0x69] sm:$0xff] %vm257_vm0, %v631_v53  ;;  %v578_v55 = vsel %vm559_vm5, %v3410_v47, %v536_v54  ;;  %v582_v60 = vsel %vm559_vm5, %v3411_v51, %v538_v56  ;;  %v3418_v47 = vld [vmem:[%s3581_s27 + $0x68] sm:$0xff]  }
  0x8f   : > { %v632_v58 = vunpack.c.l.bf16 %v578_v55  ;;  %v633_v59 = vunpack.c.h.bf16 %v578_v55  ;;  %v634_v62 = vunpack.c.l.bf16 %v582_v60  ;;  %v635_v63 = vunpack.c.h.bf16 %v582_v60 }
  0x90   : > { %v3629_v0 = vld [vmem:[#allocation2 + $0x18] sm:$0xff]  ;;  %v3631_v1 = vld [vmem:[#allocation2 + $0x20] sm:$0xff]  ;;  %v3708_v46 = vld [vmem:[#allocation2 + $0x28] sm:$0x3] }
  0x91   : > { %665 = vst.msk [vmem:[#allocation2 + $0x79] sm:$0xff] %vm257_vm0, %v632_v58  ;;  %666 = vst.msk [vmem:[#allocation2 + $0x81] sm:$0xff] %vm257_vm0, %v633_v59  ;;  %v2761_v2 = vpack.i.bf16 %v3631_v1, %v3629_v0  ;;  %v3637_v3 = vld [vmem:[#allocation2 + $0x48] sm:$0xff]  ;;  %v3639_v4 = vld [vmem:[#allocation2 + $0x50] sm:$0xff]  ;;  %v540_v5 = vpop.permute.xlu0 %539  ;;  %v542_v6 = vpop.permute.xlu1 %541  ;;  %v797_v54 = vrot.slane %v3629_v0, 1  ;;  %v798_v55 = vrot.slane %v3631_v1, 1 }
  0x92   : > { %667 = vst.msk [vmem:[#allocation2 + $0x91] sm:$0xff] %vm257_vm0, %v634_v62  ;;  %668 = vst.msk [vmem:[#allocation2 + $0x99] sm:$0xff] %vm257_vm0, %v635_v63  ;;  %v586_v7 = vsel %vm559_vm5, %v3415_v57, %v540_v5  ;;  %v3648_v9 = vpack.i.bf16 %v3639_v4, %v3637_v3  ;;  %v590_v10 = vsel %vm559_vm5, %v3413_v61, %v542_v6  ;;  %v800_v58 = vrot.slane %v3708_v46, 1  ;;  %v3421_v61 = vld [vmem:[%s3581_s27 + $0x70] sm:$0xff]  }
  0x93   : > { %2762 = vrot.lane.b32.xlu0 %v2761_v2, %s3472_s30  ;;  %v636_v12 = vunpack.c.l.bf16 %v586_v7  ;;  %v637_v13 = vunpack.c.h.bf16 %v586_v7  ;;  %v638_v16 = vunpack.c.l.bf16 %v590_v10  ;;  %v639_v17 = vunpack.c.h.bf16 %v590_v10 }
  0x94   : > { %v3652_v14 = vld [vmem:[#allocation2 + $0x30] sm:$0xff]  ;;  %v3654_v15 = vld [vmem:[#allocation2 + $0x38] sm:$0xff]  ;;  %v3689_v37 = vld [vmem:[#allocation2 + $0x40] sm:$0x3] }
  0x95   : > { %v2766_v18 = vpack.i.bf16 %v3654_v15, %v3652_v14  ;;  %v3658_v19 = vld [vmem:[#allocation2 + $0x60] sm:$0xff]  ;;  %v3660_v20 = vld [vmem:[#allocation2 + $0x68] sm:$0xff]  ;;  %669 = vst.msk [vmem:[#allocation2 + $0xa9] sm:$0xff] %vm257_vm0, %v636_v12  ;;  %670 = vst.msk [vmem:[#allocation2 + $0xb1] sm:$0xff] %vm257_vm0, %v637_v13  ;;  %v544_v21 = vpop.permute.xlu0 %543  ;;  %v546_v22 = vpop.permute.xlu1 %545  ;;  %v802_v39 = vrot.slane %v3652_v14, 1  ;;  %v803_v40 = vrot.slane %v3654_v15, 1 }
  0x96   : > { %671 = vst.msk [vmem:[#allocation2 + $0xc1] sm:$0xff] %vm257_vm0, %v638_v16  ;;  %672 = vst.msk [vmem:[#allocation2 + $0xc9] sm:$0xff] %vm257_vm0, %v639_v17  ;;  %v594_v23 = vsel %vm559_vm5, %v3417_v8, %v544_v21  ;;  %v3673_v25 = vpack.i.bf16 %v3660_v20, %v3658_v19  ;;  %v598_v26 = vsel %vm559_vm5, %v3414_v11, %v546_v22  ;;  %v805_v50 = vrot.slane %v3689_v37, 1  ;;  %v3712_v53 = vld [vmem:[#allocation2 + $0x70] sm:$0x3] }
  0x97   : > { %2767 = vrot.lane.b32.xlu1 %v2766_v18, %s3472_s30  ;;  %2772 = vrot.lane.b32.xlu0 %v3648_v9, %s3472_s30  ;;  %v640_v28 = vunpack.c.l.bf16 %v594_v23  ;;  %v641_v29 = vunpack.c.h.bf16 %v594_v23  ;;  %v642_v32 = vunpack.c.l.bf16 %v598_v26  ;;  %v643_v33 = vunpack.c.h.bf16 %v598_v26  ;;  %v3735_v13 = vld [vmem:[#allocation2 + $0x58] sm:$0x3] }
  0x98   : > { %v3677_v30 = vld [vmem:[#allocation2 + $0x78] sm:$0xff]  ;;  %v3679_v31 = vld [vmem:[#allocation2 + $0x80] sm:$0xff]  ;;  %v804_v57 = vsel %vm791_vm3, %v802_v39, %v803_v40  ;;  %v812_v62 = vrot.slane %v3658_v19, 1  ;;  %v813_v63 = vrot.slane %v3660_v20, 1  ;;  %v806_v6 = vsel %vm791_vm3, %v803_v40, %v805_v50 }
  0x99   : > { %v3683_v34 = vpack.i.bf16 %v3679_v31, %v3677_v30  ;;  %v3685_v35 = vld [vmem:[#allocation2 + $0x90] sm:$0xff]  ;;  %v3687_v36 = vld [vmem:[#allocation2 + $0x98] sm:$0xff]  ;;  %673 = vst.msk [vmem:[#allocation2 + $0xd9] sm:$0xff] %vm257_vm0, %v640_v28  ;;  %674 = vst.msk [vmem:[#allocation2 + $0xe1] sm:$0xff] %vm257_vm0, %v641_v29  ;;  %v548_v38 = vpop.permute.xlu0 %547  ;;  %v550_v41 = vpop.permute.xlu1 %549  ;;  %v815_v7 = vrot.slane %v3712_v53, 1  ;;  %v799_v11 = vsel %vm791_vm3, %v797_v54, %v798_v55  ;;  %v807_v16 = vrot.slane %v3637_v3, 1 }
  0x9a   : > { %675 = vst.msk [vmem:[#allocation2 + $0xf1] sm:$0xff] %vm257_vm0, %v642_v32  ;;  %676 = vst.msk [vmem:[#allocation2 + $0xf9] sm:$0xff] %vm257_vm0, %v643_v33  ;;  %v602_v42 = vsel %vm559_vm5, %v3419_v24, %v548_v38  ;;  %v3705_v44 = vpack.i.bf16 %v3687_v36, %v3685_v35  ;;  %v606_v45 = vsel %vm559_vm5, %v3416_v27, %v550_v41  ;;  %v3733_v12 = vld [vmem:[#allocation2 + $0xa0] sm:$0x3]  ;;  %v808_v22 = vrot.slane %v3639_v4, 1 }
  0x9b   : > { %2777 = vrot.lane.b32.xlu1 %v3673_v25, %s3472_s30  ;;  %2782 = vrot.lane.b32.xlu0 %v3683_v34, %s3472_s30  ;;  %v644_v48 = vunpack.c.l.bf16 %v602_v42  ;;  %v645_v49 = vunpack.c.h.bf16 %v602_v42  ;;  %v646_v51 = vunpack.c.l.bf16 %v606_v45  ;;  %v647_v52 = vunpack.c.h.bf16 %v606_v45  ;;  %v3758_v32 = vld [vmem:[#allocation2 + $0x88] sm:$0x3] }
  0x9c   : > { %4986 = vst [vmem:[#allocation3_spill] sm:$0xff] %v3705_v44  ;;  %v801_v21 = vsel %vm791_vm3, %v798_v55, %v800_v58  ;;  %v3754_v28 = vpack.i.bf16 %v806_v6, %v804_v57  ;;  %v814_v29 = vsel %vm791_vm3, %v812_v62, %v813_v63  ;;  %v816_v39 = vsel %vm791_vm3, %v813_v63, %v815_v7 }
  0x9d   : > { %677 = vst.msk [vmem:[#allocation2 + $0x109] sm:$0xff] %vm257_vm0, %v644_v48  ;;  %678 = vst.msk [vmem:[#allocation2 + $0x111] sm:$0xff] %vm257_vm0, %v645_v49  ;;  %v552_v56 = vpop.permute.xlu0 %551  ;;  %v554_v59 = vpop.permute.xlu1 %553  ;;  %v3743_v23 = vld [vmem:[#allocation2 + $0xc0] sm:$0xff]  ;;  %v3745_v24 = vld [vmem:[#allocation2 + $0xc8] sm:$0xff]  ;;  %v822_v40 = vrot.slane %v3685_v35, 1  ;;  %v823_v41 = vrot.slane %v3687_v36, 1  ;;  %v3785_v55 = vpack.i.bf16 %v816_v39, %v814_v29  ;;  %v809_v58 = vsel %vm791_vm3, %v807_v16, %v808_v22 }
  0x9e   : > { %679 = vst.msk [vmem:[#allocation2 + $0x121] sm:$0xff] %vm257_vm0, %v646_v51  ;;  %680 = vst.msk [vmem:[#allocation2 + $0x129] sm:$0xff] %vm257_vm0, %v647_v52  ;;  %v610_v60 = vsel %vm559_vm5, %v3420_v43, %v552_v56  ;;  %v614_v2 = vsel %vm559_vm5, %v3418_v47, %v554_v59  ;;  %v3747_v26 = vld [vmem:[#allocation2 + $0xd0] sm:$0x3]  ;;  %v832_v42 = vrot.slane %v3743_v23, 1  ;;  %v833_v43 = vrot.slane %v3745_v24, 1 }
  0x9f   : > { %2787 = vrot.lane.b32.xlu1 %v3705_v44, %s3472_s30  ;;  %2792 = vrot.lane.b32.xlu0 %v2766_v18, %s3473_s6  ;;  %v648_v5 = vunpack.c.l.bf16 %v610_v60  ;;  %v650_v8 = vunpack.c.l.bf16 %v614_v2  ;;  %v651_v10 = vunpack.c.h.bf16 %v614_v2  ;;  %v649_v17 = vunpack.c.h.bf16 %v610_v60  ;;  %4987 = vst [vmem:[#allocation4_spill] sm:$0xff] %v3754_v28  ;;  %4989 = vst [vmem:[#allocation6_spill] sm:$0xff] %v3785_v55  ;;  %v3790_v59 = vld [vmem:[#allocation2 + $0xa8] sm:$0xff]  ;;  %v3798_v2 = vld [vmem:[#allocation2 + $0xb8] sm:$0x3] }
  0xa0   : > { %v835_v45 = vrot.slane %v3747_v26, 1  ;;  %v817_v47 = vrot.slane %v3677_v30, 1  ;;  %v818_v48 = vrot.slane %v3679_v31, 1  ;;  %v820_v49 = vrot.slane %v3758_v32, 1  ;;  %v3821_v29 = vld [vmem:[#allocation2 + $0xe8] sm:$0x3] }
  0xa1   : > { %681 = vst.msk [vmem:[#allocation2 + $0x139] sm:$0xff] %vm257_vm0, %v648_v5  ;;  %v556_v18 = vpop.permute.xlu0 %555  ;;  %683 = vst.msk [vmem:[#allocation2 + $0x151] sm:$0xff] %vm257_vm0, %v650_v8  ;;  %v3773_v50 = vld [vmem:[#allocation2 + $0xf0] sm:$0xff]  ;;  %v3779_v51 = vpack.i.bf16 %v801_v21, %v799_v11  ;;  %v3781_v52 = vld [vmem:[#allocation2 + $0xf8] sm:$0xff]  ;;  %v824_v56 = vsel %vm791_vm3, %v822_v40, %v823_v41  ;;  %v827_v11 = vrot.slane %v3790_v59, 1 }
  0xa2   : > { %684 = vst.msk [vmem:[#allocation2 + $0x159] sm:$0xff] %vm257_vm0, %v651_v10  ;;  %v618_v27 = vsel %vm559_vm5, %v3421_v61, %v556_v18  ;;  %682 = vst.msk [vmem:[#allocation2 + $0x141] sm:$0xff] %vm257_vm0, %v649_v17  ;;  %v3783_v54 = vld [vmem:[#allocation2 + $0x100] sm:$0x3]  ;;  %v834_v61 = vsel %vm791_vm3, %v832_v42, %v833_v43  ;;  %v836_v62 = vsel %vm791_vm3, %v833_v43, %v835_v45  ;;  %v842_v63 = vrot.slane %v3773_v50, 1  ;;  %v3804_v10 = vld [vmem:[#allocation2 + $0xd8] sm:$0xff] }
  0xa3   : > { %2797 = vrot.lane.b32.xlu1 %v3648_v9, %s3473_s6  ;;  %2802 = vrot.lane.b32.xlu0 %v3673_v25, %s3473_s6  ;;  %v652_v33 = vunpack.c.l.bf16 %v618_v27  ;;  %v653_v38 = vunpack.c.h.bf16 %v618_v27  ;;  %v825_v9 = vrot.slane %v3733_v12, 1  ;;  %v810_v25 = vrot.slane %v3735_v13, 1  ;;  %4988 = vst [vmem:[#allocation5_spill] sm:$0xff] %v3779_v51  ;;  %v3816_v21 = vld [vmem:[#allocation2 + $0xe0] sm:$0xff] }
  0xa4   : > { %v819_v5 = vsel %vm791_vm3, %v817_v47, %v818_v48  ;;  %v821_v6 = vsel %vm791_vm3, %v818_v48, %v820_v49  ;;  %v843_v7 = vrot.slane %v3781_v52, 1  ;;  %v845_v8 = vrot.slane %v3783_v54, 1  ;;  %v3837_v42 = vld [vmem:[#allocation2 + $0x110] sm:$0xff] }
  0xa5   : > { %685 = vst.msk [vmem:[#allocation2 + $0x169] sm:$0xff] %vm257_vm0, %v652_v33  ;;  %686 = vst.msk [vmem:[#allocation2 + $0x171] sm:$0xff] %vm257_vm0, %v653_v38  ;;  %v826_v57 = vsel %vm791_vm3, %v823_v41, %v825_v9  ;;  %v811_v60 = vsel %vm791_vm3, %v808_v22, %v810_v25  ;;  %v3812_v17 = vld [vmem:[#allocation2 + $0x120] sm:$0xff]  ;;  %v3814_v18 = vld [vmem:[#allocation2 + $0x128] sm:$0xff]  ;;  %v830_v22 = vrot.slane %v3798_v2, 1  ;;  %v3829_v40 = vpack.i.bf16 %v836_v62, %v834_v61 }
  0xa6   : > { %v3819_v27 = vld [vmem:[#allocation2 + $0x130] sm:$0x3]  ;;  %v3823_v33 = vld [vmem:[#allocation2 + $0x108] sm:$0xff]  ;;  %v3825_v38 = vpack.i.bf16 %v826_v57, %v824_v56  ;;  %v3827_v39 = vpack.i.bf16 %v811_v60, %v809_v58  ;;  %v3831_v41 = vpack.i.bf16 %v821_v6, %v819_v5  ;;  %v844_v43 = vsel %vm791_vm3, %v842_v63, %v843_v7  ;;  %v3845_v56 = vld [vmem:[#allocation2 + $0x118] sm:$0x3] }
  0xa7   : > { %2807 = vrot.lane.b32.xlu1 %v3683_v34, %s3473_s6  ;;  %2817 = vrot.lane.b32.xlu0 %v3754_v28, %s3470_s28  ;;  %v3792_v34 = vld [vmem:[#allocation2 + $0xb0] sm:$0xff]  ;;  %4992 = vst [vmem:[#allocation9_spill] sm:$0xff] %v3829_v40  ;;  %v846_v45 = vsel %vm791_vm3, %v843_v7, %v845_v8  ;;  %v852_v47 = vrot.slane %v3812_v17, 1  ;;  %v853_v48 = vrot.slane %v3814_v18, 1  ;;  %4994 = vst [vmem:[#allocation11_spill] sm:$0xff] %v3845_v56  ;;  %v855_v58 = vrot.slane %v3819_v27, 1 }
  0xa8   : > { %v828_v16 = vrot.slane %v3792_v34, 1  ;;  %4990 = vst [vmem:[#allocation7_spill] sm:$0xff] %v3825_v38  ;;  %4991 = vst [vmem:[#allocation8_spill] sm:$0xff] %v3827_v39  ;;  %v3833_v9 = vld [vmem:[#allocation2 + $0x150] sm:$0xff]  ;;  %v837_v60 = vrot.slane %v3804_v10, 1  ;;  %v838_v61 = vrot.slane %v3816_v21, 1  ;;  %v3863_v44 = vpack.i.bf16 %v846_v45, %v844_v43 }
  0xa9   : > { %4993 = vst [vmem:[#allocation10_spill] sm:$0xff] %v3831_v41  ;;  %v3835_v25 = vld [vmem:[#allocation2 + $0x158] sm:$0xff]  ;;  %v3843_v49 = vld [vmem:[#allocation2 + $0x160] sm:$0x3]  ;;  %v840_v63 = vrot.slane %v3821_v29, 1  ;;  %v862_v5 = vrot.slane %v3833_v9, 1 }
  0xaa   : > { %v829_v57 = vsel %vm791_vm3, %v827_v11, %v828_v16  ;;  %v831_v62 = vsel %vm791_vm3, %v828_v16, %v830_v22  ;;  %v863_v6 = vrot.slane %v3835_v25, 1  ;;  %v865_v7 = vrot.slane %v3843_v49, 1  ;;  %4995 = vst [vmem:[#allocation12_spill] sm:$0xff] %v3863_v44  ;;  %v3874_v28 = vld [vmem:[#allocation2 + $0x138] sm:$0xff]  ;;  %v3878_v43 = vld [vmem:[#allocation2 + $0x148] sm:$0x3] }
  0xab   : > { %2827 = vrot.lane.b32.xlu0 %v3785_v55, %s3470_s28  ;;  %2812 = vrot.lane.b32.xlu1 %v3779_v51, %s3470_s28  ;;  %v847_v8 = vrot.slane %v3823_v33, 1  ;;  %v848_v11 = vrot.slane %v3837_v42, 1  ;;  %v854_v55 = vsel %vm791_vm3, %v852_v47, %v853_v48  ;;  %v3870_v16 = vpack.i.bf16 %v831_v62, %v829_v57  ;;  %v3876_v51 = vld [vmem:[#allocation2 + $0x140] sm:$0xff] }
  0xac   : > { %v856_v22 = vsel %vm791_vm3, %v853_v48, %v855_v58  ;;  %v841_v45 = vsel %vm791_vm3, %v838_v61, %v840_v63  ;;  %v864_v47 = vsel %vm791_vm3, %v862_v5, %v863_v6  ;;  %v3884_v57 = vld [vmem:[#allocation2 + $0x168] sm:$0xff]  ;;  %v3886_v62 = vld [vmem:[#allocation2 + $0x170] sm:$0xff]  ;;  %v3888_v48 = vld [vmem:[#allocation2 + $0x178] sm:$0x3]  ;;  %v866_v58 = vsel %vm791_vm3, %v863_v6, %v865_v7 }
  0xad   : > { %4996 = vst [vmem:[#allocation13_spill] sm:$0xff] %v3870_v16  ;;  %4997 = vst [vmem:[#allocation14_spill] sm:$0xff] %v3886_v62  ;;  %v3894_v63 = vpack.i.bf16 %v856_v22, %v854_v55  ;;  %v860_v5 = vrot.slane %v3878_v43, 1  ;;  %v870_v55 = vrot.slane %v3888_v48, 1  ;;  %v3908_v7 = vpack.i.bf16 %v866_v58, %v864_v47 }
  0xae   : > { %4998 = vst [vmem:[#allocation15_spill] sm:$0xff] %v3888_v48  ;;  %v999_v48 = vrot.slane %v3685_v35, 2  ;;  %v977_v35 = vrot.slane %v3708_v46, 2  ;;  %v1009_v47 = vrot.slane %v3743_v23, 2  ;;  %v1010_v58 = vrot.slane %v3745_v24, 2 }
  0xaf   : > { %2837 = vrot.lane.b32.xlu0 %v3825_v38, %s3470_s28  ;;  %2822 = vrot.lane.b32.xlu1 %v3827_v39, %s3470_s28  ;;  %v850_v38 = vrot.slane %v3845_v56, 1  ;;  %v839_v39 = vsel %vm791_vm3, %v837_v60, %v838_v61  ;;  %v849_v60 = vsel %vm791_vm3, %v847_v8, %v848_v11  ;;  %v982_v61 = vrot.slane %v3689_v37, 2 }
  0xb0   : > { %v3903_v6 = vpack.i.bf16 %v841_v45, %v839_v39  ;;  %v868_v37 = vrot.slane %v3886_v62, 1  ;;  %v992_v62 = vrot.slane %v3712_v53, 2  ;;  %v975_v53 = vrot.slane %v3631_v1, 2 }
  0xb1   : > { %v851_v56 = vsel %vm791_vm3, %v848_v11, %v850_v38  ;;  %v867_v38 = vrot.slane %v3884_v57, 1  ;;  %v987_v1 = vrot.slane %v3735_v13, 2 }
  0xb2   : > { %v3910_v8 = vpack.i.bf16 %v851_v56, %v849_v60  ;;  %v974_v56 = vrot.slane %v3629_v0, 2  ;;  %v1012_v60 = vrot.slane %v3747_v26, 2 }
  0xb3   : > { %2847 = vrot.lane.b32.xlu0 %v3829_v40, %s3470_s28  ;;  %2832 = vrot.lane.b32.xlu1 %v3831_v41, %s3470_s28  ;;  %v979_v40 = vrot.slane %v3652_v14, 2  ;;  %v980_v41 = vrot.slane %v3654_v15, 2  ;;  %v857_v14 = vrot.slane %v3874_v28, 1  ;;  %v858_v15 = vrot.slane %v3876_v51, 1 }
  0xb5   : > { %v981_v11 = vsel %vm968_vm4, %v979_v40, %v980_v41  ;;  %v983_v22 = vsel %vm968_vm4, %v980_v41, %v982_v61  ;;  %v859_v39 = vsel %vm791_vm3, %v857_v14, %v858_v15  ;;  %v861_v45 = vsel %vm791_vm3, %v858_v15, %v860_v5 }
  0xb6   : > { %v869_v40 = vsel %vm791_vm3, %v867_v38, %v868_v37  ;;  %v1002_v41 = vrot.slane %v3733_v12, 2  ;;  %v984_v61 = vrot.slane %v3637_v3, 2  ;;  %v985_v14 = vrot.slane %v3639_v4, 2 }
  0xb7   : > { %2857 = vrot.lane.b32.xlu0 %v3863_v44, %s3470_s28  ;;  %2842 = vrot.lane.b32.xlu1 %v3870_v16, %s3470_s28  ;;  %v989_v44 = vrot.slane %v3658_v19, 2  ;;  %v990_v16 = vrot.slane %v3660_v20, 2  ;;  %v871_v19 = vsel %vm791_vm3, %v868_v37, %v870_v55  ;;  %v1000_v20 = vrot.slane %v3687_v36, 2 }
  0xb8   : > { %v3936_v15 = vpack.i.bf16 %v983_v22, %v981_v11  ;;  %v3938_v36 = vpack.i.bf16 %v861_v45, %v859_v39  ;;  %v1019_v3 = vrot.slane %v3773_v50, 2  ;;  %v1020_v4 = vrot.slane %v3781_v52, 2 }
  0xb9   : > { %v991_v0 = vsel %vm968_vm4, %v989_v44, %v990_v16  ;;  %v993_v46 = vsel %vm968_vm4, %v990_v16, %v992_v62  ;;  %v1022_v12 = vrot.slane %v3783_v54, 2  ;;  %v3950_v26 = vpack.i.bf16 %v871_v19, %v869_v40 }
  0xba   : > { %v1001_v44 = vsel %vm968_vm4, %v999_v48, %v1000_v20  ;;  %v1003_v13 = vsel %vm968_vm4, %v1000_v20, %v1002_v41  ;;  %v976_v5 = vsel %vm968_vm4, %v974_v56, %v975_v53  ;;  %v978_v38 = vsel %vm968_vm4, %v975_v53, %v977_v35 }
  0xbb   : > { %2867 = vrot.lane.b32.xlu0 %v3894_v63, %s3470_s28  ;;  %2852 = vrot.lane.b32.xlu1 %v3903_v6, %s3470_s28  ;;  %v1011_v37 = vsel %vm968_vm4, %v1009_v47, %v1010_v58  ;;  %v1013_v16 = vsel %vm968_vm4, %v1010_v58, %v1012_v60  ;;  %v986_v62 = vsel %vm968_vm4, %v984_v61, %v985_v14  ;;  %v994_v54 = vrot.slane %v3677_v30, 2 }
  0xbc   : > { %v988_v55 = vsel %vm968_vm4, %v985_v14, %v987_v1  ;;  %v995_v11 = vrot.slane %v3679_v31, 2  ;;  %v997_v48 = vrot.slane %v3758_v32, 2  ;;  %v1021_v22 = vsel %vm968_vm4, %v1019_v3, %v1020_v4  ;;  %v3422_v1 = vld [vmem:[%s3581_s27 + $0x78] sm:$0xff]   ;;  %v558_v3 = vpop.permute.xlu1 %557 }
  0xbd   : > { %v1023_v39 = vsel %vm968_vm4, %v1020_v4, %v1022_v12  ;;  %v1029_v45 = vrot.slane %v3812_v17, 2  ;;  %v1030_v40 = vrot.slane %v3814_v18, 2  ;;  %v3971_v19 = vpack.i.bf16 %v993_v46, %v991_v0 }
  0xbe   : > { %v3973_v30 = vpack.i.bf16 %v1003_v13, %v1001_v44  ;;  %v1032_v31 = vrot.slane %v3819_v27, 2  ;;  %v3976_v32 = vpack.i.bf16 %v978_v38, %v976_v5  ;;  %v1004_v20 = vrot.slane %v3790_v59, 2 }
  0xbf   : > { %2877 = vrot.lane.b32.xlu0 %v3908_v7, %s3470_s28  ;;  %2862 = vrot.lane.b32.xlu1 %v3910_v8, %s3470_s28  ;;  %v1005_v41 = vrot.slane %v3792_v34, 2  ;;  %v3980_v56 = vpack.i.bf16 %v1013_v16, %v1011_v37  ;;  %v3982_v53 = vpack.i.bf16 %v988_v55, %v986_v62  ;;  %v3984_v35 = vpack.i.bf16 %v1023_v39, %v1021_v22 }
  0xc0   : > { %v1007_v47 = vrot.slane %v3798_v2, 2  ;;  %v996_v27 = vsel %vm968_vm4, %v994_v54, %v995_v11  ;;  %v998_v58 = vsel %vm968_vm4, %v995_v11, %v997_v48  ;;  %v1031_v60 = vsel %vm968_vm4, %v1029_v45, %v1030_v40 }
  0xc1   : > { %v1039_v61 = vrot.slane %v3833_v9, 2  ;;  %v1033_v14 = vsel %vm968_vm4, %v1030_v40, %v1032_v31  ;;  %v1040_v0 = vrot.slane %v3835_v25, 2  ;;  %v1006_v2 = vsel %vm968_vm4, %v1004_v20, %v1005_v41 }
  0xc2   : > { %v1042_v46 = vrot.slane %v3843_v49, 2  ;;  %v1008_v4 = vsel %vm968_vm4, %v1005_v41, %v1007_v47  ;;  %v1014_v12 = vrot.slane %v3804_v10, 2  ;;  %v1015_v44 = vrot.slane %v3816_v21, 2 }
  0xc3   : > { %2892 = vrot.lane.b32.xlu0 %v3936_v15, %s3471_s29  ;;  %2872 = vrot.lane.b32.xlu1 %v3938_v36, %s3470_s28  ;;  %v4007_v13 = vpack.i.bf16 %v998_v58, %v996_v27  ;;  %v4009_v5 = vpack.i.bf16 %v1033_v14, %v1031_v60  ;;  %v1041_v38 = vsel %vm968_vm4, %v1039_v61, %v1040_v0  ;;  %v1017_v49 = vrot.slane %v3821_v29, 2  ;;  %v4999_v29 = vld [vmem:[#allocation11_spill] sm:$0xff]  ;;  %v5000_v58 = vld [vmem:[#allocation14_spill] sm:$0xff] }
  0xc4   : > { %v622_v37 = vsel %vm559_vm5, %v3422_v1, %v558_v3  ;;  %v4014_v16 = vpack.i.bf16 %v1008_v4, %v1006_v2  ;;  %v1043_v62 = vsel %vm968_vm4, %v1040_v0, %v1042_v46  ;;  %v1016_v11 = vsel %vm968_vm4, %v1014_v12, %v1015_v44  ;;  %v5001_v14 = vld [vmem:[#allocation15_spill] sm:$0xff] }
  0xc5   : > { %v654_v55 = vunpack.c.l.bf16 %v622_v37  ;;  %v655_v54 = vunpack.c.h.bf16 %v622_v37  ;;  %v1024_v48 = vrot.slane %v3823_v33, 2  ;;  %v1025_v22 = vrot.slane %v3837_v42, 2  ;;  %v3424_v37 = vld [vmem:[%s4954_s2 + $0x8] sm:$0xff]  }
  0xc6   : > { %v1027_v39 = vrot.slane %v4999_v29, 2  ;;  %v1018_v45 = vsel %vm968_vm4, %v1015_v44, %v1017_v49  ;;  %v1034_v40 = vrot.slane %v3874_v28, 2  ;;  %v1035_v31 = vrot.slane %v3876_v51, 2  ;;  %v3423_v44 = vld [vmem:[%s4954_s2] sm:$0xff]   ;;  %v4105_v29 = vpop.permute.xlu0 %2752 }
  0xc7   : > { %2902 = vrot.lane.b32.xlu0 %v3971_v19, %s3471_s29  ;;  %2882 = vrot.lane.b32.xlu1 %v3950_v26, %s3470_s28  ;;  %687 = vst.msk [vmem:[#allocation2 + $0x181] sm:$0xff] %vm257_vm0, %v654_v55  ;;  %688 = vst.msk [vmem:[#allocation2 + $0x189] sm:$0xff] %vm257_vm0, %v655_v54  ;;  %v1037_v20 = vrot.slane %v3878_v43, 2  ;;  %v1026_v41 = vsel %vm968_vm4, %v1024_v48, %v1025_v22  ;;  %v1044_v27 = vrot.slane %v3884_v57, 2  ;;  %v1045_v60 = vrot.slane %v5000_v58, 2  ;;  %v5003_v55 = vld [vmem:[#allocation4_spill] sm:$0xff]  ;;  %s4783_s28 = scalar_lea.vmem %s4956_s4, %s2657_s23 }
  0xc8   : > { %v1028_v47 = vsel %vm968_vm4, %v1025_v22, %v1027_v39  ;;  %v4039_v61 = vpack.i.bf16 %v1018_v45, %v1016_v11  ;;  %v1047_v0 = vrot.slane %v5001_v14, 2  ;;  %v1036_v43 = vsel %vm968_vm4, %v1034_v40, %v1035_v31  ;;  %2679 = vmatprep.subr.bf16.mxu0 %v3423_v44  ;;  %2721 = vmatprep.subr.bf16.mxu1 %v3423_v44  ;;  %v3427_v54 = vld [vmem:[%s4954_s2 + $0x20] ss:$0 sps:$4 sm:$0xff]   ;;  %v5004_v11 = vld [vmem:[#allocation8_spill] sm:$0xff]  ;;  %v5005_v22 = vld [vmem:[#allocation6_spill] sm:$0xff] }
  0xc9   : > { %v1038_v1 = vsel %vm968_vm4, %v1035_v31, %v1037_v20  ;;  %v4048_v2 = vpack.i.bf16 %v1028_v47, %v1026_v41  ;;  %v4050_v46 = vpack.i.bf16 %v1043_v62, %v1041_v38  ;;  %v1046_v3 = vsel %vm968_vm4, %v1044_v27, %v1045_v60  ;;  %v5002_v38 = vld [vmem:[#allocation5_spill] sm:$0xff]  ;;  %2680 = vmatpush3.bf16.msra.mxu0 %v3423_v44  ;;  %v3425_v62 = vld [vmem:[%s4954_s2 + $0x10] sm:$0xff]  }
  0xca   : > { %v1048_v4 = vsel %vm968_vm4, %v1045_v60, %v1047_v0  ;;  %v4054_v12 = vpack.i.bf16 %v1038_v1, %v1036_v43  ;;  %2726 = vmatpush3.bf16.msra.mxu1 %v3423_v44  ;;  %2681 = vmatprep.subr.bf16.mxu0 %v3424_v37  ;;  %v2120_v48 = vsel %vm2118_vm6, %v3427_v54, 0  ;;  %v4115_v39 = vpop.permute.xlu0 %2757  ;;  %v5007_v45 = vld [vmem:[#allocation3_spill] sm:$0xff]  ;;  %v3091_v27 = vpack.i.bf16 %v3792_v34, %v3790_v59  ;;  %v5009_v0 = vld [vmem:[#allocation13_spill] sm:$0xff] }
  0xcb   : > { %2912 = vrot.lane.b32.xlu0 %v3973_v30, %s3471_s29  ;;  %2887 = vrot.lane.b32.xlu1 %v3976_v32, %s3471_s29  ;;  %v4063_v49 = vpack.i.bf16 %v1048_v4, %v1046_v3  ;;  %v3121_v1 = vpack.i.bf16 %v3745_v24, %v3743_v23  ;;  %v5010_v44 = vld [vmem:[#allocation9_spill] sm:$0xff] }
  0xcc   : > { %2722 = vmatprep.subr.bf16.mxu1 %v3424_v37 }
  0xcd   : > { %2682 = vmatpush3.bf16.msra.mxu0 %v3424_v37 }
  0xce   : > { %2727 = vmatpush3.bf16.msra.mxu1 %v3424_v37  ;;  %2683 = vmatprep.subr.bf16.mxu0 %v3425_v62  ;;  %v3151_v37 = vpack.i.bf16 %v3816_v21, %v3804_v10 }
  0xcf   : > { %2922 = vrot.lane.b32.xlu0 %v3980_v56, %s3471_s29  ;;  %2897 = vrot.lane.b32.xlu1 %v3982_v53, %s3471_s29 }
  0xd0   : > { %2723 = vmatprep.subr.bf16.mxu1 %v3425_v62 }
  0xd1   : > { %2684 = vmatpush3.bf16.msra.mxu0 %v3425_v62 }
  0xd2   : > { %2728 = vmatpush3.bf16.msra.mxu1 %v3425_v62 }
  0xd3   : > { %2932 = vrot.lane.b32.xlu0 %v3984_v35, %s3471_s29  ;;  %2907 = vrot.lane.b32.xlu1 %v4007_v13, %s3471_s29 }
  0xd7   : > { %2942 = vrot.lane.b32.xlu0 %v4009_v5, %s3471_s29  ;;  %2917 = vrot.lane.b32.xlu1 %v4014_v16, %s3471_s29 }
  0xdb   : > { %2952 = vrot.lane.b32.xlu0 %v4050_v46, %s3471_s29  ;;  %2927 = vrot.lane.b32.xlu1 %v4039_v61, %s3471_s29 }
  0xdf   : > { %2962 = vrot.lane.b32.xlu0 %v5002_v38, %s3474_s9  ;;  %2937 = vrot.lane.b32.xlu1 %v4048_v2, %s3471_s29 }
  0xe3   : > { %2972 = vrot.lane.b32.xlu0 %v3976_v32, %s3475_s12  ;;  %2947 = vrot.lane.b32.xlu1 %v4054_v12, %s3471_s29  ;;  %v3426_v32 = vld [vmem:[%s4954_s2 + $0x18] sm:$0xff]  }
  0xe4   : > { %2685 = vmatprep.subr.bf16.mxu0 %v3426_v32  ;;  %2724 = vmatprep.subr.bf16.mxu1 %v3426_v32 }
  0xe5   : > { %2686 = vmatpush3.bf16.msra.mxu0 %v3426_v32  ;;  %2729 = vmatpush3.bf16.msra.mxu1 %v3426_v32 }
  0xe6   : > { %2731 = vmatprep.subr.msk.bf16.mxu0 %vm2118_vm6, %v3427_v54  ;;  %2732 = vmatprep.subr.msk.bf16.mxu1 %vm2118_vm6, %v3427_v54  ;;  %v3181_v54 = vpack.i.bf16 %v3781_v52, %v3773_v50 }
  0xe7   : > { %2982 = vrot.lane.b32.xlu0 %v5003_v55, %s3476_s15  ;;  %2957 = vrot.lane.b32.xlu1 %v4063_v49, %s3471_s29  ;;  %s2598_s29 = sshll.u32 %s5025_s19, 1 }
  0xe8   : > { %s255_s7 = scalar_lea.vmem %s4957_s5, %s2598_s29 }
  0xe9   : > { %2688 = vmatpush3.bf16.msra.mxu0 %v2120_v48  ;;  %2730 = vmatpush3.bf16.msra.mxu1 %v2120_v48  ;;  %v5014_v48 = vld [vmem:[#allocation12_spill] sm:$0xff] }
  0xeb   : > { %2992 = vrot.lane.b32.xlu0 %v3936_v15, %s3477_s20  ;;  %2967 = vrot.lane.b32.xlu1 %v5003_v55, %s3474_s9 }
  0xef   : > { %3002 = vrot.lane.b32.xlu0 %v5004_v11, %s3474_s9  ;;  %2977 = vrot.lane.b32.xlu1 %v3936_v15, %s3475_s12  ;;  %v5006_v15 = vld [vmem:[#allocation10_spill] sm:$0xff] }
  0xf3   : > { %3012 = vrot.lane.b32.xlu0 %v3982_v53, %s3475_s12  ;;  %2987 = vrot.lane.b32.xlu1 %v5004_v11, %s3476_s15 }
  0xf7   : > { %3022 = vrot.lane.b32.xlu0 %v5005_v22, %s3476_s15  ;;  %2997 = vrot.lane.b32.xlu1 %v3982_v53, %s3477_s20 }
  0xfb   : > { %3032 = vrot.lane.b32.xlu0 %v3971_v19, %s3477_s20  ;;  %3007 = vrot.lane.b32.xlu1 %v5005_v22, %s3474_s9 }
  0xff   : > { %3042 = vrot.lane.b32.xlu0 %v5006_v15, %s3474_s9  ;;  %3017 = vrot.lane.b32.xlu1 %v3971_v19, %s3475_s12  ;;  %v5008_v19 = vld [vmem:[#allocation7_spill] sm:$0xff] }
 0x103   : > { %3052 = vrot.lane.b32.xlu0 %v4007_v13, %s3475_s12  ;;  %3027 = vrot.lane.b32.xlu1 %v5006_v15, %s3476_s15  ;;  %v3211_v15 = vpack.i.bf16 %v3837_v42, %v3823_v33 }
 0x105   : > { %v4121_v53 = vpop.permute.xlu0 %2762 }
 0x107   : > { %3062 = vrot.lane.b32.xlu0 %v5007_v45, %s3473_s6  ;;  %3037 = vrot.lane.b32.xlu1 %v4007_v13, %s3477_s20 }
 0x109   : > { %v4127_v40 = vpop.permute.xlu1 %2767  ;;  %v4129_v31 = vpop.permute.xlu0 %2772 }
 0x10b   : > { %3072 = vrot.lane.b32.xlu0 %v5008_v19, %s3476_s15  ;;  %3047 = vrot.lane.b32.xlu1 %v5008_v19, %s3474_s9 }
 0x10d   : > { %v4135_v20 = vpop.permute.xlu1 %2777  ;;  %v4137_v41 = vpop.permute.xlu0 %2782 }
 0x10f   : > { %3082 = vrot.lane.b32.xlu0 %v3973_v30, %s3477_s20  ;;  %3057 = vrot.lane.b32.xlu1 %v3973_v30, %s3475_s12 }
 0x111   : > { %v4143_v13 = vpop.permute.xlu1 %2787  ;;  %v4145_v47 = vpop.permute.xlu0 %2792 }
 0x113   : > { %3092 = vrot.lane.b32.xlu0 %v3091_v27, %s3472_s30  ;;  %3067 = vrot.lane.b32.xlu1 %v3091_v27, %s3473_s6 }
 0x115   : > { %v4151_v60 = vpop.permute.xlu1 %2797  ;;  %v4153_v14 = vpop.permute.xlu0 %2802 }
 0x117   : > { %3102 = vrot.lane.b32.xlu0 %v5009_v0, %s3474_s9  ;;  %3077 = vrot.lane.b32.xlu1 %v5009_v0, %s3476_s15  ;;  %v3241_v0 = vpack.i.bf16 %v3814_v18, %v3812_v17  ;;  %v3429_v17 = vld [vmem:[#allocation2] sm:$0xff] }
 0x119   : > { %v4159_v30 = vpop.permute.xlu1 %2807  ;;  %v4161_v43 = vpop.permute.xlu0 %2817 }
 0x11b   : > { %3112 = vrot.lane.b32.xlu0 %v4014_v16, %s3475_s12  ;;  %3087 = vrot.lane.b32.xlu1 %v4014_v16, %s3477_s20 }
 0x11d   : > { %v4167_v59 = vpop.permute.xlu0 %2827  ;;  %v4169_v34 = vpop.permute.xlu1 %2812 }
 0x11f   : > { %3122 = vrot.lane.b32.xlu0 %v3121_v1, %s3473_s6  ;;  %3097 = vrot.lane.b32.xlu1 %v3121_v1, %s3472_s30  ;;  %v2755_v1 = vunpack.i.h.bf16 %v4105_v29 }
 0x121   : > { %v4175_v3 = vpop.permute.xlu0 %2837  ;;  %v4177_v4 = vpop.permute.xlu1 %2822 }
 0x123   : > { %3132 = vrot.lane.b32.xlu0 %v5010_v44, %s3476_s15  ;;  %3107 = vrot.lane.b32.xlu1 %v5010_v44, %s3474_s9  ;;  %v2760_v44 = vunpack.i.h.bf16 %v4115_v39 }
 0x125   : > { %v4183_v16 = vpop.permute.xlu0 %2847  ;;  %v4185_v38 = vpop.permute.xlu1 %2832 }
 0x127   : > { %3142 = vrot.lane.b32.xlu0 %v3980_v56, %s3477_s20  ;;  %3117 = vrot.lane.b32.xlu1 %v3980_v56, %s3475_s12 }
 0x129   : > { %v4191_v23 = vpop.permute.xlu0 %2857  ;;  %v4193_v24 = vpop.permute.xlu1 %2842 }
 0x12b   : > { %3152 = vrot.lane.b32.xlu0 %v3151_v37, %s3472_s30  ;;  %3127 = vrot.lane.b32.xlu1 %v3151_v37, %s3473_s6 }
 0x12d   : > { %v4199_v62 = vpop.permute.xlu0 %2867  ;;  %v4201_v55 = vpop.permute.xlu1 %2852 }
 0x12f   : > { %3162 = vrot.lane.b32.xlu0 %v3903_v6, %s3474_s9  ;;  %3137 = vrot.lane.b32.xlu1 %v3903_v6, %s3476_s15 }
 0x131   : > { %v4207_v56 = vpop.permute.xlu0 %2877  ;;  %v4209_v32 = vpop.permute.xlu1 %2862 }
 0x132   : > { %5011 = vst [vmem:[#allocation11_spill] sm:$0xff] %v4207_v56 }
 0x133   : > { %3172 = vrot.lane.b32.xlu0 %v4039_v61, %s3475_s12  ;;  %3147 = vrot.lane.b32.xlu1 %v4039_v61, %s3477_s20 }
 0x135   : > { %v4215_v10 = vpop.permute.xlu0 %2892  ;;  %v4217_v21 = vpop.permute.xlu1 %2872 }
 0x136   : > { %5012 = vst [vmem:[#allocation14_spill] sm:$0xff] %v4217_v21 }
 0x137   : > { %3182 = vrot.lane.b32.xlu0 %v3181_v54, %s3473_s6  ;;  %3157 = vrot.lane.b32.xlu1 %v3181_v54, %s3472_s30 }
 0x139   : > { %v4223_v6 = vpop.permute.xlu0 %2902  ;;  %v4225_v11 = vpop.permute.xlu1 %2882 }
 0x13a   : > { %5013 = vst [vmem:[#allocation15_spill] sm:$0xff] %v4225_v11  ;;  %v2764_v11 = vunpack.i.l.bf16 %v4121_v53 }
 0x13b   : > { %3192 = vrot.lane.b32.xlu0 %v5014_v48, %s3476_s15  ;;  %3167 = vrot.lane.b32.xlu1 %v5014_v48, %s3474_s9 }
 0x13d   : > { %v4231_v61 = vpop.permute.xlu0 %2912  ;;  %v4233_v22 = vpop.permute.xlu1 %2887 }
 0x13f   : > { %3202 = vrot.lane.b32.xlu0 %v3984_v35, %s3477_s20  ;;  %3177 = vrot.lane.b32.xlu1 %v3984_v35, %s3475_s12 }
 0x141   : > { %v4239_v50 = vpop.permute.xlu0 %2922  ;;  %v4241_v52 = vpop.permute.xlu1 %2897 }
 0x143   : > { %3212 = vrot.lane.b32.xlu0 %v3211_v15, %s3472_s30  ;;  %3187 = vrot.lane.b32.xlu1 %v3211_v15, %s3473_s6  ;;  %v2759_v15 = vunpack.i.l.bf16 %v4115_v39 }
 0x145   : > { %v4247_v45 = vpop.permute.xlu0 %2932  ;;  %v4249_v19 = vpop.permute.xlu1 %2907 }
 0x147   : > { %3222 = vrot.lane.b32.xlu0 %v3910_v8, %s3474_s9  ;;  %3197 = vrot.lane.b32.xlu1 %v3910_v8, %s3476_s15  ;;  %v2754_v8 = vunpack.i.l.bf16 %v4105_v29 }
 0x149   : > { %v4255_v35 = vpop.permute.xlu0 %2942  ;;  %v4257_v27 = vpop.permute.xlu1 %2917  ;;  %v1747_v18 = vsel %vm257_vm0, %v3429_v17, %v2754_v8 }
 0x14a   : > { %v1780_v39 = vsel %vm1779_vm7, %v1747_v18, %v2759_v15 }
 0x14b   : > { %3232 = vrot.lane.b32.xlu0 %v4048_v2, %s3475_s12  ;;  %3207 = vrot.lane.b32.xlu1 %v4048_v2, %s3477_s20  ;;  %v3428_v2 = vld [vmem:[#allocation2 + $0x8] sm:$0xff] }
 0x14c   : > { %v1748_v48 = vsel %vm257_vm0, %v3428_v2, %v2755_v1 }
 0x14d   : > { %v4263_v33 = vpop.permute.xlu0 %2952  ;;  %v4265_v42 = vpop.permute.xlu1 %2927  ;;  %v1781_v29 = vsel %vm1779_vm7, %v1748_v48, %v2760_v44  ;;  %v2815_v48 = vunpack.i.h.bf16 %v4169_v34 }
 0x14e   : > { %5015 = vst [vmem:[#allocation5_spill] sm:$0xff] %v4263_v33 }
 0x14f   : > { %3242 = vrot.lane.b32.xlu0 %v3241_v0, %s3473_s6  ;;  %3217 = vrot.lane.b32.xlu1 %v3241_v0, %s3472_s30  ;;  %v2765_v0 = vunpack.i.h.bf16 %v4121_v53  ;;  %v4297_v53 = vpack.i.bf16 %v3835_v25, %v3833_v9 }
 0x151   : > { %v2963_v37 = vpop.permute.xlu0 %2962  ;;  %v4274_v54 = vpop.permute.xlu1 %2937  ;;  %v1814_v44 = vsel %vm1812_vm8, %v1781_v29, %v2765_v0  ;;  %v2794_v0 = vunpack.i.l.bf16 %v4145_v47 }
 0x152   : > { %v2965_v8 = vunpack.i.h.bf16 %v2963_v37  ;;  %v2964_v17 = vunpack.i.l.bf16 %v2963_v37  ;;  %v1813_v37 = vsel %vm1812_vm8, %v1780_v39, %v2764_v11  ;;  %v2795_v11 = vunpack.i.h.bf16 %v4145_v47 }
 0x153   : > { %3252 = vrot.lane.b32.xlu0 %v3894_v63, %s3476_s15  ;;  %3227 = vrot.lane.b32.xlu1 %v3894_v63, %s3474_s9  ;;  %v3271_v63 = vpack.i.bf16 %v3876_v51, %v3874_v28  ;;  %v2820_v39 = vunpack.i.h.bf16 %v4161_v43 }
 0x154   : > { %v1846_v28 = vsel %vm1845_vm9, %v1813_v37, %v2964_v17  ;;  %v2890_v17 = vunpack.i.h.bf16 %v4233_v22 }
 0x155   : > { %v2973_v1 = vpop.permute.xlu0 %2972  ;;  %v4286_v2 = vpop.permute.xlu1 %2947 }
 0x156   : > { %5016 = vst [vmem:[#allocation4_spill] sm:$0xff] %v4286_v2  ;;  %v2975_v33 = vunpack.i.h.bf16 %v2973_v1  ;;  %v2974_v56 = vunpack.i.l.bf16 %v2973_v1  ;;  %v1847_v1 = vsel %vm1845_vm9, %v1814_v44, %v2965_v8  ;;  %v2819_v8 = vunpack.i.l.bf16 %v4161_v43 }
 0x157   : > { %3262 = vrot.lane.b32.xlu0 %v4009_v5, %s3477_s20  ;;  %3237 = vrot.lane.b32.xlu1 %v4009_v5, %s3475_s12  ;;  %v2814_v5 = vunpack.i.l.bf16 %v4169_v34  ;;  %v2889_v34 = vunpack.i.l.bf16 %v4233_v22  ;;  %v2895_v2 = vunpack.i.h.bf16 %v4215_v10 }
 0x158   : > { %v1879_v51 = vsel %vm1878_vm10, %v1846_v28, %v2974_v56  ;;  %v1880_v9 = vsel %vm1878_vm10, %v1847_v1, %v2975_v33  ;;  %v3430_v56 = vld [vmem:[#allocation2 + $0x20] sm:$0xff]  ;;  %v3431_v28 = vld [vmem:[#allocation2 + $0x18] sm:$0xff] }
 0x159   : > { %v2983_v15 = vpop.permute.xlu0 %2982  ;;  %v4302_v18 = vpop.permute.xlu1 %2957  ;;  %v1750_v33 = vsel %vm257_vm0, %v3430_v56, %v2815_v48  ;;  %v1912_v1 = vsel %vm1911_vm11, %v1879_v51, %v2794_v0  ;;  %v1913_v47 = vsel %vm1911_vm11, %v1880_v9, %v2795_v11  ;;  %v2894_v48 = vunpack.i.l.bf16 %v4215_v10 }
 0x15a   : > { %5017 = vst [vmem:[#allocation8_spill] sm:$0xff] %v4302_v18  ;;  %v2985_v25 = vunpack.i.h.bf16 %v2983_v15  ;;  %v2984_v29 = vunpack.i.l.bf16 %v2983_v15  ;;  %v1749_v18 = vsel %vm257_vm0, %v3431_v28, %v2814_v5  ;;  %v1783_v11 = vsel %vm1779_vm7, %v1750_v33, %v2890_v17 }
 0x15b   : > { %3272 = vrot.lane.b32.xlu0 %v3271_v63, %s3472_s30  ;;  %3247 = vrot.lane.b32.xlu1 %v3271_v63, %s3473_s6  ;;  %v1782_v51 = vsel %vm1779_vm7, %v1749_v18, %v2889_v34  ;;  %v2775_v10 = vunpack.i.h.bf16 %v4129_v31  ;;  %v2774_v18 = vunpack.i.l.bf16 %v4129_v31  ;;  %v3432_v34 = vld [vmem:[#allocation2 + $0x38] sm:$0xff] }
 0x15c   : > { %v1945_v43 = vsel %vm1944_vm12, %v1912_v1, %v2984_v29  ;;  %v1946_v22 = vsel %vm1944_vm12, %v1913_v47, %v2985_v25  ;;  %v2769_v29 = vunpack.i.l.bf16 %v4127_v40 }
 0x15d   : > { %v2993_v44 = vpop.permute.xlu0 %2992  ;;  %v2968_v37 = vpop.permute.xlu1 %2967 }
 0x15e   : > { %v2995_v15 = vunpack.i.h.bf16 %v2993_v44  ;;  %v2994_v63 = vunpack.i.l.bf16 %v2993_v44  ;;  %v2970_v0 = vunpack.i.h.bf16 %v2968_v37  ;;  %v2969_v56 = vunpack.i.l.bf16 %v2968_v37 }
 0x15f   : > { %3282 = vrot.lane.b32.xlu0 %v3938_v36, %s3474_s9  ;;  %3257 = vrot.lane.b32.xlu1 %v3938_v36, %s3476_s15  ;;  %v2770_v36 = vunpack.i.h.bf16 %v4127_v40  ;;  %v1815_v37 = vsel %vm1812_vm8, %v1782_v51, %v2769_v29  ;;  %v2800_v51 = vunpack.i.h.bf16 %v4151_v60 }
 0x160   : > { %v1978_v9 = vsel %vm1977_vm13, %v1945_v43, %v2994_v63  ;;  %v1979_v5 = vsel %vm1977_vm13, %v1946_v22, %v2995_v15  ;;  %v1752_v15 = vsel %vm257_vm0, %v3432_v34, %v2820_v39  ;;  %v3433_v63 = vld [vmem:[#allocation2 + $0x30] sm:$0xff]  ;;  %v1848_v31 = vsel %vm1845_vm9, %v1815_v37, %v2969_v56 }
 0x161   : > { %v3003_v44 = vpop.permute.xlu0 %3002  ;;  %v2978_v28 = vpop.permute.xlu1 %2977  ;;  %v2010_v21 = vpack.c.bf16 %v1979_v5, %v1978_v9  ;;  %v1751_v33 = vsel %vm257_vm0, %v3433_v63, %v2819_v8  ;;  %v1785_v40 = vsel %vm1779_vm7, %v1752_v15, %v2895_v2  ;;  %v1816_v47 = vsel %vm1812_vm8, %v1783_v11, %v2770_v36 }
 0x162   : > { %v2980_v25 = vunpack.i.h.bf16 %v2978_v28  ;;  %v2979_v1 = vunpack.i.l.bf16 %v2978_v28  ;;  %v1784_v17 = vsel %vm1779_vm7, %v1751_v33, %v2894_v48  ;;  %v1849_v39 = vsel %vm1845_vm9, %v1816_v47, %v2970_v0 }
 0x163   : > { %3292 = vrot.lane.b32.xlu0 %v4054_v12, %s3475_s12  ;;  %2689 = vmatprep.mubr.msk.bf16.mxu0 %vm2069_vm14, %v2010_v21  ;;  %v3005_v8 = vunpack.i.h.bf16 %v3003_v44  ;;  %v3004_v43 = vunpack.i.l.bf16 %v3003_v44  ;;  %v2799_v11 = vunpack.i.l.bf16 %v4151_v60  ;;  %v2805_v0 = vunpack.i.h.bf16 %v4153_v14 }
 0x164   : > { %3267 = vrot.lane.b32.xlu1 %v4054_v12, %s3477_s20  ;;  %v1881_v21 = vsel %vm1878_vm10, %v1848_v31, %v2979_v1  ;;  %v1882_v48 = vsel %vm1878_vm10, %v1849_v39, %v2980_v25  ;;  %v1817_v56 = vsel %vm1812_vm8, %v1784_v17, %v2774_v18  ;;  %v1818_v44 = vsel %vm1812_vm8, %v1785_v40, %v2775_v10 }
 0x165   : > { %v3013_v22 = vpop.permute.xlu0 %3012  ;;  %v2988_v9 = vpop.permute.xlu1 %2987  ;;  %v1851_v36 = vsel %vm1845_vm9, %v1818_v44, %v3005_v8  ;;  %v1850_v29 = vsel %vm1845_vm9, %v1817_v56, %v3004_v43  ;;  %v1914_v60 = vsel %vm1911_vm11, %v1881_v21, %v2799_v11  ;;  %v1915_v25 = vsel %vm1911_vm11, %v1882_v48, %v2800_v51  ;;  %v4377_v8 = vld [vmem:[#allocation2 + $0x180] sm:$0xff] }
 0x166   : > { %v3015_v2 = vunpack.i.h.bf16 %v3013_v22  ;;  %v3014_v5 = vunpack.i.l.bf16 %v3013_v22  ;;  %v2990_v28 = vunpack.i.h.bf16 %v2988_v9  ;;  %v2989_v12 = vunpack.i.l.bf16 %v2988_v9 }
 0x167   : > { %3302 = vrot.lane.b32.xlu0 %v4297_v53, %s3473_s6  ;;  %v2804_v37 = vunpack.i.l.bf16 %v4153_v14  ;;  %v2825_v47 = vunpack.i.h.bf16 %v4177_v4  ;;  %v2824_v43 = vunpack.i.l.bf16 %v4177_v4  ;;  %v2900_v22 = vunpack.i.h.bf16 %v4241_v52 }
 0x168   : > { %3277 = vrot.lane.b32.xlu1 %v4297_v53, %s3472_s30  ;;  %v1883_v15 = vsel %vm1878_vm10, %v1850_v29, %v3014_v5  ;;  %v1884_v63 = vsel %vm1878_vm10, %v1851_v36, %v3015_v2  ;;  %v1947_v10 = vsel %vm1944_vm12, %v1914_v60, %v2989_v12  ;;  %v1948_v53 = vsel %vm1944_vm12, %v1915_v25, %v2990_v28  ;;  %v4382_v2 = vld [vmem:[#allocation2 + $0x188] sm:$0xff]  ;;  %v3434_v36 = vld [vmem:[#allocation2 + $0x50] sm:$0xff] }
 0x169   : > { %v3023_v1 = vpop.permute.xlu0 %3022  ;;  %v2998_v34 = vpop.permute.xlu1 %2997  ;;  %v2899_v9 = vunpack.i.l.bf16 %v4241_v52  ;;  %v1916_v5 = vsel %vm1911_vm11, %v1883_v15, %v2804_v37  ;;  %v1917_v51 = vsel %vm1911_vm11, %v1884_v63, %v2805_v0  ;;  %v3331_v4 = vpack.i.bf16 %v5000_v58, %v3884_v57  ;;  %v3435_v60 = vld [vmem:[#allocation2 + $0x48] sm:$0xff] }
 0x16a   : > { %v3000_v18 = vunpack.i.h.bf16 %v2998_v34  ;;  %v2999_v33 = vunpack.i.l.bf16 %v2998_v34  ;;  %v3025_v17 = vunpack.i.h.bf16 %v3023_v1  ;;  %v3024_v40 = vunpack.i.l.bf16 %v3023_v1  ;;  %v4406_v34 = vld [vmem:[#allocation2 + $0x190] sm:$0x3] }
 0x16b   : > { %3312 = vrot.lane.b32.xlu0 %v3908_v7, %s3476_s15  ;;  %v1244_v52 = vrot.slane %v4377_v8, 1  ;;  %v4400_v44 = vpack.i.bf16 %v4382_v2, %v4377_v8  ;;  %v1754_v29 = vsel %vm257_vm0, %v3434_v36, %v2825_v47  ;;  %v1753_v25 = vsel %vm257_vm0, %v3435_v60, %v2824_v43  ;;  %v3437_v36 = vld [vmem:[#allocation2 + $0x60] sm:$0xff] }
 0x16c   : > { %v1980_v31 = vsel %vm1977_vm13, %v1947_v10, %v2999_v33  ;;  %v1981_v39 = vsel %vm1977_vm13, %v1948_v53, %v3000_v18  ;;  %3287 = vrot.lane.b32.xlu1 %v3908_v7, %s3474_s9  ;;  %v1949_v7 = vsel %vm1944_vm12, %v1916_v5, %v3024_v40  ;;  %v1950_v12 = vsel %vm1944_vm12, %v1917_v51, %v3025_v17 }
 0x16d   : > { %v2011_v21 = vpack.c.bf16 %v1981_v39, %v1980_v31  ;;  %v3033_v48 = vpop.permute.xlu0 %3032  ;;  %v3008_v14 = vpop.permute.xlu1 %3007  ;;  %v1786_v15 = vsel %vm1779_vm7, %v1753_v25, %v2899_v9  ;;  %v2780_v33 = vunpack.i.h.bf16 %v4135_v20  ;;  %v2779_v10 = vunpack.i.l.bf16 %v4135_v20 }
 0x16e   : > { %v3035_v11 = vunpack.i.h.bf16 %v3033_v48  ;;  %v3034_v28 = vunpack.i.l.bf16 %v3033_v48  ;;  %v3010_v63 = vunpack.i.h.bf16 %v3008_v14  ;;  %v3009_v18 = vunpack.i.l.bf16 %v3008_v14 }
 0x16f   : > { %3322 = vrot.lane.b32.xlu0 %v4050_v46, %s3477_s20  ;;  %2690 = vmatmul.mubr.msk.bf16.vlgmr.msra.gmra.mrb[0].mxu0 %vm2069_vm14, %v2011_v21  ;;  %v1245_v40 = vrot.slane %v4382_v2, 1  ;;  %v1247_v37 = vrot.slane %v4406_v34, 1  ;;  %v1345_v47 = vrot.slane %v4377_v8, 2  ;;  %v1346_v31 = vrot.slane %v4382_v2, 2 }
 0x170   : > { %v1982_v56 = vsel %vm1977_vm13, %v1949_v7, %v3034_v28  ;;  %v1983_v0 = vsel %vm1977_vm13, %v1950_v12, %v3035_v11  ;;  %3297 = vrot.lane.b32.xlu1 %v4050_v46, %s3475_s12  ;;  %v1787_v46 = vsel %vm1779_vm7, %v1754_v29, %v2900_v22  ;;  %v2830_v39 = vunpack.i.h.bf16 %v4167_v59 }
 0x171   : > { %v2012_v57 = vpack.c.bf16 %v1983_v0, %v1982_v56  ;;  %v4404_v58 = vpop.permute.xlu0 %3042  ;;  %v3018_v1 = vpop.permute.xlu1 %3017  ;;  %v2829_v20 = vunpack.i.l.bf16 %v4167_v59  ;;  %v1819_v43 = vsel %vm1812_vm8, %v1786_v15, %v2779_v10  ;;  %v1820_v22 = vsel %vm1812_vm8, %v1787_v46, %v2780_v33  ;;  %v3436_v56 = vld [vmem:[#allocation2 + $0x68] sm:$0xff] }
 0x172   : > { %v3020_v53 = vunpack.i.h.bf16 %v3018_v1  ;;  %v3019_v17 = vunpack.i.l.bf16 %v3018_v1  ;;  %v2905_v48 = vunpack.i.h.bf16 %v4223_v6  ;;  %v2904_v14 = vunpack.i.l.bf16 %v4223_v6 }
 0x173   : > { %3332 = vrot.lane.b32.xlu0 %v3331_v4, %s3472_s30  ;;  %2693 = vmatprep.mubr.msk.bf16.mxu0 %vm2069_vm14, %v2012_v57  ;;  %v1852_v5 = vsel %vm1845_vm9, %v1819_v43, %v3009_v18  ;;  %v1853_v8 = vsel %vm1845_vm9, %v1820_v22, %v3010_v63  ;;  %v2810_v28 = vunpack.i.h.bf16 %v4159_v30  ;;  %v2809_v7 = vunpack.i.l.bf16 %v4159_v30 }
 0x174   : > { %3307 = vrot.lane.b32.xlu1 %v3331_v4, %s3473_s6  ;;  %v1885_v2 = vsel %vm1878_vm10, %v1852_v5, %v3019_v17  ;;  %v1886_v51 = vsel %vm1878_vm10, %v1853_v8, %v3020_v53  ;;  %v1246_v6 = vsel %vm791_vm3, %v1244_v52, %v1245_v40  ;;  %v1348_v12 = vrot.slane %v4406_v34, 2  ;;  %v4466_v5 = vld [vmem:[#allocation2 + $0x1a0] sm:$0xff] }
 0x175   : > { %v4423_v9 = vpop.permute.xlu0 %3052  ;;  %v3028_v21 = vpop.permute.xlu1 %3027  ;;  %v2785_v4 = vunpack.i.h.bf16 %v4137_v41  ;;  %v1756_v0 = vsel %vm257_vm0, %v3436_v56, %v2830_v39  ;;  %v1755_v29 = vsel %vm257_vm0, %v3437_v36, %v2829_v20  ;;  %v1248_v57 = vsel %vm791_vm3, %v1245_v40, %v1247_v37 }
 0x176   : > { %v3030_v59 = vunpack.i.h.bf16 %v3028_v21  ;;  %v3029_v11 = vunpack.i.l.bf16 %v3028_v21  ;;  %v1918_v30 = vsel %vm1911_vm11, %v1885_v2, %v2809_v7  ;;  %v1788_v34 = vsel %vm1779_vm7, %v1755_v29, %v2904_v14  ;;  %v4464_v14 = vld [vmem:[#allocation2 + $0x198] sm:$0xff]  ;;  %v742_v29 = vld [vmem:[#allocation2 + $0x1a8] sm:$0x3] }
 0x177   : > { %3342 = vrot.lane.b32.xlu0 %v3950_v26, %s3474_s9  ;;  %v1789_v15 = vsel %vm1779_vm7, %v1756_v0, %v2905_v48  ;;  %v3045_v18 = vunpack.i.h.bf16 %v4404_v58  ;;  %v3044_v33 = vunpack.i.l.bf16 %v4404_v58  ;;  %v2784_v17 = vunpack.i.l.bf16 %v4137_v41 }
 0x178   : > { %3317 = vrot.lane.b32.xlu1 %v3950_v26, %s3476_s15  ;;  %v1919_v26 = vsel %vm1911_vm11, %v1886_v51, %v2810_v28  ;;  %v1951_v46 = vsel %vm1944_vm12, %v1918_v30, %v3029_v11  ;;  %v3055_v40 = vunpack.i.h.bf16 %v4423_v9  ;;  %v3054_v37 = vunpack.i.l.bf16 %v4423_v9 }
 0x179   : > { %v3063_v60 = vpop.permute.xlu0 %3062  ;;  %v3038_v25 = vpop.permute.xlu1 %3037  ;;  %v1952_v63 = vsel %vm1944_vm12, %v1919_v26, %v3030_v59  ;;  %v1347_v58 = vsel %vm968_vm4, %v1345_v47, %v1346_v31  ;;  %v1349_v48 = vsel %vm968_vm4, %v1346_v31, %v1348_v12  ;;  %v1822_v41 = vsel %vm1812_vm8, %v1789_v15, %v2785_v4 }
 0x17a   : > { %v3040_v1 = vunpack.i.h.bf16 %v3038_v25  ;;  %v3039_v52 = vunpack.i.l.bf16 %v3038_v25  ;;  %v3065_v22 = vunpack.i.h.bf16 %v3063_v60  ;;  %v3064_v21 = vunpack.i.l.bf16 %v3063_v60 }
 0x17b   : > { %3352 = vrot.lane.b32.xlu0 %v4063_v49, %s3475_s12  ;;  %v1855_v2 = vsel %vm1845_vm9, %v1822_v41, %v3045_v18  ;;  %v3371_v31 = vpack.i.bf16 %v1248_v57, %v1246_v6  ;;  %v1546_v7 = vrot.slane %v4466_v5, 1  ;;  %v1545_v12 = vrot.slane %v4464_v14, 1 }
 0x17c   : > { %v1984_v10 = vsel %vm1977_vm13, %v1951_v46, %v3039_v52  ;;  %v1985_v53 = vsel %vm1977_vm13, %v1952_v63, %v3040_v1  ;;  %3327 = vrot.lane.b32.xlu1 %v4063_v49, %s3477_s20  ;;  %v1821_v49 = vsel %vm1812_vm8, %v1788_v34, %v2784_v17  ;;  %v1888_v59 = vsel %vm1878_vm10, %v1855_v2, %v3055_v40  ;;  %v3438_v17 = vld [vmem:[#allocation2 + $0x80] sm:$0xff] }
 0x17d   : > { %v2013_v39 = vpack.c.bf16 %v1985_v53, %v1984_v10  ;;  %v3073_v20 = vpop.permute.xlu0 %3072  ;;  %v4460_v43 = vpop.permute.xlu1 %3047  ;;  %v1854_v47 = vsel %vm1845_vm9, %v1821_v49, %v3044_v33  ;;  %v1921_v56 = vsel %vm1911_vm11, %v1888_v59, %v3065_v22  ;;  %v2834_v6 = vunpack.i.l.bf16 %v4185_v38 }
 0x17e   : > { %v3075_v8 = vunpack.i.h.bf16 %v3073_v20  ;;  %v3074_v9 = vunpack.i.l.bf16 %v3073_v20  ;;  %v1887_v51 = vsel %vm1878_vm10, %v1854_v47, %v3054_v37  ;;  %v2910_v57 = vunpack.i.h.bf16 %v4249_v19  ;;  %v3439_v37 = vld [vmem:[#allocation2 + $0x78] sm:$0xff] }
 0x17f   : > { %3362 = vrot.lane.b32.xlu0 %v4400_v44, %s3473_s6  ;;  %2694 = vmatmul.mubr.msk.bf16.gmra.mrb[4].mxu0 %vm2069_vm14, %v2013_v39  ;;  %v1920_v4 = vsel %vm1911_vm11, %v1887_v51, %v3064_v21  ;;  %v2909_v30 = vunpack.i.l.bf16 %v4249_v19  ;;  %v3381_v15 = vpack.i.bf16 %v1349_v48, %v1347_v58  ;;  %v1548_v46 = vrot.slane %v742_v29, 1 }
 0x180   : > { %3337 = vrot.lane.b32.xlu1 %v4400_v44, %s3472_s30  ;;  %v2835_v44 = vunpack.i.h.bf16 %v4185_v38  ;;  %v1953_v60 = vsel %vm1944_vm12, %v1920_v4, %v3074_v9  ;;  %v1954_v25 = vsel %vm1944_vm12, %v1921_v56, %v3075_v8  ;;  %v1647_v63 = vrot.slane %v4466_v5, 2 }
 0x181   : > { %v3083_v11 = vpop.permute.xlu0 %3082  ;;  %v3058_v28 = vpop.permute.xlu1 %3057  ;;  %v3366_v18 = vpack.i.bf16 %v4466_v5, %v4464_v14  ;;  %v1646_v33 = vrot.slane %v4464_v14, 2  ;;  %v1547_v19 = vsel %vm791_vm3, %v1545_v12, %v1546_v7  ;;  %v2790_v10 = vunpack.i.h.bf16 %v4143_v13 }
 0x182   : > { %v3085_v0 = vunpack.i.h.bf16 %v3083_v11  ;;  %v3084_v36 = vunpack.i.l.bf16 %v3083_v11  ;;  %v2789_v53 = vunpack.i.l.bf16 %v4143_v13  ;;  %v1758_v40 = vsel %vm257_vm0, %v3438_v17, %v2835_v44  ;;  %v3440_v17 = vld [vmem:[#allocation2 + $0x98] sm:$0xff] }
 0x183   : > { %3372 = vrot.lane.b32.xlu0 %v3371_v31, %s3476_s15  ;;  %v1757_v39 = vsel %vm257_vm0, %v3439_v37, %v2834_v6  ;;  %v1791_v22 = vsel %vm1779_vm7, %v1758_v40, %v2910_v57  ;;  %v3050_v21 = vunpack.i.h.bf16 %v4460_v43  ;;  %v3049_v58 = vunpack.i.l.bf16 %v4460_v43  ;;  %v3441_v40 = vld [vmem:[#allocation2 + $0x90] sm:$0xff] }
 0x184   : > { %v1986_v26 = vsel %vm1977_vm13, %v1953_v60, %v3084_v36  ;;  %v1987_v1 = vsel %vm1977_vm13, %v1954_v25, %v3085_v0  ;;  %3347 = vrot.lane.b32.xlu1 %v3371_v31, %s3474_s9  ;;  %v1790_v20 = vsel %vm1779_vm7, %v1757_v39, %v2909_v30  ;;  %v3060_v13 = vunpack.i.h.bf16 %v3058_v28 }
 0x185   : > { %v2014_v52 = vpack.c.bf16 %v1987_v1, %v1986_v26  ;;  %v4493_v34 = vpop.permute.xlu0 %3092  ;;  %v3068_v38 = vpop.permute.xlu1 %3067  ;;  %v3059_v48 = vunpack.i.l.bf16 %v3058_v28  ;;  %v1549_v49 = vsel %vm791_vm3, %v1546_v7, %v1548_v46  ;;  %v1649_v41 = vrot.slane %v742_v29, 2 }
 0x186   : > { %v3070_v8 = vunpack.i.h.bf16 %v3068_v38  ;;  %v3069_v9 = vunpack.i.l.bf16 %v3068_v38  ;;  %v1823_v2 = vsel %vm1812_vm8, %v1790_v20, %v2789_v53  ;;  %v1824_v47 = vsel %vm1812_vm8, %v1791_v22, %v2790_v10 }
 0x187   : > { %3382 = vrot.lane.b32.xlu0 %v3381_v15, %s3477_s20  ;;  %2697 = vmatprep.mubr.msk.bf16.mxu0 %vm2069_vm14, %v2014_v52  ;;  %v1856_v59 = vsel %vm1845_vm9, %v1823_v2, %v3049_v58  ;;  %v1857_v43 = vsel %vm1845_vm9, %v1824_v47, %v3050_v21  ;;  %v3376_v11 = vpack.i.bf16 %v1549_v49, %v1547_v19  ;;  %v2840_v1 = vunpack.i.h.bf16 %v4175_v3 }
 0x188   : > { %3357 = vrot.lane.b32.xlu1 %v3381_v15, %s3475_s12  ;;  %v1889_v28 = vsel %vm1878_vm10, %v1856_v59, %v3059_v48  ;;  %v1890_v7 = vsel %vm1878_vm10, %v1857_v43, %v3060_v13  ;;  %v1648_v56 = vsel %vm968_vm4, %v1646_v33, %v1647_v63  ;;  %v1650_v0 = vsel %vm968_vm4, %v1647_v63, %v1649_v41 }
 0x189   : > { %v3103_v14 = vpop.permute.xlu0 %3102  ;;  %v3078_v5 = vpop.permute.xlu1 %3077  ;;  %v1922_v36 = vsel %vm1911_vm11, %v1889_v28, %v3069_v9  ;;  %v1923_v29 = vsel %vm1911_vm11, %v1890_v7, %v3070_v8  ;;  %v3386_v26 = vpack.i.bf16 %v1650_v0, %v1648_v56  ;;  %v2839_v52 = vunpack.i.l.bf16 %v4175_v3 }
 0x18a   : > { %v3080_v31 = vunpack.i.h.bf16 %v3078_v5  ;;  %v3079_v51 = vunpack.i.l.bf16 %v3078_v5  ;;  %v2915_v63 = vunpack.i.h.bf16 %v4231_v61  ;;  %v3095_v33 = vunpack.i.h.bf16 %v4493_v34 }
 0x18b   : > { %v3094_v19 = vunpack.i.l.bf16 %v4493_v34  ;;  %v3105_v10 = vunpack.i.h.bf16 %v3103_v14  ;;  %v3104_v53 = vunpack.i.l.bf16 %v3103_v14  ;;  %v1760_v3 = vsel %vm257_vm0, %v3440_v17, %v2840_v1  ;;  %v3442_v1 = vld [vmem:[#allocation2 + $0xb0] sm:$0xff] }
 0x18c   : > { %3367 = vrot.lane.b32.xlu1 %v3366_v18, %s3473_s6  ;;  %v1955_v60 = vsel %vm1944_vm12, %v1922_v36, %v3079_v51  ;;  %v1956_v25 = vsel %vm1944_vm12, %v1923_v29, %v3080_v31  ;;  %v2914_v18 = vunpack.i.l.bf16 %v4231_v61  ;;  %v1759_v37 = vsel %vm257_vm0, %v3441_v40, %v2839_v52 }
 0x18d   : > { %v3113_v12 = vpop.permute.xlu0 %3112  ;;  %v3088_v4 = vpop.permute.xlu1 %3087  ;;  %v1793_v34 = vsel %vm1779_vm7, %v1760_v3, %v2915_v63  ;;  %v2845_v56 = vunpack.i.h.bf16 %v4193_v24  ;;  %v2844_v0 = vunpack.i.l.bf16 %v4193_v24  ;;  %v3443_v24 = vld [vmem:[#allocation2 + $0xa8] sm:$0xff] }
 0x18e   : > { %v3090_v44 = vunpack.i.h.bf16 %v3088_v4  ;;  %v3089_v6 = vunpack.i.l.bf16 %v3088_v4  ;;  %v3115_v39 = vunpack.i.h.bf16 %v3113_v12  ;;  %v3114_v20 = vunpack.i.l.bf16 %v3113_v12 }
 0x18f   : > { %v1792_v21 = vsel %vm1779_vm7, %v1759_v37, %v2914_v18  ;;  %v1826_v48 = vsel %vm1812_vm8, %v1793_v34, %v3095_v33  ;;  %v1762_v52 = vsel %vm257_vm0, %v3442_v1, %v2845_v56 }
 0x190   : > { %v1988_v57 = vsel %vm1977_vm13, %v1955_v60, %v3089_v6  ;;  %v1989_v30 = vsel %vm1977_vm13, %v1956_v25, %v3090_v44  ;;  %3377 = vrot.lane.b32.xlu1 %v3376_v11, %s3476_s15  ;;  %v1825_v14 = vsel %vm1812_vm8, %v1792_v21, %v3094_v19  ;;  %v1859_v8 = vsel %vm1845_vm9, %v1826_v48, %v3105_v10 }
 0x191   : > { %v2015_v38 = vpack.c.bf16 %v1989_v30, %v1988_v57  ;;  %v3123_v15 = vpop.permute.xlu0 %3122  ;;  %v4530_v46 = vpop.permute.xlu1 %3097  ;;  %v1858_v41 = vsel %vm1845_vm9, %v1825_v14, %v3104_v53  ;;  %v1892_v2 = vsel %vm1878_vm10, %v1859_v8, %v3115_v39  ;;  %v2920_v6 = vunpack.i.h.bf16 %v4257_v27 }
 0x192   : > { %v3125_v58 = vunpack.i.h.bf16 %v3123_v15  ;;  %v3124_v13 = vunpack.i.l.bf16 %v3123_v15  ;;  %v1891_v9 = vsel %vm1878_vm10, %v1858_v41, %v3114_v20  ;;  %v2919_v60 = vunpack.i.l.bf16 %v4257_v27 }
 0x193   : > { %2698 = vmatmul.mubr.msk.bf16.gmra.mrb[8].mxu0 %vm2069_vm14, %v2015_v38  ;;  %v3100_v25 = vunpack.i.h.bf16 %v4530_v46  ;;  %v3099_v57 = vunpack.i.l.bf16 %v4530_v46  ;;  %v1761_v38 = vsel %vm257_vm0, %v3443_v24, %v2844_v0  ;;  %v1795_v19 = vsel %vm1779_vm7, %v1762_v52, %v2920_v6 }
 0x194   : > { %3387 = vrot.lane.b32.xlu1 %v3386_v26, %s3477_s20  ;;  %v1924_v51 = vsel %vm1911_vm11, %v1891_v9, %v3124_v13  ;;  %v1925_v59 = vsel %vm1911_vm11, %v1892_v2, %v3125_v58  ;;  %v1794_v27 = vsel %vm1779_vm7, %v1761_v38, %v2919_v60  ;;  %v2850_v8 = vunpack.i.h.bf16 %v4183_v16 }
 0x195   : > { %v3133_v22 = vpop.permute.xlu0 %3132  ;;  %v3108_v61 = vpop.permute.xlu1 %3107  ;;  %v1827_v53 = vsel %vm1812_vm8, %v1794_v27, %v3099_v57  ;;  %v1828_v17 = vsel %vm1812_vm8, %v1795_v19, %v3100_v25  ;;  %v2849_v9 = vunpack.i.l.bf16 %v4183_v16  ;;  %v3445_v16 = vld [vmem:[#allocation2 + $0xc0] sm:$0xff] }
 0x196   : > { %v3135_v5 = vunpack.i.h.bf16 %v3133_v22  ;;  %v3134_v49 = vunpack.i.l.bf16 %v3133_v22  ;;  %v3110_v30 = vunpack.i.h.bf16 %v3108_v61  ;;  %v3109_v26 = vunpack.i.l.bf16 %v3108_v61 }
 0x197   : > { %v1763_v56 = vsel %vm257_vm0, %v3445_v16, %v2849_v9 }
 0x198   : > { %v1957_v28 = vsel %vm1944_vm12, %v1924_v51, %v3134_v49  ;;  %v1958_v7 = vsel %vm1944_vm12, %v1925_v59, %v3135_v5  ;;  %v1860_v37 = vsel %vm1845_vm9, %v1827_v53, %v3109_v26  ;;  %v1861_v39 = vsel %vm1845_vm9, %v1828_v17, %v3110_v30 }
 0x199   : > { %v3143_v47 = vpop.permute.xlu0 %3142  ;;  %v3118_v31 = vpop.permute.xlu1 %3117  ;;  %v2925_v51 = vunpack.i.h.bf16 %v4239_v50  ;;  %v2924_v59 = vunpack.i.l.bf16 %v4239_v50 }
 0x19a   : > { %v3145_v43 = vunpack.i.h.bf16 %v3143_v47  ;;  %v3144_v11 = vunpack.i.l.bf16 %v3143_v47  ;;  %v3120_v15 = vunpack.i.h.bf16 %v3118_v31  ;;  %v3119_v63 = vunpack.i.l.bf16 %v3118_v31 }
 0x19b   : > { %v1796_v50 = vsel %vm1779_vm7, %v1763_v56, %v2924_v59 }
 0x19c   : > { %v1990_v12 = vsel %vm1977_vm13, %v1957_v28, %v3144_v11  ;;  %v1991_v4 = vsel %vm1977_vm13, %v1958_v7, %v3145_v43  ;;  %v1893_v20 = vsel %vm1878_vm10, %v1860_v37, %v3119_v63  ;;  %v1894_v22 = vsel %vm1878_vm10, %v1861_v39, %v3120_v15 }
 0x19d   : > { %v2016_v36 = vpack.c.bf16 %v1991_v4, %v1990_v12  ;;  %v4556_v29 = vpop.permute.xlu0 %3152  ;;  %v3128_v44 = vpop.permute.xlu1 %3127  ;;  %v3444_v12 = vld [vmem:[#allocation2 + $0xc8] sm:$0xff]  ;;  %v2854_v37 = vunpack.i.l.bf16 %v4201_v55 }
 0x19e   : > { %v3130_v10 = vunpack.i.h.bf16 %v3128_v44  ;;  %v3129_v46 = vunpack.i.l.bf16 %v3128_v44  ;;  %v3155_v43 = vunpack.i.h.bf16 %v4556_v29  ;;  %v3154_v11 = vunpack.i.l.bf16 %v4556_v29 }
 0x19f   : > { %2701 = vmatprep.mubr.msk.bf16.mxu0 %vm2069_vm14, %v2016_v36  ;;  %v1764_v4 = vsel %vm257_vm0, %v3444_v12, %v2850_v8 }
 0x1a0   : > { %v1926_v34 = vsel %vm1911_vm11, %v1893_v20, %v3129_v46  ;;  %v1927_v58 = vsel %vm1911_vm11, %v1894_v22, %v3130_v10  ;;  %v1797_v60 = vsel %vm1779_vm7, %v1764_v4, %v2925_v51  ;;  %v1829_v30 = vsel %vm1812_vm8, %v1796_v50, %v3154_v11 }
 0x1a1   : > { %v3163_v18 = vpop.permute.xlu0 %3162  ;;  %v3138_v33 = vpop.permute.xlu1 %3137  ;;  %v1830_v57 = vsel %vm1812_vm8, %v1797_v60, %v3155_v43 }
 0x1a2   : > { %v3140_v3 = vunpack.i.h.bf16 %v3138_v33  ;;  %v3139_v40 = vunpack.i.l.bf16 %v3138_v33  ;;  %v3165_v28 = vunpack.i.h.bf16 %v3163_v18  ;;  %v3164_v7 = vunpack.i.l.bf16 %v3163_v18 }
 0x1a4   : > { %v1959_v14 = vsel %vm1944_vm12, %v1926_v34, %v3139_v40  ;;  %v1960_v5 = vsel %vm1944_vm12, %v1927_v58, %v3140_v3  ;;  %v1862_v52 = vsel %vm1845_vm9, %v1829_v30, %v3164_v7  ;;  %v1863_v24 = vsel %vm1845_vm9, %v1830_v57, %v3165_v28 }
 0x1a5   : > { %v3173_v61 = vpop.permute.xlu0 %3172  ;;  %v3148_v21 = vpop.permute.xlu1 %3147  ;;  %v2855_v40 = vunpack.i.h.bf16 %v4201_v55  ;;  %v3447_v55 = vld [vmem:[#allocation2 + $0xd8] sm:$0xff]  ;;  %v2860_v30 = vunpack.i.h.bf16 %v4191_v23 }
 0x1a6   : > { %v3150_v13 = vunpack.i.h.bf16 %v3148_v21  ;;  %v3149_v48 = vunpack.i.l.bf16 %v3148_v21  ;;  %v3175_v0 = vunpack.i.h.bf16 %v3173_v61  ;;  %v3174_v36 = vunpack.i.l.bf16 %v3173_v61 }
 0x1a7   : > { %v2930_v61 = vunpack.i.h.bf16 %v4265_v42  ;;  %v2929_v21 = vunpack.i.l.bf16 %v4265_v42 }
 0x1a8   : > { %v1992_v49 = vsel %vm1977_vm13, %v1959_v14, %v3149_v48  ;;  %v1993_v41 = vsel %vm1977_vm13, %v1960_v5, %v3150_v13  ;;  %v1895_v38 = vsel %vm1878_vm10, %v1862_v52, %v3174_v36  ;;  %v1896_v15 = vsel %vm1878_vm10, %v1863_v24, %v3175_v0  ;;  %v3446_v14 = vld [vmem:[#allocation2 + $0xe0] sm:$0xff] }
 0x1a9   : > { %v2017_v2 = vpack.c.bf16 %v1993_v41, %v1992_v49  ;;  %v3183_v47 = vpop.permute.xlu0 %3182  ;;  %v4581_v31 = vpop.permute.xlu1 %3157  ;;  %v1766_v5 = vsel %vm257_vm0, %v3446_v14, %v2855_v40  ;;  %v1765_v49 = vsel %vm257_vm0, %v3447_v55, %v2854_v37 }
 0x1aa   : > { %v3185_v25 = vunpack.i.h.bf16 %v3183_v47  ;;  %v3184_v29 = vunpack.i.l.bf16 %v3183_v47  ;;  %v3160_v34 = vunpack.i.h.bf16 %v4581_v31  ;;  %v3159_v58 = vunpack.i.l.bf16 %v4581_v31 }
 0x1ab   : > { %2702 = vmatmul.mubr.msk.bf16.gmra.mrb[12].mxu0 %vm2069_vm14, %v2017_v2  ;;  %v1798_v42 = vsel %vm1779_vm7, %v1765_v49, %v2929_v21  ;;  %v1799_v47 = vsel %vm1779_vm7, %v1766_v5, %v2930_v61 }
 0x1ac   : > { %v1928_v33 = vsel %vm1911_vm11, %v1895_v38, %v3184_v29  ;;  %v1929_v27 = vsel %vm1911_vm11, %v1896_v15, %v3185_v25  ;;  %v1831_v59 = vsel %vm1812_vm8, %v1798_v42, %v3159_v58  ;;  %v1832_v43 = vsel %vm1812_vm8, %v1799_v47, %v3160_v34 }
 0x1ad   : > { %v3193_v44 = vpop.permute.xlu0 %3192  ;;  %v3168_v6 = vpop.permute.xlu1 %3167  ;;  %v2935_v38 = vunpack.i.h.bf16 %v4247_v45  ;;  %v2934_v15 = vunpack.i.l.bf16 %v4247_v45 }
 0x1ae   : > { %v3195_v26 = vunpack.i.h.bf16 %v3193_v44  ;;  %v3194_v1 = vunpack.i.l.bf16 %v3193_v44  ;;  %v3170_v13 = vunpack.i.h.bf16 %v3168_v6  ;;  %v3169_v48 = vunpack.i.l.bf16 %v3168_v6 }
 0x1b0   : > { %v1961_v46 = vsel %vm1944_vm12, %v1928_v33, %v3194_v1  ;;  %v1962_v53 = vsel %vm1944_vm12, %v1929_v27, %v3195_v26  ;;  %v1864_v7 = vsel %vm1845_vm9, %v1831_v59, %v3169_v48  ;;  %v1865_v12 = vsel %vm1845_vm9, %v1832_v43, %v3170_v13 }
 0x1b1   : > { %v3203_v63 = vpop.permute.xlu0 %3202  ;;  %v3178_v18 = vpop.permute.xlu1 %3177  ;;  %v2859_v26 = vunpack.i.l.bf16 %v4191_v23  ;;  %v3449_v23 = vld [vmem:[#allocation2 + $0xf0] sm:$0xff] }
 0x1b2   : > { %v3205_v19 = vunpack.i.h.bf16 %v3203_v63  ;;  %v3204_v10 = vunpack.i.l.bf16 %v3203_v63  ;;  %v3180_v41 = vunpack.i.h.bf16 %v3178_v18  ;;  %v3179_v8 = vunpack.i.l.bf16 %v3178_v18 }
 0x1b4   : > { %v1994_v17 = vsel %vm1977_vm13, %v1961_v46, %v3204_v10  ;;  %v1995_v3 = vsel %vm1977_vm13, %v1962_v53, %v3205_v19  ;;  %v1897_v4 = vsel %vm1878_vm10, %v1864_v7, %v3179_v8  ;;  %v1898_v16 = vsel %vm1878_vm10, %v1865_v12, %v3180_v41  ;;  %v3448_v19 = vld [vmem:[#allocation2 + $0xf8] sm:$0xff] }
 0x1b5   : > { %v4606_v39 = vpop.permute.xlu0 %3212  ;;  %v3188_v20 = vpop.permute.xlu1 %3187  ;;  %v2018_v22 = vpack.c.bf16 %v1995_v3, %v1994_v17  ;;  %v1768_v10 = vsel %vm257_vm0, %v3448_v19, %v2860_v30  ;;  %v1767_v46 = vsel %vm257_vm0, %v3449_v23, %v2859_v26  ;;  %v2940_v7 = vunpack.i.h.bf16 %v4274_v54 }
 0x1b6   : > { %v3190_v51 = vunpack.i.h.bf16 %v3188_v20  ;;  %v3189_v31 = vunpack.i.l.bf16 %v3188_v20  ;;  %v3215_v63 = vunpack.i.h.bf16 %v4606_v39  ;;  %v3214_v18 = vunpack.i.l.bf16 %v4606_v39 }
 0x1b7   : > { %2705 = vmatprep.mubr.msk.bf16.mxu1 %vm2069_vm14, %v2018_v22  ;;  %v1800_v45 = vsel %vm1779_vm7, %v1767_v46, %v2934_v15  ;;  %v1801_v37 = vsel %vm1779_vm7, %v1768_v10, %v2935_v38  ;;  %v2939_v12 = vunpack.i.l.bf16 %v4274_v54 }
 0x1b8   : > { %v1930_v36 = vsel %vm1911_vm11, %v1897_v4, %v3189_v31  ;;  %v1931_v44 = vsel %vm1911_vm11, %v1898_v16, %v3190_v51  ;;  %v1834_v22 = vsel %vm1812_vm8, %v1801_v37, %v3215_v63  ;;  %v1833_v61 = vsel %vm1812_vm8, %v1800_v45, %v3214_v18 }
 0x1b9   : > { %v3223_v9 = vpop.permute.xlu0 %3222  ;;  %v3198_v2 = vpop.permute.xlu1 %3197  ;;  %v2869_v45 = vunpack.i.l.bf16 %v4199_v62 }
 0x1ba   : > { %v3200_v11 = vunpack.i.h.bf16 %v3198_v2  ;;  %v3199_v28 = vunpack.i.l.bf16 %v3198_v2  ;;  %v3225_v33 = vunpack.i.h.bf16 %v3223_v9  ;;  %v3224_v27 = vunpack.i.l.bf16 %v3223_v9 }
 0x1bc   : > { %v1963_v60 = vsel %vm1944_vm12, %v1930_v36, %v3199_v28  ;;  %v1964_v25 = vsel %vm1944_vm12, %v1931_v44, %v3200_v11  ;;  %v1866_v58 = vsel %vm1845_vm9, %v1833_v61, %v3224_v27  ;;  %v1867_v13 = vsel %vm1845_vm9, %v1834_v22, %v3225_v33 }
 0x1bd   : > { %v3233_v56 = vpop.permute.xlu0 %3232  ;;  %v3208_v0 = vpop.permute.xlu1 %3207  ;;  %v2865_v11 = vunpack.i.h.bf16 %v4209_v32  ;;  %v2864_v28 = vunpack.i.l.bf16 %v4209_v32  ;;  %v2945_v22 = vunpack.i.h.bf16 %v4255_v35  ;;  %v2944_v61 = vunpack.i.l.bf16 %v4255_v35 }
 0x1be   : > { %v3210_v6 = vunpack.i.h.bf16 %v3208_v0  ;;  %v3209_v50 = vunpack.i.l.bf16 %v3208_v0  ;;  %v3235_v53 = vunpack.i.h.bf16 %v3233_v56  ;;  %v3234_v17 = vunpack.i.l.bf16 %v3233_v56 }
 0x1c0   : > { %v1996_v29 = vsel %vm1977_vm13, %v1963_v60, %v3209_v50  ;;  %v1997_v57 = vsel %vm1977_vm13, %v1964_v25, %v3210_v6  ;;  %v1899_v48 = vsel %vm1878_vm10, %v1866_v58, %v3234_v17  ;;  %v1900_v14 = vsel %vm1878_vm10, %v1867_v13, %v3235_v53  ;;  %v3450_v6 = vld [vmem:[#allocation2 + $0x110] sm:$0xff]  ;;  %v3451_v60 = vld [vmem:[#allocation2 + $0x108] sm:$0xff] }
 0x1c1   : > { %v2019_v1 = vpack.c.bf16 %v1997_v57, %v1996_v29  ;;  %v3243_v52 = vpop.permute.xlu0 %3242  ;;  %v4631_v24 = vpop.permute.xlu1 %3217  ;;  %v1770_v50 = vsel %vm257_vm0, %v3450_v6, %v2865_v11  ;;  %v1769_v32 = vsel %vm257_vm0, %v3451_v60, %v2864_v28 }
 0x1c2   : > { %v3245_v20 = vunpack.i.h.bf16 %v3243_v52  ;;  %v3244_v39 = vunpack.i.l.bf16 %v3243_v52  ;;  %v3220_v4 = vunpack.i.h.bf16 %v4631_v24  ;;  %v3219_v16 = vunpack.i.l.bf16 %v4631_v24 }
 0x1c3   : > { %2706 = vmatmul.mubr.msk.bf16.vlgmr.msra.gmra.mrb[0].mxu1 %vm2069_vm14, %v2019_v1  ;;  %v1802_v54 = vsel %vm1779_vm7, %v1769_v32, %v2939_v12  ;;  %v1803_v57 = vsel %vm1779_vm7, %v1770_v50, %v2940_v7 }
 0x1c4   : > { %v1932_v49 = vsel %vm1911_vm11, %v1899_v48, %v3244_v39  ;;  %v1933_v41 = vsel %vm1911_vm11, %v1900_v14, %v3245_v20  ;;  %v1835_v1 = vsel %vm1812_vm8, %v1802_v54, %v3219_v16  ;;  %v1836_v52 = vsel %vm1812_vm8, %v1803_v57, %v3220_v4  ;;  %v5018_v57 = vld [vmem:[#allocation14_spill] sm:$0xff] }
 0x1c5   : > { %v3253_v3 = vpop.permute.xlu0 %3252  ;;  %v3228_v40 = vpop.permute.xlu1 %3227 }
 0x1c6   : > { %v3255_v21 = vunpack.i.h.bf16 %v3253_v3  ;;  %v3254_v34 = vunpack.i.l.bf16 %v3253_v3  ;;  %v3230_v56 = vunpack.i.h.bf16 %v3228_v40  ;;  %v3229_v0 = vunpack.i.l.bf16 %v3228_v40 }
 0x1c7   : > { %v2870_v40 = vunpack.i.h.bf16 %v4199_v62  ;;  %v3452_v62 = vld [vmem:[#allocation2 + $0x128] sm:$0xff] }
 0x1c8   : > { %v1965_v2 = vsel %vm1944_vm12, %v1932_v49, %v3254_v34  ;;  %v1966_v42 = vsel %vm1944_vm12, %v1933_v41, %v3255_v21  ;;  %v1868_v15 = vsel %vm1845_vm9, %v1835_v1, %v3229_v0  ;;  %v1869_v63 = vsel %vm1845_vm9, %v1836_v52, %v3230_v56  ;;  %v5019_v52 = vld [vmem:[#allocation4_spill] sm:$0xff] }
 0x1c9   : > { %v3263_v5 = vpop.permute.xlu0 %3262  ;;  %v3238_v55 = vpop.permute.xlu1 %3237 }
 0x1ca   : > { %v3265_v8 = vunpack.i.h.bf16 %v3263_v5  ;;  %v3264_v9 = vunpack.i.l.bf16 %v3263_v5  ;;  %v3240_v25 = vunpack.i.h.bf16 %v3238_v55  ;;  %v3239_v29 = vunpack.i.l.bf16 %v3238_v55  ;;  %v3453_v55 = vld [vmem:[#allocation2 + $0x120] sm:$0xff] }
 0x1cb   : > { %v1772_v5 = vsel %vm257_vm0, %v3452_v62, %v2870_v40  ;;  %v1771_v49 = vsel %vm257_vm0, %v3453_v55, %v2869_v45 }
 0x1cc   : > { %v1998_v47 = vsel %vm1977_vm13, %v1965_v2, %v3264_v9  ;;  %v1999_v51 = vsel %vm1977_vm13, %v1966_v42, %v3265_v8  ;;  %v1901_v33 = vsel %vm1878_vm10, %v1868_v15, %v3239_v29  ;;  %v1902_v27 = vsel %vm1878_vm10, %v1869_v63, %v3240_v25 }
 0x1cd   : > { %v2020_v31 = vpack.c.bf16 %v1999_v51, %v1998_v47  ;;  %v4654_v59 = vpop.permute.xlu0 %3272  ;;  %v3248_v43 = vpop.permute.xlu1 %3247  ;;  %v1804_v9 = vsel %vm1779_vm7, %v1771_v49, %v2944_v61  ;;  %v1805_v2 = vsel %vm1779_vm7, %v1772_v5, %v2945_v22 }
 0x1ce   : > { %v3250_v30 = vunpack.i.h.bf16 %v3248_v43  ;;  %v3249_v26 = vunpack.i.l.bf16 %v3248_v43  ;;  %v3275_v58 = vunpack.i.h.bf16 %v4654_v59  ;;  %v3274_v13 = vunpack.i.l.bf16 %v4654_v59 }
 0x1cf   : > { %2709 = vmatprep.mubr.msk.bf16.mxu1 %vm2069_vm14, %v2020_v31 }
 0x1d0   : > { %v1934_v10 = vsel %vm1911_vm11, %v1901_v33, %v3249_v26  ;;  %v1935_v23 = vsel %vm1911_vm11, %v1902_v27, %v3250_v30  ;;  %v1838_v31 = vsel %vm1812_vm8, %v1805_v2, %v3275_v58  ;;  %v1837_v59 = vsel %vm1812_vm8, %v1804_v9, %v3274_v13  ;;  %v5020_v9 = vld [vmem:[#allocation11_spill] sm:$0xff] }
 0x1d1   : > { %v3283_v36 = vpop.permute.xlu0 %3282  ;;  %v3258_v44 = vpop.permute.xlu1 %3257  ;;  %v2875_v30 = vunpack.i.h.bf16 %v5018_v57  ;;  %v2874_v26 = vunpack.i.l.bf16 %v5018_v57  ;;  %v2880_v2 = vunpack.i.h.bf16 %v5020_v9 }
 0x1d2   : > { %v3260_v24 = vunpack.i.h.bf16 %v3258_v44  ;;  %v3259_v38 = vunpack.i.l.bf16 %v3258_v44  ;;  %v3285_v48 = vunpack.i.h.bf16 %v3283_v36  ;;  %v3284_v14 = vunpack.i.l.bf16 %v3283_v36 }
 0x1d4   : > { %v1967_v17 = vsel %vm1944_vm12, %v1934_v10, %v3259_v38  ;;  %v1968_v3 = vsel %vm1944_vm12, %v1935_v23, %v3260_v24  ;;  %v1870_v28 = vsel %vm1845_vm9, %v1837_v59, %v3284_v14  ;;  %v1871_v7 = vsel %vm1845_vm9, %v1838_v31, %v3285_v48  ;;  %v3455_v23 = vld [vmem:[#allocation2 + $0x138] sm:$0xff]  ;;  %v5021_v59 = vld [vmem:[#allocation5_spill] sm:$0xff] }
 0x1d5   : > { %v3293_v18 = vpop.permute.xlu0 %3292  ;;  %v2950_v24 = vunpack.i.h.bf16 %v5019_v52  ;;  %v2949_v38 = vunpack.i.l.bf16 %v5019_v52 }
 0x1d6   : > { %v3268_v19 = vpop.permute.xlu1 %3267  ;;  %v3295_v41 = vunpack.i.h.bf16 %v3293_v18  ;;  %v3294_v8 = vunpack.i.l.bf16 %v3293_v18 }
 0x1d7   : > { %v3270_v46 = vunpack.i.h.bf16 %v3268_v19  ;;  %v3269_v53 = vunpack.i.l.bf16 %v3268_v19  ;;  %v3454_v19 = vld [vmem:[#allocation2 + $0x140] sm:$0xff] }
 0x1d8   : > { %v1903_v12 = vsel %vm1878_vm10, %v1870_v28, %v3294_v8  ;;  %v1904_v4 = vsel %vm1878_vm10, %v1871_v7, %v3295_v41  ;;  %v1774_v10 = vsel %vm257_vm0, %v3454_v19, %v2875_v30 }
 0x1d9   : > { %v2000_v37 = vsel %vm1977_vm13, %v1967_v17, %v3269_v53  ;;  %v2001_v20 = vsel %vm1977_vm13, %v1968_v3, %v3270_v46  ;;  %v3303_v39 = vpop.permute.xlu0 %3302  ;;  %v1773_v46 = vsel %vm257_vm0, %v3455_v23, %v2874_v26  ;;  %v1807_v45 = vsel %vm1779_vm7, %v1774_v10, %v2950_v24 }
 0x1da   : > { %v2021_v21 = vpack.c.bf16 %v2001_v20, %v2000_v37  ;;  %v4683_v34 = vpop.permute.xlu1 %3277  ;;  %v3305_v42 = vunpack.i.h.bf16 %v3303_v39  ;;  %v3304_v47 = vunpack.i.l.bf16 %v3303_v39  ;;  %v1806_v40 = vsel %vm1779_vm7, %v1773_v46, %v2949_v38 }
 0x1db   : > { %v3280_v15 = vunpack.i.h.bf16 %v4683_v34  ;;  %v3279_v63 = vunpack.i.l.bf16 %v4683_v34 }
 0x1dc   : > { %2710 = vmatmul.mubr.msk.bf16.gmra.mrb[4].mxu1 %vm2069_vm14, %v2021_v21  ;;  %v1936_v56 = vsel %vm1911_vm11, %v1903_v12, %v3304_v47  ;;  %v1937_v0 = vsel %vm1911_vm11, %v1904_v4, %v3305_v42  ;;  %v2879_v42 = vunpack.i.l.bf16 %v5020_v9 }
 0x1dd   : > { %v3313_v35 = vpop.permute.xlu0 %3312  ;;  %v1839_v39 = vsel %vm1812_vm8, %v1806_v40, %v3279_v63  ;;  %v1840_v22 = vsel %vm1812_vm8, %v1807_v45, %v3280_v15 }
 0x1de   : > { %v3288_v51 = vpop.permute.xlu1 %3287  ;;  %v3315_v43 = vunpack.i.h.bf16 %v3313_v35  ;;  %v3314_v11 = vunpack.i.l.bf16 %v3313_v35 }
 0x1df   : > { %v3290_v18 = vunpack.i.h.bf16 %v3288_v51  ;;  %v3289_v33 = vunpack.i.l.bf16 %v3288_v51 }
 0x1e0   : > { %v1969_v50 = vsel %vm1944_vm12, %v1936_v56, %v3314_v11  ;;  %v1970_v60 = vsel %vm1944_vm12, %v1937_v0, %v3315_v43  ;;  %v2955_v43 = vunpack.i.h.bf16 %v5021_v59  ;;  %v2954_v11 = vunpack.i.l.bf16 %v5021_v59  ;;  %v3456_v0 = vld [vmem:[#allocation2 + $0x158] sm:$0xff] }
 0x1e1   : > { %v3323_v16 = vpop.permute.xlu0 %3322  ;;  %v1872_v34 = vsel %vm1845_vm9, %v1839_v39, %v3289_v33  ;;  %v1873_v58 = vsel %vm1845_vm9, %v1840_v22, %v3290_v18 }
 0x1e2   : > { %v3325_v36 = vunpack.i.h.bf16 %v3323_v16  ;;  %v3324_v44 = vunpack.i.l.bf16 %v3323_v16  ;;  %v3298_v6 = vpop.permute.xlu1 %3297 }
 0x1e3   : > { %v3300_v53 = vunpack.i.h.bf16 %v3298_v6  ;;  %v3299_v17 = vunpack.i.l.bf16 %v3298_v6 }
 0x1e4   : > { %v2002_v32 = vsel %vm1977_vm13, %v1969_v50, %v3324_v44  ;;  %v2003_v25 = vsel %vm1977_vm13, %v1970_v60, %v3325_v36  ;;  %v1776_v36 = vsel %vm257_vm0, %v3456_v0, %v2880_v2  ;;  %v3457_v44 = vld [vmem:[#allocation2 + $0x150] sm:$0xff] }
 0x1e5   : > { %v2022_v29 = vpack.c.bf16 %v2003_v25, %v2002_v32  ;;  %v4704_v54 = vpop.permute.xlu0 %3332  ;;  %v1905_v48 = vsel %vm1878_vm10, %v1872_v34, %v3299_v17  ;;  %v1906_v14 = vsel %vm1878_vm10, %v1873_v58, %v3300_v53  ;;  %v1775_v6 = vsel %vm257_vm0, %v3457_v44, %v2879_v42 }
 0x1e6   : > { %v3308_v1 = vpop.permute.xlu1 %3307  ;;  %v3335_v12 = vunpack.i.h.bf16 %v4704_v54  ;;  %v3334_v4 = vunpack.i.l.bf16 %v4704_v54  ;;  %v1808_v25 = vsel %vm1779_vm7, %v1775_v6, %v2954_v11 }
 0x1e7   : > { %2713 = vmatprep.mubr.msk.bf16.mxu1 %vm2069_vm14, %v2022_v29  ;;  %v3310_v37 = vunpack.i.h.bf16 %v3308_v1  ;;  %v3309_v20 = vunpack.i.l.bf16 %v3308_v1  ;;  %v1809_v29 = vsel %vm1779_vm7, %v1776_v36, %v2955_v43 }
 0x1e8   : > { %v1842_v26 = vsel %vm1812_vm8, %v1809_v29, %v3335_v12  ;;  %v1841_v1 = vsel %vm1812_vm8, %v1808_v25, %v3334_v4  ;;  %v4778_v25 = vld [vmem:[%s4955_s3] ss:$0 sm:$0xff] }
 0x1e9   : > { %v3343_v27 = vpop.permute.xlu0 %3342  ;;  %v1938_v5 = vsel %vm1911_vm11, %v1905_v48, %v3309_v20  ;;  %v1939_v55 = vsel %vm1911_vm11, %v1906_v14, %v3310_v37  ;;  %v5022_v37 = vld [vmem:[#allocation15_spill] sm:$0xff] }
 0x1ea   : > { %v3318_v3 = vpop.permute.xlu1 %3317  ;;  %v3345_v16 = vunpack.i.h.bf16 %v3343_v27  ;;  %v3344_v56 = vunpack.i.l.bf16 %v3343_v27  ;;  %v2885_v20 = vunpack.i.h.bf16 %v5022_v37  ;;  %v2884_v39 = vunpack.i.l.bf16 %v5022_v37 }
 0x1eb   : > { %v3320_v61 = vunpack.i.h.bf16 %v3318_v3  ;;  %v3319_v21 = vunpack.i.l.bf16 %v3318_v3 }
 0x1ec   : > { %v1874_v38 = vsel %vm1845_vm9, %v1841_v1, %v3344_v56  ;;  %v1875_v15 = vsel %vm1845_vm9, %v1842_v26, %v3345_v16 }
 0x1ed   : > { %v3353_v13 = vpop.permute.xlu0 %3352  ;;  %v1971_v8 = vsel %vm1944_vm12, %v1938_v5, %v3319_v21  ;;  %v1972_v35 = vsel %vm1944_vm12, %v1939_v55, %v3320_v61  ;;  %v5023_v61 = vld [vmem:[#allocation8_spill] sm:$0xff]  ;;  %v3459_v55 = vld [vmem:[#allocation2 + $0x168] sm:$0xff] }
 0x1ee   : > { %v3328_v62 = vpop.permute.xlu1 %3327  ;;  %v3355_v50 = vunpack.i.h.bf16 %v3353_v13  ;;  %v3354_v60 = vunpack.i.l.bf16 %v3353_v13  ;;  %v2960_v21 = vunpack.i.h.bf16 %v5023_v61  ;;  %v2959_v34 = vunpack.i.l.bf16 %v5023_v61 }
 0x1ef   : > { %v3330_v49 = vunpack.i.h.bf16 %v3328_v62  ;;  %v3329_v41 = vunpack.i.l.bf16 %v3328_v62  ;;  %v3458_v62 = vld [vmem:[#allocation2 + $0x170] sm:$0xff] }
 0x1f0   : > { %v1907_v63 = vsel %vm1878_vm10, %v1874_v38, %v3354_v60  ;;  %v1908_v18 = vsel %vm1878_vm10, %v1875_v15, %v3355_v50  ;;  %v1778_v5 = vsel %vm257_vm0, %v3458_v62, %v2885_v20 }
 0x1f1   : > { %v2004_v47 = vsel %vm1977_vm13, %v1971_v8, %v3329_v41  ;;  %v2005_v51 = vsel %vm1977_vm13, %v1972_v35, %v3330_v49  ;;  %v3363_v31 = vpop.permute.xlu0 %3362  ;;  %v1777_v49 = vsel %vm257_vm0, %v3459_v55, %v2884_v39  ;;  %v1811_v2 = vsel %vm1779_vm7, %v1778_v5, %v2960_v21 }
 0x1f2   : > { %v2023_v28 = vpack.c.bf16 %v2005_v51, %v2004_v47  ;;  %v3338_v7 = vpop.permute.xlu1 %3337  ;;  %v3365_v57 = vunpack.i.h.bf16 %v3363_v31  ;;  %v3364_v30 = vunpack.i.l.bf16 %v3363_v31  ;;  %v1810_v9 = vsel %vm1779_vm7, %v1777_v49, %v2959_v34 }
 0x1f3   : > { %v3340_v58 = vunpack.i.h.bf16 %v3338_v7  ;;  %v3339_v13 = vunpack.i.l.bf16 %v3338_v7  ;;  %vm2487_vm0 = vcmask 25600  }
 0x1f4   : > { %2714 = vmatmul.mubr.msk.bf16.gmra.mrb[8].mxu1 %vm2069_vm14, %v2023_v28  ;;  %v1940_v27 = vsel %vm1911_vm11, %v1907_v63, %v3364_v30  ;;  %v1941_v19 = vsel %vm1911_vm11, %v1908_v18, %v3365_v57 }
 0x1f5   : > { %v3373_v32 = vpop.permute.xlu0 %3372  ;;  %v1843_v51 = vsel %vm1812_vm8, %v1810_v9, %v3339_v13  ;;  %v1844_v31 = vsel %vm1812_vm8, %v1811_v2, %v3340_v58 }
 0x1f6   : > { %v3348_v54 = vpop.permute.xlu1 %3347  ;;  %v3375_v52 = vunpack.i.h.bf16 %v3373_v32  ;;  %v3374_v24 = vunpack.i.l.bf16 %v3373_v32 }
 0x1f7   : > { %v3350_v48 = vunpack.i.h.bf16 %v3348_v54  ;;  %v3349_v14 = vunpack.i.l.bf16 %v3348_v54 }
 0x1f8   : > { %v1973_v53 = vsel %vm1944_vm12, %v1940_v27, %v3374_v24  ;;  %v1974_v17 = vsel %vm1944_vm12, %v1941_v19, %v3375_v52 }
 0x1f9   : > { %v3383_v33 = vpop.permute.xlu0 %3382  ;;  %v1876_v11 = vsel %vm1845_vm9, %v1843_v51, %v3349_v14  ;;  %v1877_v28 = vsel %vm1845_vm9, %v1844_v31, %v3350_v48 }
 0x1fa   : > { %v3385_v10 = vunpack.i.h.bf16 %v3383_v33  ;;  %v3384_v23 = vunpack.i.l.bf16 %v3383_v33  ;;  %v3358_v46 = vpop.permute.xlu1 %3357 }
 0x1fb   : > { %v3360_v41 = vunpack.i.h.bf16 %v3358_v46  ;;  %v3359_v8 = vunpack.i.l.bf16 %v3358_v46 }
 0x1fc   : > { %v2006_v3 = vsel %vm1977_vm13, %v1973_v53, %v3384_v23  ;;  %v2007_v40 = vsel %vm1977_vm13, %v1974_v17, %v3385_v10 }
 0x1fd   : > { %v2024_v45 = vpack.c.bf16 %v2007_v40, %v2006_v3  ;;  %v1909_v7 = vsel %vm1878_vm10, %v1876_v11, %v3359_v8  ;;  %v1910_v12 = vsel %vm1878_vm10, %v1877_v28, %v3360_v41 }
 0x1fe   : > { %v3368_v22 = vpop.permute.xlu1 %3367 }
 0x1ff   : > { %2717 = vmatprep.mubr.msk.bf16.mxu1 %vm2069_vm14, %v2024_v45  ;;  %v3370_v42 = vunpack.i.h.bf16 %v3368_v22  ;;  %v3369_v47 = vunpack.i.l.bf16 %v3368_v22 }
 0x201   : > { %v1942_v16 = vsel %vm1911_vm11, %v1909_v7, %v3369_v47  ;;  %v1943_v56 = vsel %vm1911_vm11, %v1910_v12, %v3370_v42 }
 0x202   : > { %v3378_v35 = vpop.permute.xlu1 %3377 }
 0x203   : > { %v3380_v59 = vunpack.i.h.bf16 %v3378_v35  ;;  %v3379_v43 = vunpack.i.l.bf16 %v3378_v35 }
 0x205   : > { %v1975_v44 = vsel %vm1944_vm12, %v1942_v16, %v3379_v43  ;;  %v1976_v6 = vsel %vm1944_vm12, %v1943_v56, %v3380_v59 }
 0x206   : > { %v3388_v4 = vpop.permute.xlu1 %3387 }
 0x207   : > { %v3390_v0 = vunpack.i.h.bf16 %v3388_v4  ;;  %v3389_v36 = vunpack.i.l.bf16 %v3388_v4 }
 0x209   : > { %v2008_v50 = vsel %vm1977_vm13, %v1975_v44, %v3389_v36  ;;  %v2009_v60 = vsel %vm1977_vm13, %v1976_v6, %v3390_v0 }
 0x20a   : > { %v2025_v32 = vpack.c.bf16 %v2009_v60, %v2008_v50 }
 0x20c   : > { %2718 = vmatmul.mubr.msk.bf16.gmra.mrb[12].mxu1 %vm2069_vm14, %v2025_v32 }
 0x242   : > { %v2691_v29 = vpop.f32.mrb[0].mxu0 }
 0x243   : > { %v2165_v57 = vadd.f32 %v2691_v29, %v4778_v25  ;;  %v2156_v30 = vpop.f32.mrb[1].mxu0 }
 0x244   : > { %v2157_v54 = vadd.f32 %v4778_v25, %v2156_v30  ;;  %v2692_v26 = vpop.f32.mrb[2].mxu0 }
 0x245   : > { %2285 = vst.msk [vmem:[%s4783_s28 + $0x10] sm:$0xff] %vm559_vm5, %v2165_v57  ;;  %v2168_v1 = vadd.f32 %v2692_v26, %v4778_v25  ;;  %v2159_v52 = vpop.f32.mrb[3].mxu0  ;;  %v2386_v15 = vmul.f32 %v2165_v57, %v2165_v57  ;;  %v2318_v19 = vsel %vm559_vm5, %v2165_v57, 0.0 }
 0x246   : > { %2283 = vst.msk [vmem:[%s4783_s28] sm:$0xff] %vm559_vm5, %v2157_v54  ;;  %v2384_v24 = vmul.f32 %v2157_v54, %v2157_v54  ;;  %v2160_v38 = vadd.f32 %v4778_v25, %v2159_v52  ;;  %v2315_v63 = vsel %vm559_vm5, %v2157_v54, 0.0 }
 0x247   : > { %2286 = vst.msk [vmem:[%s4783_s28 + $0x18] sm:$0xff] %vm559_vm5, %v2168_v1  ;;  %v2387_v23 = vmul.f32 %v2168_v1, %v2168_v1  ;;  %v2419_v3 = vsel %vm559_vm5, %v2386_v15, 0.0  ;;  %v2320_v40 = vsel %vm559_vm5, %v2168_v1, 0.0 }
 0x248   : > { %2284 = vst.msk [vmem:[%s4783_s28 + $0x8] sm:$0xff] %vm559_vm5, %v2160_v38  ;;  %v2316_v18 = vsel %vm559_vm5, %v2160_v38, 0.0  ;;  %v2385_v33 = vmul.f32 %v2160_v38, %v2160_v38  ;;  %v2416_v10 = vsel %vm559_vm5, %v2384_v24, 0.0 }
 0x249   : > { %v2317_v27 = vadd.f32 %v2316_v18, %v2315_v63  ;;  %v2421_v20 = vsel %vm559_vm5, %v2387_v23, 0.0 }
 0x24a   : > { %v2417_v46 = vsel %vm559_vm5, %v2385_v33, 0.0 }
 0x24b   : > { %v2319_v53 = vadd.f32 %v2318_v19, %v2317_v27  ;;  %v2418_v17 = vadd.f32 %v2417_v46, %v2416_v10 }
 0x24d   : > { %v2420_v45 = vadd.f32 %v2419_v3, %v2418_v17  ;;  %v2321_v37 = vadd.f32 %v2320_v40, %v2319_v53 }
 0x24f   : > { %v2422_v39 = vadd.f32 %v2421_v20, %v2420_v45 }
 0x252   : > { %v2695_v22 = vpop.f32.mrb[4].mxu0 }
 0x253   : > { %v2181_v61 = vadd.f32 %v2695_v22, %v4778_v25  ;;  %v2172_v21 = vpop.f32.mrb[5].mxu0 }
 0x254   : > { %v2173_v34 = vadd.f32 %v4778_v25, %v2172_v21  ;;  %v2696_v58 = vpop.f32.mrb[6].mxu0 }
 0x255   : > { %2289 = vst.msk [vmem:[%s4783_s28 + $0x30] sm:$0xff] %vm559_vm5, %v2181_v61  ;;  %v2184_v13 = vadd.f32 %v2696_v58, %v4778_v25  ;;  %v2175_v48 = vpop.f32.mrb[7].mxu0  ;;  %v2390_v49 = vmul.f32 %v2181_v61, %v2181_v61  ;;  %v2326_v42 = vsel %vm559_vm5, %v2181_v61, 0.0 }
 0x256   : > { %2287 = vst.msk [vmem:[%s4783_s28 + $0x20] sm:$0xff] %vm559_vm5, %v2173_v34  ;;  %v2322_v14 = vsel %vm559_vm5, %v2173_v34, 0.0  ;;  %v2388_v62 = vmul.f32 %v2173_v34, %v2173_v34  ;;  %v2176_v5 = vadd.f32 %v4778_v25, %v2175_v48 }
 0x257   : > { %v2323_v55 = vadd.f32 %v2322_v14, %v2321_v37  ;;  %2290 = vst.msk [vmem:[%s4783_s28 + $0x38] sm:$0xff] %vm559_vm5, %v2184_v13  ;;  %v2391_v47 = vmul.f32 %v2184_v13, %v2184_v13  ;;  %v2427_v43 = vsel %vm559_vm5, %v2390_v49, 0.0  ;;  %v2328_v11 = vsel %vm559_vm5, %v2184_v13, 0.0 }
 0x258   : > { %v2423_v41 = vsel %vm559_vm5, %v2388_v62, 0.0  ;;  %2288 = vst.msk [vmem:[%s4783_s28 + $0x28] sm:$0xff] %vm559_vm5, %v2176_v5  ;;  %v2324_v8 = vsel %vm559_vm5, %v2176_v5, 0.0  ;;  %v2389_v35 = vmul.f32 %v2176_v5, %v2176_v5 }
 0x259   : > { %v2424_v9 = vadd.f32 %v2423_v41, %v2422_v39  ;;  %v2325_v2 = vadd.f32 %v2324_v8, %v2323_v55  ;;  %v2429_v12 = vsel %vm559_vm5, %v2391_v47, 0.0 }
 0x25a   : > { %v2425_v51 = vsel %vm559_vm5, %v2389_v35, 0.0 }
 0x25b   : > { %v2327_v31 = vadd.f32 %v2326_v42, %v2325_v2  ;;  %v2426_v59 = vadd.f32 %v2425_v51, %v2424_v9 }
 0x25d   : > { %v2428_v28 = vadd.f32 %v2427_v43, %v2426_v59  ;;  %v2329_v7 = vadd.f32 %v2328_v11, %v2327_v31 }
 0x25f   : > { %v2430_v4 = vadd.f32 %v2429_v12, %v2428_v28 }
 0x266   : > { %v2699_v16 = vpop.f32.mrb[8].mxu0 }
 0x267   : > { %v2197_v56 = vadd.f32 %v2699_v16, %v4778_v25  ;;  %v2188_v0 = vpop.f32.mrb[9].mxu0 }
 0x268   : > { %v2189_v36 = vadd.f32 %v4778_v25, %v2188_v0  ;;  %v2700_v44 = vpop.f32.mrb[10].mxu0 }
 0x269   : > { %2293 = vst.msk [vmem:[%s4783_s28 + $0x50] sm:$0xff] %vm559_vm5, %v2197_v56  ;;  %v2200_v6 = vadd.f32 %v2700_v44, %v4778_v25  ;;  %v2191_v50 = vpop.f32.mrb[11].mxu0  ;;  %v2394_v30 = vmul.f32 %v2197_v56, %v2197_v56  ;;  %v2334_v38 = vsel %vm559_vm5, %v2197_v56, 0.0 }
 0x26a   : > { %2291 = vst.msk [vmem:[%s4783_s28 + $0x40] sm:$0xff] %vm559_vm5, %v2189_v36  ;;  %v2330_v60 = vsel %vm559_vm5, %v2189_v36, 0.0  ;;  %v2392_v32 = vmul.f32 %v2189_v36, %v2189_v36  ;;  %v2192_v29 = vadd.f32 %v4778_v25, %v2191_v50 }
 0x26b   : > { %v2331_v57 = vadd.f32 %v2330_v60, %v2329_v7  ;;  %2294 = vst.msk [vmem:[%s4783_s28 + $0x58] sm:$0xff] %vm559_vm5, %v2200_v6  ;;  %v2395_v15 = vmul.f32 %v2200_v6, %v2200_v6  ;;  %v2435_v27 = vsel %vm559_vm5, %v2394_v30, 0.0  ;;  %v2336_v19 = vsel %vm559_vm5, %v2200_v6, 0.0 }
 0x26c   : > { %v2431_v54 = vsel %vm559_vm5, %v2392_v32, 0.0  ;;  %2292 = vst.msk [vmem:[%s4783_s28 + $0x48] sm:$0xff] %vm559_vm5, %v2192_v29  ;;  %v2332_v26 = vsel %vm559_vm5, %v2192_v29, 0.0  ;;  %v2393_v1 = vmul.f32 %v2192_v29, %v2192_v29 }
 0x26d   : > { %v2432_v52 = vadd.f32 %v2431_v54, %v2430_v4  ;;  %v2333_v24 = vadd.f32 %v2332_v26, %v2331_v57  ;;  %v2437_v46 = vsel %vm559_vm5, %v2395_v15, 0.0 }
 0x26e   : > { %v2433_v63 = vsel %vm559_vm5, %v2393_v1, 0.0 }
 0x26f   : > { %v2335_v18 = vadd.f32 %v2334_v38, %v2333_v24  ;;  %v2434_v33 = vadd.f32 %v2433_v63, %v2432_v52 }
 0x271   : > { %v2436_v10 = vadd.f32 %v2435_v27, %v2434_v33  ;;  %v2337_v23 = vadd.f32 %v2336_v19, %v2335_v18 }
 0x273   : > { %v2438_v53 = vadd.f32 %v2437_v46, %v2436_v10 }
 0x27e   : > { %v2703_v17 = vpop.f32.mrb[12].mxu0 }
 0x27f   : > { %v2213_v3 = vadd.f32 %v2703_v17, %v4778_v25  ;;  %v2204_v40 = vpop.f32.mrb[13].mxu0 }
 0x280   : > { %v2205_v45 = vadd.f32 %v4778_v25, %v2204_v40  ;;  %v2704_v37 = vpop.f32.mrb[14].mxu0 }
 0x281   : > { %2297 = vst.msk [vmem:[%s4783_s28 + $0x70] sm:$0xff] %vm559_vm5, %v2213_v3  ;;  %v2216_v20 = vadd.f32 %v2704_v37, %v4778_v25  ;;  %v2207_v39 = vpop.f32.mrb[15].mxu0  ;;  %v2398_v58 = vmul.f32 %v2213_v3, %v2213_v3  ;;  %v2342_v55 = vsel %vm559_vm5, %v2213_v3, 0.0 }
 0x282   : > { %2295 = vst.msk [vmem:[%s4783_s28 + $0x60] sm:$0xff] %vm559_vm5, %v2205_v45  ;;  %v2338_v22 = vsel %vm559_vm5, %v2205_v45, 0.0  ;;  %v2396_v61 = vmul.f32 %v2205_v45, %v2205_v45  ;;  %v2208_v21 = vadd.f32 %v4778_v25, %v2207_v39 }
 0x283   : > { %v2339_v34 = vadd.f32 %v2338_v22, %v2337_v23  ;;  %2298 = vst.msk [vmem:[%s4783_s28 + $0x78] sm:$0xff] %vm559_vm5, %v2216_v20  ;;  %v2399_v49 = vmul.f32 %v2216_v20, %v2216_v20  ;;  %v2443_v9 = vsel %vm559_vm5, %v2398_v58, 0.0  ;;  %v2344_v2 = vsel %vm559_vm5, %v2216_v20, 0.0 }
 0x284   : > { %v2439_v13 = vsel %vm559_vm5, %v2396_v61, 0.0  ;;  %2296 = vst.msk [vmem:[%s4783_s28 + $0x68] sm:$0xff] %vm559_vm5, %v2208_v21  ;;  %v2340_v48 = vsel %vm559_vm5, %v2208_v21, 0.0  ;;  %v2397_v14 = vmul.f32 %v2208_v21, %v2208_v21 }
 0x285   : > { %v2440_v62 = vadd.f32 %v2439_v13, %v2438_v53  ;;  %v2341_v5 = vadd.f32 %v2340_v48, %v2339_v34  ;;  %v2445_v51 = vsel %vm559_vm5, %v2399_v49, 0.0 }
 0x286   : > { %v2441_v41 = vsel %vm559_vm5, %v2397_v14, 0.0 }
 0x287   : > { %v2343_v8 = vadd.f32 %v2342_v55, %v2341_v5  ;;  %v2442_v35 = vadd.f32 %v2441_v41, %v2440_v62 }
 0x289   : > { %v2444_v42 = vadd.f32 %v2443_v9, %v2442_v35  ;;  %v2345_v47 = vadd.f32 %v2344_v2, %v2343_v8 }
 0x28b   : > { %v2446_v31 = vadd.f32 %v2445_v51, %v2444_v42 }
 0x296   : > { %v2707_v59 = vpop.f32.mrb[0].mxu1 }
 0x297   : > { %v2229_v43 = vadd.f32 %v2707_v59, %v4778_v25  ;;  %v2220_v11 = vpop.f32.mrb[1].mxu1 }
 0x298   : > { %v2221_v28 = vadd.f32 %v4778_v25, %v2220_v11  ;;  %v2708_v7 = vpop.f32.mrb[2].mxu1 }
 0x299   : > { %2301 = vst.msk [vmem:[%s4783_s28 + $0x90] sm:$0xff] %vm559_vm5, %v2229_v43  ;;  %v2232_v12 = vadd.f32 %v2708_v7, %v4778_v25  ;;  %v2223_v4 = vpop.f32.mrb[3].mxu1  ;;  %v2402_v44 = vmul.f32 %v2229_v43, %v2229_v43  ;;  %v2350_v57 = vsel %vm559_vm5, %v2229_v43, 0.0 }
 0x29a   : > { %2299 = vst.msk [vmem:[%s4783_s28 + $0x80] sm:$0xff] %vm559_vm5, %v2221_v28  ;;  %v2346_v16 = vsel %vm559_vm5, %v2221_v28, 0.0  ;;  %v2400_v56 = vmul.f32 %v2221_v28, %v2221_v28  ;;  %v2224_v0 = vadd.f32 %v4778_v25, %v2223_v4 }
 0x29b   : > { %v2347_v36 = vadd.f32 %v2346_v16, %v2345_v47  ;;  %2302 = vst.msk [vmem:[%s4783_s28 + $0x98] sm:$0xff] %vm559_vm5, %v2232_v12  ;;  %v2403_v30 = vmul.f32 %v2232_v12, %v2232_v12  ;;  %v2451_v52 = vsel %vm559_vm5, %v2402_v44, 0.0  ;;  %v2352_v24 = vsel %vm559_vm5, %v2232_v12, 0.0 }
 0x29c   : > { %v2447_v6 = vsel %vm559_vm5, %v2400_v56, 0.0  ;;  %2300 = vst.msk [vmem:[%s4783_s28 + $0x88] sm:$0xff] %vm559_vm5, %v2224_v0  ;;  %v2348_v50 = vsel %vm559_vm5, %v2224_v0, 0.0  ;;  %v2401_v60 = vmul.f32 %v2224_v0, %v2224_v0 }
 0x29d   : > { %v2448_v32 = vadd.f32 %v2447_v6, %v2446_v31  ;;  %v2349_v29 = vadd.f32 %v2348_v50, %v2347_v36  ;;  %v2453_v63 = vsel %vm559_vm5, %v2403_v30, 0.0 }
 0x29e   : > { %v2449_v54 = vsel %vm559_vm5, %v2401_v60, 0.0 }
 0x29f   : > { %v2351_v26 = vadd.f32 %v2350_v57, %v2349_v29  ;;  %v2450_v1 = vadd.f32 %v2449_v54, %v2448_v32 }
 0x2a1   : > { %v2452_v38 = vadd.f32 %v2451_v52, %v2450_v1  ;;  %v2353_v15 = vadd.f32 %v2352_v24, %v2351_v26 }
 0x2a3   : > { %v2454_v18 = vadd.f32 %v2453_v63, %v2452_v38 }
 0x2af   : > { %v2711_v33 = vpop.f32.mrb[4].mxu1 }
 0x2b0   : > { %v2245_v27 = vadd.f32 %v2711_v33, %v4778_v25  ;;  %v2236_v19 = vpop.f32.mrb[5].mxu1 }
 0x2b1   : > { %v2237_v10 = vadd.f32 %v4778_v25, %v2236_v19  ;;  %v2712_v23 = vpop.f32.mrb[6].mxu1 }
 0x2b2   : > { %2305 = vst.msk [vmem:[%s4783_s28 + $0xb0] sm:$0xff] %vm559_vm5, %v2245_v27  ;;  %v2248_v46 = vadd.f32 %v2712_v23, %v4778_v25  ;;  %v2239_v53 = vpop.f32.mrb[7].mxu1  ;;  %v2406_v37 = vmul.f32 %v2245_v27, %v2245_v27  ;;  %v2358_v34 = vsel %vm559_vm5, %v2245_v27, 0.0 }
 0x2b3   : > { %2303 = vst.msk [vmem:[%s4783_s28 + $0xa0] sm:$0xff] %vm559_vm5, %v2237_v10  ;;  %v2354_v17 = vsel %vm559_vm5, %v2237_v10, 0.0  ;;  %v2404_v3 = vmul.f32 %v2237_v10, %v2237_v10  ;;  %v2240_v40 = vadd.f32 %v4778_v25, %v2239_v53 }
 0x2b4   : > { %v2355_v45 = vadd.f32 %v2354_v17, %v2353_v15  ;;  %2306 = vst.msk [vmem:[%s4783_s28 + $0xb8] sm:$0xff] %vm559_vm5, %v2248_v46  ;;  %v2407_v58 = vmul.f32 %v2248_v46, %v2248_v46  ;;  %v2459_v62 = vsel %vm559_vm5, %v2406_v37, 0.0  ;;  %v2360_v5 = vsel %vm559_vm5, %v2248_v46, 0.0 }
 0x2b5   : > { %v2455_v20 = vsel %vm559_vm5, %v2404_v3, 0.0  ;;  %2304 = vst.msk [vmem:[%s4783_s28 + $0xa8] sm:$0xff] %vm559_vm5, %v2240_v40  ;;  %v2356_v39 = vsel %vm559_vm5, %v2240_v40, 0.0  ;;  %v2405_v22 = vmul.f32 %v2240_v40, %v2240_v40 }
 0x2b6   : > { %v2456_v61 = vadd.f32 %v2455_v20, %v2454_v18  ;;  %v2357_v21 = vadd.f32 %v2356_v39, %v2355_v45  ;;  %v2461_v41 = vsel %vm559_vm5, %v2407_v58, 0.0 }
 0x2b7   : > { %v2457_v13 = vsel %vm559_vm5, %v2405_v22, 0.0 }
 0x2b8   : > { %v2359_v48 = vadd.f32 %v2358_v34, %v2357_v21  ;;  %v2458_v14 = vadd.f32 %v2457_v13, %v2456_v61 }
 0x2ba   : > { %v2460_v55 = vadd.f32 %v2459_v62, %v2458_v14  ;;  %v2361_v49 = vadd.f32 %v2360_v5, %v2359_v48 }
 0x2bc   : > { %v2462_v8 = vadd.f32 %v2461_v41, %v2460_v55 }
 0x2c7   : > { %v2715_v35 = vpop.f32.mrb[8].mxu1 }
 0x2c8   : > { %v2261_v9 = vadd.f32 %v2715_v35, %v4778_v25  ;;  %v2252_v2 = vpop.f32.mrb[9].mxu1 }
 0x2c9   : > { %v2253_v42 = vadd.f32 %v4778_v25, %v2252_v2  ;;  %v2716_v47 = vpop.f32.mrb[10].mxu1 }
 0x2ca   : > { %2309 = vst.msk [vmem:[%s4783_s28 + $0xd0] sm:$0xff] %vm559_vm5, %v2261_v9  ;;  %v2264_v51 = vadd.f32 %v2716_v47, %v4778_v25  ;;  %v2255_v31 = vpop.f32.mrb[11].mxu1  ;;  %v2410_v7 = vmul.f32 %v2261_v9, %v2261_v9  ;;  %v2366_v36 = vsel %vm559_vm5, %v2261_v9, 0.0 }
 0x2cb   : > { %2307 = vst.msk [vmem:[%s4783_s28 + $0xc0] sm:$0xff] %vm559_vm5, %v2253_v42  ;;  %v2362_v59 = vsel %vm559_vm5, %v2253_v42, 0.0  ;;  %v2408_v43 = vmul.f32 %v2253_v42, %v2253_v42  ;;  %v2256_v11 = vadd.f32 %v4778_v25, %v2255_v31 }
 0x2cc   : > { %v2363_v28 = vadd.f32 %v2362_v59, %v2361_v49  ;;  %2310 = vst.msk [vmem:[%s4783_s28 + $0xd8] sm:$0xff] %vm559_vm5, %v2264_v51  ;;  %v2411_v44 = vmul.f32 %v2264_v51, %v2264_v51  ;;  %v2467_v32 = vsel %vm559_vm5, %v2410_v7, 0.0  ;;  %v2368_v29 = vsel %vm559_vm5, %v2264_v51, 0.0 }
 0x2cd   : > { %v2463_v12 = vsel %vm559_vm5, %v2408_v43, 0.0  ;;  %2308 = vst.msk [vmem:[%s4783_s28 + $0xc8] sm:$0xff] %vm559_vm5, %v2256_v11  ;;  %v2364_v4 = vsel %vm559_vm5, %v2256_v11, 0.0  ;;  %v2409_v16 = vmul.f32 %v2256_v11, %v2256_v11 }
 0x2ce   : > { %v2464_v56 = vadd.f32 %v2463_v12, %v2462_v8  ;;  %v2365_v0 = vadd.f32 %v2364_v4, %v2363_v28  ;;  %v2469_v54 = vsel %vm559_vm5, %v2411_v44, 0.0 }
 0x2cf   : > { %v2465_v6 = vsel %vm559_vm5, %v2409_v16, 0.0 }
 0x2d0   : > { %v2367_v50 = vadd.f32 %v2366_v36, %v2365_v0  ;;  %v2466_v60 = vadd.f32 %v2465_v6, %v2464_v56 }
 0x2d2   : > { %v2468_v57 = vadd.f32 %v2467_v32, %v2466_v60  ;;  %v2369_v30 = vadd.f32 %v2368_v29, %v2367_v50 }
 0x2d4   : > { %v2470_v26 = vadd.f32 %v2469_v54, %v2468_v57 }
 0x2df   : > { %v2719_v1 = vpop.f32.mrb[12].mxu1 }
 0x2e0   : > { %v2277_v52 = vadd.f32 %v2719_v1, %v4778_v25  ;;  %v2268_v24 = vpop.f32.mrb[13].mxu1 }
 0x2e1   : > { %v2269_v38 = vadd.f32 %v4778_v25, %v2268_v24  ;;  %v2720_v15 = vpop.f32.mrb[14].mxu1 }
 0x2e2   : > { %2313 = vst.msk [vmem:[%s4783_s28 + $0xf0] sm:$0xff] %vm559_vm5, %v2277_v52  ;;  %v2280_v63 = vadd.f32 %v2720_v15, %v4778_v25  ;;  %v2271_v18 = vpop.f32.mrb[15].mxu1  ;;  %v2414_v23 = vmul.f32 %v2277_v52, %v2277_v52  ;;  %v2374_v45 = vsel %vm559_vm5, %v2277_v52, 0.0 }
 0x2e3   : > { %2311 = vst.msk [vmem:[%s4783_s28 + $0xe0] sm:$0xff] %vm559_vm5, %v2269_v38  ;;  %v2370_v33 = vsel %vm559_vm5, %v2269_v38, 0.0  ;;  %v2412_v27 = vmul.f32 %v2269_v38, %v2269_v38  ;;  %v2272_v19 = vadd.f32 %v4778_v25, %v2271_v18 }
 0x2e4   : > { %v2371_v10 = vadd.f32 %v2370_v33, %v2369_v30  ;;  %2314 = vst.msk [vmem:[%s4783_s28 + $0xf8] sm:$0xff] %vm559_vm5, %v2280_v63  ;;  %v2415_v37 = vmul.f32 %v2280_v63, %v2280_v63  ;;  %v2475_v22 = vsel %vm559_vm5, %v2414_v23, 0.0  ;;  %v2376_v61 = vsel %vm559_vm5, %v2280_v63, 0.0 }
 0x2e5   : > { %v2471_v46 = vsel %vm559_vm5, %v2412_v27, 0.0  ;;  %2312 = vst.msk [vmem:[%s4783_s28 + $0xe8] sm:$0xff] %vm559_vm5, %v2272_v19  ;;  %v2372_v53 = vsel %vm559_vm5, %v2272_v19, 0.0  ;;  %v2413_v17 = vmul.f32 %v2272_v19, %v2272_v19 }
 0x2e6   : > { %v2472_v3 = vadd.f32 %v2471_v46, %v2470_v26  ;;  %v2373_v40 = vadd.f32 %v2372_v53, %v2371_v10  ;;  %v2477_v58 = vsel %vm559_vm5, %v2415_v37, 0.0 }
 0x2e7   : > { %v2473_v20 = vsel %vm559_vm5, %v2413_v17, 0.0 }
 0x2e8   : > { %v2375_v39 = vadd.f32 %v2374_v45, %v2373_v40  ;;  %v2474_v25 = vadd.f32 %v2473_v20, %v2472_v3 }
 0x2ea   : > { %v2377_v21 = vadd.f32 %v2376_v61, %v2375_v39  ;;  %v2476_v34 = vadd.f32 %v2475_v22, %v2474_v25 }
 0x2ec   : > { %v2378_v13 = vrot.slane %v2377_v21, 4  ;;  %v2478_v48 = vadd.f32 %v2477_v58, %v2476_v34 }
 0x2ee   : > { %v2379_v14 = vadd.f32 %v2378_v13, %v2377_v21  ;;  %v2479_v62 = vrot.slane %v2478_v48, 4 }
 0x2f0   : > { %v2380_v5 = vrot.slane %v2379_v14, 2  ;;  %v2480_v55 = vadd.f32 %v2479_v62, %v2478_v48 }
 0x2f2   : > { %v2381_v49 = vadd.f32 %v2380_v5, %v2379_v14  ;;  %v2481_v41 = vrot.slane %v2480_v55, 2 }
 0x2f4   : > { %v2382_v8 = vrot.slane %v2381_v49, 1  ;;  %v2482_v35 = vadd.f32 %v2481_v41, %v2480_v55 }
 0x2f6   : > { %v2483_v9 = vrot.slane %v2482_v35, 1  ;;  %v2383_v2 = vadd.f32 %v2382_v8, %v2381_v49 }
 0x2f8   : > { %v2484_v42 = vadd.f32 %v2483_v9, %v2482_v35 }
 0x2fa   : > { %v2486_v47 = vsel %vm2485_vm15, %v2383_v2, %v2484_v42 }
 0x2fb   : > { %2488 = vst.msk [vmem:[%s255_s7] sm:$0x3] %vm2487_vm0, %v2486_v47 }
 0x2fc PF: > { %s16_s18 = sadd.s32 1, %s3466_s18  }
 0x2fd   : > { %p13_p4 = scmp.ge.s32.totalorder %s16_s18, 4  }
 0x2ff   :  { %15 = sbr.rel (!%p13_p4) target bundleno = 1 (0x1), region = 83 }

</bundles_post_ra>
